<compile_context>
chip_gen: v7x
topology: tpu7x:2x2x1
jax: 0.10.0
libtpu: 0.0.40
codegen_flags: <defaults>
</compile_context>

<pallas_src>
import jax
import jax.numpy as jnp
import numpy as np
from jax import lax
from jax.experimental import pallas as pl
from jax.experimental.pallas import tpu as pltpu


# --------------------------------------------------------------------------
# Pallas kernel: one whole-image row block per grid step, (rows, W*C) tile.
# --------------------------------------------------------------------------
def make_sce_kernel(H, W, C, rows):
    WC = W * C

    def kernel(blur_ref, event_ref,
               w0a_ref, w0b_ref, b0_ref,
               dwm1_ref, db1_ref, w1_ref, b1_ref,
               dwm2_ref, db2_ref, w2_ref, b2_ref,
               wba_ref, wbb_ref, bb_ref,
               wea_ref, web_ref, be_ref,
               blur_out_ref, event_out_ref):
        blur = blur_ref[...]      # (rows, WC), lane-dense
        event = event_ref[...]    # (rows, WC)

        def conv1x1(x, w_ref, bias_ref):
            # block-diagonal (WC, WC) weight -> one MXU dot
            return (jnp.dot(x, w_ref[...], preferred_element_type=jnp.float32)
                    + bias_ref[...])

        def conv1x1_cat(a, b, wa_ref, wb_ref, bias_ref):
            # split-K form of conv1x1(cat([a, b])): two K=WC dots, no concat
            return (jnp.dot(a, wa_ref[...], preferred_element_type=jnp.float32)
                    + jnp.dot(b, wb_ref[...], preferred_element_type=jnp.float32)
                    + bias_ref[...])

        # Within-image row index (batch is merged into the row axis; images
        # are stacked contiguously so row % H is the image-local row).
        rh = lax.broadcasted_iota(jnp.int32, (rows, WC), 0) % H
        # Height-validity masks: one-sided compares, built once, reused by
        # both depthwise convs.
        hmask = {di: (rh < (H - di)) if di > 0 else (rh >= (-di))
                 for di in (-3, -2, -1, 1, 2, 3)}

        def dwconv7(x, wcm_ref, bias_ref):
            # wcm_ref: (49, WC) combined dw3+dw5+dw7 weight, pre-tiled over W
            # with the width zero-padding mask folded in.  Per-tap (1, WC)
            # loads ride the (idle here) vector-load slots instead of
            # pinning a (49, WC) value in vregs.
            def tap(ki, kj):
                return wcm_ref[pl.ds(ki * 7 + kj, 1), :]        # (1, WC)

            # kj (width) shifts: lane rolls by (kj-3)*C (XLU slot).
            g = [x if kj == 3
                 else pltpu.roll(x, shift=(-(kj - 3) * C) % WC, axis=1)
                 for kj in range(7)]

            def row_sum(ki):
                s = g[0] * tap(ki, 0)
                for kj in range(1, 7):
                    s = s + g[kj] * tap(ki, kj)
                return s

            # ki == 3 (no height shift, no mask) initialises the accumulator.
            acc = row_sum(3)
            for ki in (0, 1, 2, 4, 5, 6):
                di = ki - 3
                inner = row_sum(ki)
                # ki (height) shift: sublane roll + one-sided row mask.
                inner = pltpu.roll(inner, shift=(-di) % rows, axis=0)
                acc = acc + jnp.where(hmask[di], inner, 0.0)
            return acc + bias_ref[...]

        # f_fuse = conv_fuse_0(cat(blur, event))
        f = conv1x1_cat(blur, event, w0a_ref, w0b_ref, b0_ref)
        # f_fuse = conv_fuse_1(dw3_1(f) + dw5_1(f) + dw7_1(f))
        f = conv1x1(dwconv7(f, dwm1_ref, db1_ref), w1_ref, b1_ref)
        # f_fuse = conv_fuse_2(dw3_2(f) + dw5_2(f) + dw7_2(f))
        f = conv1x1(dwconv7(f, dwm2_ref, db2_ref), w2_ref, b2_ref)

        sc = jax.nn.sigmoid(f)

        # blur_en  = conv_fuse_blur(cat(blur * sc,  blur))
        # event_en = conv_fuse_event(cat(event * sc, event))
        blur_out_ref[...] = conv1x1_cat(blur * sc, blur, wba_ref, wbb_ref, bb_ref)
        event_out_ref[...] = conv1x1_cat(event * sc, event, wea_ref, web_ref, be_ref)

    return kernel


# --------------------------------------------------------------------------
# Wrapper
# --------------------------------------------------------------------------
def _default_grid_blocks(N):
    """Merged batch (1 block) on single-TC chips; 2 parallel blocks on v7x."""
    try:
        kind = jax.devices()[0].device_kind.lower()
    except Exception:
        return 1
    if "v7" in kind and N % 2 == 0:
        return 2
    return 1


def spectral_consistency_enhancement(blur, event, kparams, grid_blocks=None):
    N, H, W, C = blur.shape
    WC = W * C
    total_rows = N * H
    if grid_blocks is None:
        grid_blocks = _default_grid_blocks(N)
    if N % grid_blocks != 0:
        grid_blocks = 1
    rows = (N // grid_blocks) * H        # whole images per row block

    blur2 = blur.reshape(total_rows, WC)     # row-major merge, no data movement
    event2 = event.reshape(total_rows, WC)

    img_spec = pl.BlockSpec((rows, WC), lambda i: (i, 0))

    def param_spec(shape):
        zeros = (0,) * len(shape)
        # NOTE: at larger tile sizes add pipeline_mode=pl.Buffered(1) here
        # (constant params never re-fetch) to halve weight VMEM.
        return pl.BlockSpec(shape, lambda i, _z=zeros: _z)

    out_b, out_e = pl.pallas_call(
        make_sce_kernel(H, W, C, rows),
        grid=(grid_blocks,),
        in_specs=[img_spec, img_spec] + [param_spec(p.shape) for p in kparams],
        out_specs=[img_spec, img_spec],
        out_shape=[jax.ShapeDtypeStruct((total_rows, WC), jnp.float32),
                   jax.ShapeDtypeStruct((total_rows, WC), jnp.float32)],
        compiler_params=pltpu.CompilerParams(
            dimension_semantics=("parallel",)),   # row blocks are independent
    )(blur2, event2, *kparams)

    return out_b.reshape(N, H, W, C), out_e.reshape(N, H, W, C)


# --------------------------------------------------------------------------
# Deterministic synthetic parameters (same shapes as the torch module,
# stored as (Cin, Cout) matmul weights / (K, K, C) depthwise weights)
# --------------------------------------------------------------------------
def init_params(key, C):
    names_shapes = [
        ("w0", (2 * C, C)), ("b0", (C,)),
        ("dw3_1", (3, 3, C)), ("b3_1", (C,)),
        ("dw5_1", (5, 5, C)), ("b5_1", (C,)),
        ("dw7_1", (7, 7, C)), ("b7_1", (C,)),
        ("w1", (C, C)), ("b1", (C,)),
        ("dw3_2", (3, 3, C)), ("b3_2", (C,)),
        ("dw5_2", (5, 5, C)), ("b5_2", (C,)),
        ("dw7_2", (7, 7, C)), ("b7_2", (C,)),
        ("w2", (C, C)), ("b2", (C,)),
        ("wb", (2 * C, C)), ("bb", (C,)),
        ("we", (2 * C, C)), ("be", (C,)),
    ]
    keys = jax.random.split(key, len(names_shapes))
    return {name: jax.random.normal(k, shape, jnp.float32) * 0.1
            for (name, shape), k in zip(names_shapes, keys)}


def derive_kernel_params(p, W, C):
    """One-time (outside-kernel) weight transforms; exact up to fp assoc."""
    WC = W * C
    eyeW = jnp.eye(W, dtype=jnp.float32)

    def bd(w_cc):                               # (C, C) -> (WC, WC) block-diag
        return jnp.einsum("jk,cd->jckd", eyeW, w_cc).reshape(WC, WC)

    def brow(b):                                # (C,) -> lane-dense (1, WC)
        return jnp.tile(b, W).reshape(1, WC)

    # width (W) zero-padding validity mask, folded into the dw weights
    kj_off = jnp.arange(7) - 3                  # (7,)
    j_idx = jnp.arange(W)                       # (W,)
    col_valid = ((j_idx[None, :] + kj_off[:, None] >= 0)
                 & (j_idx[None, :] + kj_off[:, None] < W)).astype(jnp.float32)

    def dw_combined(dw3, b3, dw5, b5, dw7, b7):
        w = (jnp.pad(dw3, ((2, 2), (2, 2), (0, 0)))
             + jnp.pad(dw5, ((1, 1), (1, 1), (0, 0)))
             + dw7)                                              # (7, 7, C)
        wcm = w[:, :, None, :] * col_valid[None, :, :, None]     # (7, 7, W, C)
        return wcm.reshape(49, WC), brow(b3 + b5 + b7)

    dwm1, db1 = dw_combined(p["dw3_1"], p["b3_1"], p["dw5_1"], p["b5_1"],
                            p["dw7_1"], p["b7_1"])
    dwm2, db2 = dw_combined(p["dw3_2"], p["b3_2"], p["dw5_2"], p["b5_2"],
                            p["dw7_2"], p["b7_2"])
    return [
        bd(p["w0"][:C]), bd(p["w0"][C:]), brow(p["b0"]),
        dwm1, db1, bd(p["w1"]), brow(p["b1"]),
        dwm2, db2, bd(p["w2"]), brow(p["b2"]),
        bd(p["wb"][:C]), bd(p["wb"][C:]), brow(p["bb"]),
        bd(p["we"][:C]), bd(p["we"][C:]), brow(p["be"]),
    ]


# --------------------------------------------------------------------------
# Pure-JAX reference (faithful translation of the torch forward, NHWC)
# --------------------------------------------------------------------------
def ref_forward(blur, event, p):
    def conv1x1(x, w, b):
        return jnp.einsum("nhwc,cd->nhwd", x, w) + b.reshape(1, 1, 1, -1)

    def dwconv(x, w, b):
        C = x.shape[-1]
        y = lax.conv_general_dilated(
            x, w.reshape(w.shape[0], w.shape[1], 1, C),
            window_strides=(1, 1), padding="SAME",
            dimension_numbers=("NHWC", "HWIO", "NHWC"),
            feature_group_count=C)
        return y + b.reshape(1, 1, 1, -1)

    f = conv1x1(jnp.concatenate([blur, event], -1), p["w0"], p["b0"])
    f = conv1x1(dwconv(f, p["dw3_1"], p["b3_1"])
                + dwconv(f, p["dw5_1"], p["b5_1"])
                + dwconv(f, p["dw7_1"], p["b7_1"]), p["w1"], p["b1"])
    f = conv1x1(dwconv(f, p["dw3_2"], p["b3_2"])
                + dwconv(f, p["dw5_2"], p["b5_2"])
                + dwconv(f, p["dw7_2"], p["b7_2"]), p["w2"], p["b2"])
    sc = jax.nn.sigmoid(f)
    blur_en = conv1x1(jnp.concatenate([blur * sc, blur], -1), p["wb"], p["bb"])
    event_en = conv1x1(jnp.concatenate([event * sc, event], -1), p["we"], p["be"])
    return blur_en, event_en


if __name__ == "__main__":
    N, H, W, C = 2, 16, 16, 8          # W * C = 128 -> exact vreg lane width
    key = jax.random.PRNGKey(0)
    kb, ke, kp = jax.random.split(key, 3)
    blur = jax.random.normal(kb, (N, H, W, C), jnp.float32)
    event = jax.random.normal(ke, (N, H, W, C), jnp.float32)

    raw = init_params(kp, C)
    kparams = derive_kernel_params(raw, W, C)

    blur_en, event_en = spectral_consistency_enhancement(blur, event, kparams)
    jax.block_until_ready((blur_en, event_en))

    ref_b, ref_e = ref_forward(blur, event, raw)
    assert np.allclose(np.asarray(blur_en), np.asarray(ref_b), atol=1e-4, rtol=1e-4)
    assert np.allclose(np.asarray(event_en), np.asarray(ref_e), atol=1e-4, rtol=1e-4)

    print("KERNEL_OK")
</pallas_src>

<mosaic_0001>
module attributes {stable_mosaic.version = 11 : i64} {
  func.func @kernel(%arg0: i32, %arg1: memref<32x128xf32, #tpu.memory_space<vmem>>, %arg2: memref<32x128xf32, #tpu.memory_space<vmem>>, %arg3: memref<128x128xf32, #tpu.memory_space<vmem>>, %arg4: memref<128x128xf32, #tpu.memory_space<vmem>>, %arg5: memref<1x128xf32, #tpu.memory_space<vmem>>, %arg6: memref<49x128xf32, #tpu.memory_space<vmem>>, %arg7: memref<1x128xf32, #tpu.memory_space<vmem>>, %arg8: memref<128x128xf32, #tpu.memory_space<vmem>>, %arg9: memref<1x128xf32, #tpu.memory_space<vmem>>, %arg10: memref<49x128xf32, #tpu.memory_space<vmem>>, %arg11: memref<1x128xf32, #tpu.memory_space<vmem>>, %arg12: memref<128x128xf32, #tpu.memory_space<vmem>>, %arg13: memref<1x128xf32, #tpu.memory_space<vmem>>, %arg14: memref<128x128xf32, #tpu.memory_space<vmem>>, %arg15: memref<128x128xf32, #tpu.memory_space<vmem>>, %arg16: memref<1x128xf32, #tpu.memory_space<vmem>>, %arg17: memref<128x128xf32, #tpu.memory_space<vmem>>, %arg18: memref<128x128xf32, #tpu.memory_space<vmem>>, %arg19: memref<1x128xf32, #tpu.memory_space<vmem>>, %arg20: memref<32x128xf32, #tpu.memory_space<vmem>>, %arg21: memref<32x128xf32, #tpu.memory_space<vmem>>) attributes {dimension_semantics = [#tpu.dimension_semantics<parallel>], iteration_bounds = array<i64: 1>, scalar_prefetch = 0 : i64, scratch_operands = 0 : i64, tpu.core_type = #tpu.core_type<tc>, window_params = [{transform_indices = @transform_0, window_bounds = array<i64: 32, 128>}, {transform_indices = @transform_1, window_bounds = array<i64: 32, 128>}, {pipeline_mode = #tpu.pipeline_mode<synchronous>, transform_indices = @transform_2, window_bounds = array<i64: 128, 128>}, {pipeline_mode = #tpu.pipeline_mode<synchronous>, transform_indices = @transform_3, window_bounds = array<i64: 128, 128>}, {pipeline_mode = #tpu.pipeline_mode<synchronous>, transform_indices = @transform_4, window_bounds = array<i64: 1, 128>}, {pipeline_mode = #tpu.pipeline_mode<synchronous>, transform_indices = @transform_5, window_bounds = array<i64: 49, 128>}, {pipeline_mode = #tpu.pipeline_mode<synchronous>, transform_indices = @transform_6, window_bounds = array<i64: 1, 128>}, {pipeline_mode = #tpu.pipeline_mode<synchronous>, transform_indices = @transform_7, window_bounds = array<i64: 128, 128>}, {pipeline_mode = #tpu.pipeline_mode<synchronous>, transform_indices = @transform_8, window_bounds = array<i64: 1, 128>}, {pipeline_mode = #tpu.pipeline_mode<synchronous>, transform_indices = @transform_9, window_bounds = array<i64: 49, 128>}, {pipeline_mode = #tpu.pipeline_mode<synchronous>, transform_indices = @transform_10, window_bounds = array<i64: 1, 128>}, {pipeline_mode = #tpu.pipeline_mode<synchronous>, transform_indices = @transform_11, window_bounds = array<i64: 128, 128>}, {pipeline_mode = #tpu.pipeline_mode<synchronous>, transform_indices = @transform_12, window_bounds = array<i64: 1, 128>}, {pipeline_mode = #tpu.pipeline_mode<synchronous>, transform_indices = @transform_13, window_bounds = array<i64: 128, 128>}, {pipeline_mode = #tpu.pipeline_mode<synchronous>, transform_indices = @transform_14, window_bounds = array<i64: 128, 128>}, {pipeline_mode = #tpu.pipeline_mode<synchronous>, transform_indices = @transform_15, window_bounds = array<i64: 1, 128>}, {pipeline_mode = #tpu.pipeline_mode<synchronous>, transform_indices = @transform_16, window_bounds = array<i64: 128, 128>}, {pipeline_mode = #tpu.pipeline_mode<synchronous>, transform_indices = @transform_17, window_bounds = array<i64: 128, 128>}, {pipeline_mode = #tpu.pipeline_mode<synchronous>, transform_indices = @transform_18, window_bounds = array<i64: 1, 128>}, {transform_indices = @transform_19, window_bounds = array<i64: 32, 128>}, {transform_indices = @transform_20, window_bounds = array<i64: 32, 128>}]} {
    %c0 = arith.constant 0 : index
    %c0_0 = arith.constant 0 : index
    %0 = vector.load %arg1[%c0, %c0_0] : memref<32x128xf32, #tpu.memory_space<vmem>>, vector<32x128xf32>
    %c0_1 = arith.constant 0 : index
    %c0_2 = arith.constant 0 : index
    %1 = vector.load %arg2[%c0_1, %c0_2] : memref<32x128xf32, #tpu.memory_space<vmem>>, vector<32x128xf32>
    %2 = tpu.iota {dimensions = array<i32: 0>} : vector<32x128xi32>
    %c16_i32 = arith.constant 16 : i32
    %c0_i32 = arith.constant 0 : i32
    %3 = arith.cmpi eq, %c16_i32, %c0_i32 : i32
    %c1_i32 = arith.constant 1 : i32
    %4 = arith.select %3, %c1_i32, %c16_i32 : i32
    %5 = vector.broadcast %4 : i32 to vector<32x128xi32>
    %6 = arith.remsi %2, %5 : vector<32x128xi32>
    %c0_i32_3 = arith.constant 0 : i32
    %7 = vector.broadcast %c0_i32_3 : i32 to vector<32x128xi32>
    %8 = arith.cmpi ne, %6, %7 : vector<32x128xi32>
    %c0_i32_4 = arith.constant 0 : i32
    %9 = vector.broadcast %c0_i32_4 : i32 to vector<32x128xi32>
    %10 = arith.cmpi slt, %6, %9 : vector<32x128xi32>
    %c0_i32_5 = arith.constant 0 : i32
    %11 = arith.cmpi slt, %4, %c0_i32_5 : i32
    %12 = vector.broadcast %11 : i1 to vector<32x128xi1>
    %13 = vector.broadcast %12 : vector<32x128xi1> to vector<32x128xi1>
    %14 = arith.xori %10, %13 : vector<32x128xi1>
    %15 = arith.andi %14, %8 : vector<32x128xi1>
    %16 = vector.broadcast %4 : i32 to vector<32x128xi32>
    %17 = arith.addi %6, %16 : vector<32x128xi32>
    %18 = arith.select %15, %17, %6 : vector<32x128xi1>, vector<32x128xi32>
    %c3_i32 = arith.constant 3 : i32
    %19 = vector.broadcast %c3_i32 : i32 to vector<32x128xi32>
    %20 = arith.cmpi sge, %18, %19 : vector<32x128xi32>
    %c2_i32 = arith.constant 2 : i32
    %21 = vector.broadcast %c2_i32 : i32 to vector<32x128xi32>
    %22 = arith.cmpi sge, %18, %21 : vector<32x128xi32>
    %c1_i32_6 = arith.constant 1 : i32
    %23 = vector.broadcast %c1_i32_6 : i32 to vector<32x128xi32>
    %24 = arith.cmpi sge, %18, %23 : vector<32x128xi32>
    %c15_i32 = arith.constant 15 : i32
    %25 = vector.broadcast %c15_i32 : i32 to vector<32x128xi32>
    %26 = arith.cmpi slt, %18, %25 : vector<32x128xi32>
    %c14_i32 = arith.constant 14 : i32
    %27 = vector.broadcast %c14_i32 : i32 to vector<32x128xi32>
    %28 = arith.cmpi slt, %18, %27 : vector<32x128xi32>
    %c13_i32 = arith.constant 13 : i32
    %29 = vector.broadcast %c13_i32 : i32 to vector<32x128xi32>
    %30 = arith.cmpi slt, %18, %29 : vector<32x128xi32>
    %c0_7 = arith.constant 0 : index
    %c0_8 = arith.constant 0 : index
    %31 = vector.load %arg3[%c0_7, %c0_8] : memref<128x128xf32, #tpu.memory_space<vmem>>, vector<128x128xf32>
    %cst = arith.constant dense<0.000000e+00> : vector<32x128xf32>
    %32 = tpu.matmul %0, %31, %cst {dimension_numbers = #tpu.dot_dimension_numbers<[1], [0], [0], [1], [0, 0, 1, 1], [], []>} : vector<32x128xf32>, vector<128x128xf32>, vector<32x128xf32> -> vector<32x128xf32>
    %c0_9 = arith.constant 0 : index
    %c0_10 = arith.constant 0 : index
    %33 = vector.load %arg4[%c0_9, %c0_10] : memref<128x128xf32, #tpu.memory_space<vmem>>, vector<128x128xf32>
    %cst_11 = arith.constant dense<0.000000e+00> : vector<32x128xf32>
    %34 = tpu.matmul %1, %33, %cst_11 {dimension_numbers = #tpu.dot_dimension_numbers<[1], [0], [0], [1], [0, 0, 1, 1], [], []>} : vector<32x128xf32>, vector<128x128xf32>, vector<32x128xf32> -> vector<32x128xf32>
    %35 = arith.addf %32, %34 : vector<32x128xf32>
    %c0_12 = arith.constant 0 : index
    %c0_13 = arith.constant 0 : index
    %36 = vector.load %arg5[%c0_12, %c0_13] : memref<1x128xf32, #tpu.memory_space<vmem>>, vector<1x128xf32>
    %37 = vector.broadcast %36 : vector<1x128xf32> to vector<32x128xf32>
    %38 = arith.addf %35, %37 : vector<32x128xf32>
    %c24_i32 = arith.constant 24 : i32
    %39 = tpu.dynamic_rotate %38 by %c24_i32 dim 1 : vector<32x128xf32>, i32 -> vector<32x128xf32>
    %c16_i32_14 = arith.constant 16 : i32
    %40 = tpu.dynamic_rotate %38 by %c16_i32_14 dim 1 : vector<32x128xf32>, i32 -> vector<32x128xf32>
    %c8_i32 = arith.constant 8 : i32
    %41 = tpu.dynamic_rotate %38 by %c8_i32 dim 1 : vector<32x128xf32>, i32 -> vector<32x128xf32>
    %c120_i32 = arith.constant 120 : i32
    %42 = tpu.dynamic_rotate %38 by %c120_i32 dim 1 : vector<32x128xf32>, i32 -> vector<32x128xf32>
    %c112_i32 = arith.constant 112 : i32
    %43 = tpu.dynamic_rotate %38 by %c112_i32 dim 1 : vector<32x128xf32>, i32 -> vector<32x128xf32>
    %c104_i32 = arith.constant 104 : i32
    %44 = tpu.dynamic_rotate %38 by %c104_i32 dim 1 : vector<32x128xf32>, i32 -> vector<32x128xf32>
    %c21 = arith.constant 21 : index
    %c0_15 = arith.constant 0 : index
    %45 = vector.load %arg6[%c21, %c0_15] : memref<49x128xf32, #tpu.memory_space<vmem>>, vector<1x128xf32>
    %46 = vector.broadcast %45 : vector<1x128xf32> to vector<32x128xf32>
    %47 = arith.mulf %39, %46 : vector<32x128xf32>
    %c22 = arith.constant 22 : index
    %c0_16 = arith.constant 0 : index
    %48 = vector.load %arg6[%c22, %c0_16] : memref<49x128xf32, #tpu.memory_space<vmem>>, vector<1x128xf32>
    %49 = vector.broadcast %48 : vector<1x128xf32> to vector<32x128xf32>
    %50 = arith.mulf %40, %49 : vector<32x128xf32>
    %51 = arith.addf %47, %50 : vector<32x128xf32>
    %c23 = arith.constant 23 : index
    %c0_17 = arith.constant 0 : index
    %52 = vector.load %arg6[%c23, %c0_17] : memref<49x128xf32, #tpu.memory_space<vmem>>, vector<1x128xf32>
    %53 = vector.broadcast %52 : vector<1x128xf32> to vector<32x128xf32>
    %54 = arith.mulf %41, %53 : vector<32x128xf32>
    %55 = arith.addf %51, %54 : vector<32x128xf32>
    %c24 = arith.constant 24 : index
    %c0_18 = arith.constant 0 : index
    %56 = vector.load %arg6[%c24, %c0_18] : memref<49x128xf32, #tpu.memory_space<vmem>>, vector<1x128xf32>
    %57 = vector.broadcast %56 : vector<1x128xf32> to vector<32x128xf32>
    %58 = arith.mulf %38, %57 : vector<32x128xf32>
    %59 = arith.addf %55, %58 : vector<32x128xf32>
    %c25 = arith.constant 25 : index
    %c0_19 = arith.constant 0 : index
    %60 = vector.load %arg6[%c25, %c0_19] : memref<49x128xf32, #tpu.memory_space<vmem>>, vector<1x128xf32>
    %61 = vector.broadcast %60 : vector<1x128xf32> to vector<32x128xf32>
    %62 = arith.mulf %42, %61 : vector<32x128xf32>
    %63 = arith.addf %59, %62 : vector<32x128xf32>
    %c26 = arith.constant 26 : index
    %c0_20 = arith.constant 0 : index
    %64 = vector.load %arg6[%c26, %c0_20] : memref<49x128xf32, #tpu.memory_space<vmem>>, vector<1x128xf32>
    %65 = vector.broadcast %64 : vector<1x128xf32> to vector<32x128xf32>
    %66 = arith.mulf %43, %65 : vector<32x128xf32>
    %67 = arith.addf %63, %66 : vector<32x128xf32>
    %c27 = arith.constant 27 : index
    %c0_21 = arith.constant 0 : index
    %68 = vector.load %arg6[%c27, %c0_21] : memref<49x128xf32, #tpu.memory_space<vmem>>, vector<1x128xf32>
    %69 = vector.broadcast %68 : vector<1x128xf32> to vector<32x128xf32>
    %70 = arith.mulf %44, %69 : vector<32x128xf32>
    %71 = arith.addf %67, %70 : vector<32x128xf32>
    %c0_22 = arith.constant 0 : index
    %c0_23 = arith.constant 0 : index
    %72 = vector.load %arg6[%c0_22, %c0_23] : memref<49x128xf32, #tpu.memory_space<vmem>>, vector<1x128xf32>
    %73 = vector.broadcast %72 : vector<1x128xf32> to vector<32x128xf32>
    %74 = arith.mulf %39, %73 : vector<32x128xf32>
    %c1 = arith.constant 1 : index
    %c0_24 = arith.constant 0 : index
    %75 = vector.load %arg6[%c1, %c0_24] : memref<49x128xf32, #tpu.memory_space<vmem>>, vector<1x128xf32>
    %76 = vector.broadcast %75 : vector<1x128xf32> to vector<32x128xf32>
    %77 = arith.mulf %40, %76 : vector<32x128xf32>
    %78 = arith.addf %74, %77 : vector<32x128xf32>
    %c2 = arith.constant 2 : index
    %c0_25 = arith.constant 0 : index
    %79 = vector.load %arg6[%c2, %c0_25] : memref<49x128xf32, #tpu.memory_space<vmem>>, vector<1x128xf32>
    %80 = vector.broadcast %79 : vector<1x128xf32> to vector<32x128xf32>
    %81 = arith.mulf %41, %80 : vector<32x128xf32>
    %82 = arith.addf %78, %81 : vector<32x128xf32>
    %c3 = arith.constant 3 : index
    %c0_26 = arith.constant 0 : index
    %83 = vector.load %arg6[%c3, %c0_26] : memref<49x128xf32, #tpu.memory_space<vmem>>, vector<1x128xf32>
    %84 = vector.broadcast %83 : vector<1x128xf32> to vector<32x128xf32>
    %85 = arith.mulf %38, %84 : vector<32x128xf32>
    %86 = arith.addf %82, %85 : vector<32x128xf32>
    %c4 = arith.constant 4 : index
    %c0_27 = arith.constant 0 : index
    %87 = vector.load %arg6[%c4, %c0_27] : memref<49x128xf32, #tpu.memory_space<vmem>>, vector<1x128xf32>
    %88 = vector.broadcast %87 : vector<1x128xf32> to vector<32x128xf32>
    %89 = arith.mulf %42, %88 : vector<32x128xf32>
    %90 = arith.addf %86, %89 : vector<32x128xf32>
    %c5 = arith.constant 5 : index
    %c0_28 = arith.constant 0 : index
    %91 = vector.load %arg6[%c5, %c0_28] : memref<49x128xf32, #tpu.memory_space<vmem>>, vector<1x128xf32>
    %92 = vector.broadcast %91 : vector<1x128xf32> to vector<32x128xf32>
    %93 = arith.mulf %43, %92 : vector<32x128xf32>
    %94 = arith.addf %90, %93 : vector<32x128xf32>
    %c6 = arith.constant 6 : index
    %c0_29 = arith.constant 0 : index
    %95 = vector.load %arg6[%c6, %c0_29] : memref<49x128xf32, #tpu.memory_space<vmem>>, vector<1x128xf32>
    %96 = vector.broadcast %95 : vector<1x128xf32> to vector<32x128xf32>
    %97 = arith.mulf %44, %96 : vector<32x128xf32>
    %98 = arith.addf %94, %97 : vector<32x128xf32>
    %c3_i32_30 = arith.constant 3 : i32
    %99 = tpu.dynamic_rotate %98 by %c3_i32_30 dim 0 : vector<32x128xf32>, i32 -> vector<32x128xf32>
    %cst_31 = arith.constant 0.000000e+00 : f32
    %100 = vector.broadcast %cst_31 : f32 to vector<32x128xf32>
    %101 = arith.select %20, %99, %100 : vector<32x128xi1>, vector<32x128xf32>
    %102 = arith.addf %71, %101 : vector<32x128xf32>
    %c7 = arith.constant 7 : index
    %c0_32 = arith.constant 0 : index
    %103 = vector.load %arg6[%c7, %c0_32] : memref<49x128xf32, #tpu.memory_space<vmem>>, vector<1x128xf32>
    %104 = vector.broadcast %103 : vector<1x128xf32> to vector<32x128xf32>
    %105 = arith.mulf %39, %104 : vector<32x128xf32>
    %c8 = arith.constant 8 : index
    %c0_33 = arith.constant 0 : index
    %106 = vector.load %arg6[%c8, %c0_33] : memref<49x128xf32, #tpu.memory_space<vmem>>, vector<1x128xf32>
    %107 = vector.broadcast %106 : vector<1x128xf32> to vector<32x128xf32>
    %108 = arith.mulf %40, %107 : vector<32x128xf32>
    %109 = arith.addf %105, %108 : vector<32x128xf32>
    %c9 = arith.constant 9 : index
    %c0_34 = arith.constant 0 : index
    %110 = vector.load %arg6[%c9, %c0_34] : memref<49x128xf32, #tpu.memory_space<vmem>>, vector<1x128xf32>
    %111 = vector.broadcast %110 : vector<1x128xf32> to vector<32x128xf32>
    %112 = arith.mulf %41, %111 : vector<32x128xf32>
    %113 = arith.addf %109, %112 : vector<32x128xf32>
    %c10 = arith.constant 10 : index
    %c0_35 = arith.constant 0 : index
    %114 = vector.load %arg6[%c10, %c0_35] : memref<49x128xf32, #tpu.memory_space<vmem>>, vector<1x128xf32>
    %115 = vector.broadcast %114 : vector<1x128xf32> to vector<32x128xf32>
    %116 = arith.mulf %38, %115 : vector<32x128xf32>
    %117 = arith.addf %113, %116 : vector<32x128xf32>
    %c11 = arith.constant 11 : index
    %c0_36 = arith.constant 0 : index
    %118 = vector.load %arg6[%c11, %c0_36] : memref<49x128xf32, #tpu.memory_space<vmem>>, vector<1x128xf32>
    %119 = vector.broadcast %118 : vector<1x128xf32> to vector<32x128xf32>
    %120 = arith.mulf %42, %119 : vector<32x128xf32>
    %121 = arith.addf %117, %120 : vector<32x128xf32>
    %c12 = arith.constant 12 : index
    %c0_37 = arith.constant 0 : index
    %122 = vector.load %arg6[%c12, %c0_37] : memref<49x128xf32, #tpu.memory_space<vmem>>, vector<1x128xf32>
    %123 = vector.broadcast %122 : vector<1x128xf32> to vector<32x128xf32>
    %124 = arith.mulf %43, %123 : vector<32x128xf32>
    %125 = arith.addf %121, %124 : vector<32x128xf32>
    %c13 = arith.constant 13 : index
    %c0_38 = arith.constant 0 : index
    %126 = vector.load %arg6[%c13, %c0_38] : memref<49x128xf32, #tpu.memory_space<vmem>>, vector<1x128xf32>
    %127 = vector.broadcast %126 : vector<1x128xf32> to vector<32x128xf32>
    %128 = arith.mulf %44, %127 : vector<32x128xf32>
    %129 = arith.addf %125, %128 : vector<32x128xf32>
    %c2_i32_39 = arith.constant 2 : i32
    %130 = tpu.dynamic_rotate %129 by %c2_i32_39 dim 0 : vector<32x128xf32>, i32 -> vector<32x128xf32>
    %cst_40 = arith.constant 0.000000e+00 : f32
    %131 = vector.broadcast %cst_40 : f32 to vector<32x128xf32>
    %132 = arith.select %22, %130, %131 : vector<32x128xi1>, vector<32x128xf32>
    %133 = arith.addf %102, %132 : vector<32x128xf32>
    %c14 = arith.constant 14 : index
    %c0_41 = arith.constant 0 : index
    %134 = vector.load %arg6[%c14, %c0_41] : memref<49x128xf32, #tpu.memory_space<vmem>>, vector<1x128xf32>
    %135 = vector.broadcast %134 : vector<1x128xf32> to vector<32x128xf32>
    %136 = arith.mulf %39, %135 : vector<32x128xf32>
    %c15 = arith.constant 15 : index
    %c0_42 = arith.constant 0 : index
    %137 = vector.load %arg6[%c15, %c0_42] : memref<49x128xf32, #tpu.memory_space<vmem>>, vector<1x128xf32>
    %138 = vector.broadcast %137 : vector<1x128xf32> to vector<32x128xf32>
    %139 = arith.mulf %40, %138 : vector<32x128xf32>
    %140 = arith.addf %136, %139 : vector<32x128xf32>
    %c16 = arith.constant 16 : index
    %c0_43 = arith.constant 0 : index
    %141 = vector.load %arg6[%c16, %c0_43] : memref<49x128xf32, #tpu.memory_space<vmem>>, vector<1x128xf32>
    %142 = vector.broadcast %141 : vector<1x128xf32> to vector<32x128xf32>
    %143 = arith.mulf %41, %142 : vector<32x128xf32>
    %144 = arith.addf %140, %143 : vector<32x128xf32>
    %c17 = arith.constant 17 : index
    %c0_44 = arith.constant 0 : index
    %145 = vector.load %arg6[%c17, %c0_44] : memref<49x128xf32, #tpu.memory_space<vmem>>, vector<1x128xf32>
    %146 = vector.broadcast %145 : vector<1x128xf32> to vector<32x128xf32>
    %147 = arith.mulf %38, %146 : vector<32x128xf32>
    %148 = arith.addf %144, %147 : vector<32x128xf32>
    %c18 = arith.constant 18 : index
    %c0_45 = arith.constant 0 : index
    %149 = vector.load %arg6[%c18, %c0_45] : memref<49x128xf32, #tpu.memory_space<vmem>>, vector<1x128xf32>
    %150 = vector.broadcast %149 : vector<1x128xf32> to vector<32x128xf32>
    %151 = arith.mulf %42, %150 : vector<32x128xf32>
    %152 = arith.addf %148, %151 : vector<32x128xf32>
    %c19 = arith.constant 19 : index
    %c0_46 = arith.constant 0 : index
    %153 = vector.load %arg6[%c19, %c0_46] : memref<49x128xf32, #tpu.memory_space<vmem>>, vector<1x128xf32>
    %154 = vector.broadcast %153 : vector<1x128xf32> to vector<32x128xf32>
    %155 = arith.mulf %43, %154 : vector<32x128xf32>
    %156 = arith.addf %152, %155 : vector<32x128xf32>
    %c20 = arith.constant 20 : index
    %c0_47 = arith.constant 0 : index
    %157 = vector.load %arg6[%c20, %c0_47] : memref<49x128xf32, #tpu.memory_space<vmem>>, vector<1x128xf32>
    %158 = vector.broadcast %157 : vector<1x128xf32> to vector<32x128xf32>
    %159 = arith.mulf %44, %158 : vector<32x128xf32>
    %160 = arith.addf %156, %159 : vector<32x128xf32>
    %c1_i32_48 = arith.constant 1 : i32
    %161 = tpu.dynamic_rotate %160 by %c1_i32_48 dim 0 : vector<32x128xf32>, i32 -> vector<32x128xf32>
    %cst_49 = arith.constant 0.000000e+00 : f32
    %162 = vector.broadcast %cst_49 : f32 to vector<32x128xf32>
    %163 = arith.select %24, %161, %162 : vector<32x128xi1>, vector<32x128xf32>
    %164 = arith.addf %133, %163 : vector<32x128xf32>
    %c28 = arith.constant 28 : index
    %c0_50 = arith.constant 0 : index
    %165 = vector.load %arg6[%c28, %c0_50] : memref<49x128xf32, #tpu.memory_space<vmem>>, vector<1x128xf32>
    %166 = vector.broadcast %165 : vector<1x128xf32> to vector<32x128xf32>
    %167 = arith.mulf %39, %166 : vector<32x128xf32>
    %c29 = arith.constant 29 : index
    %c0_51 = arith.constant 0 : index
    %168 = vector.load %arg6[%c29, %c0_51] : memref<49x128xf32, #tpu.memory_space<vmem>>, vector<1x128xf32>
    %169 = vector.broadcast %168 : vector<1x128xf32> to vector<32x128xf32>
    %170 = arith.mulf %40, %169 : vector<32x128xf32>
    %171 = arith.addf %167, %170 : vector<32x128xf32>
    %c30 = arith.constant 30 : index
    %c0_52 = arith.constant 0 : index
    %172 = vector.load %arg6[%c30, %c0_52] : memref<49x128xf32, #tpu.memory_space<vmem>>, vector<1x128xf32>
    %173 = vector.broadcast %172 : vector<1x128xf32> to vector<32x128xf32>
    %174 = arith.mulf %41, %173 : vector<32x128xf32>
    %175 = arith.addf %171, %174 : vector<32x128xf32>
    %c31 = arith.constant 31 : index
    %c0_53 = arith.constant 0 : index
    %176 = vector.load %arg6[%c31, %c0_53] : memref<49x128xf32, #tpu.memory_space<vmem>>, vector<1x128xf32>
    %177 = vector.broadcast %176 : vector<1x128xf32> to vector<32x128xf32>
    %178 = arith.mulf %38, %177 : vector<32x128xf32>
    %179 = arith.addf %175, %178 : vector<32x128xf32>
    %c32 = arith.constant 32 : index
    %c0_54 = arith.constant 0 : index
    %180 = vector.load %arg6[%c32, %c0_54] : memref<49x128xf32, #tpu.memory_space<vmem>>, vector<1x128xf32>
    %181 = vector.broadcast %180 : vector<1x128xf32> to vector<32x128xf32>
    %182 = arith.mulf %42, %181 : vector<32x128xf32>
    %183 = arith.addf %179, %182 : vector<32x128xf32>
    %c33 = arith.constant 33 : index
    %c0_55 = arith.constant 0 : index
    %184 = vector.load %arg6[%c33, %c0_55] : memref<49x128xf32, #tpu.memory_space<vmem>>, vector<1x128xf32>
    %185 = vector.broadcast %184 : vector<1x128xf32> to vector<32x128xf32>
    %186 = arith.mulf %43, %185 : vector<32x128xf32>
    %187 = arith.addf %183, %186 : vector<32x128xf32>
    %c34 = arith.constant 34 : index
    %c0_56 = arith.constant 0 : index
    %188 = vector.load %arg6[%c34, %c0_56] : memref<49x128xf32, #tpu.memory_space<vmem>>, vector<1x128xf32>
    %189 = vector.broadcast %188 : vector<1x128xf32> to vector<32x128xf32>
    %190 = arith.mulf %44, %189 : vector<32x128xf32>
    %191 = arith.addf %187, %190 : vector<32x128xf32>
    %c31_i32 = arith.constant 31 : i32
    %192 = tpu.dynamic_rotate %191 by %c31_i32 dim 0 : vector<32x128xf32>, i32 -> vector<32x128xf32>
    %cst_57 = arith.constant 0.000000e+00 : f32
    %193 = vector.broadcast %cst_57 : f32 to vector<32x128xf32>
    %194 = arith.select %26, %192, %193 : vector<32x128xi1>, vector<32x128xf32>
    %195 = arith.addf %164, %194 : vector<32x128xf32>
    %c35 = arith.constant 35 : index
    %c0_58 = arith.constant 0 : index
    %196 = vector.load %arg6[%c35, %c0_58] : memref<49x128xf32, #tpu.memory_space<vmem>>, vector<1x128xf32>
    %197 = vector.broadcast %196 : vector<1x128xf32> to vector<32x128xf32>
    %198 = arith.mulf %39, %197 : vector<32x128xf32>
    %c36 = arith.constant 36 : index
    %c0_59 = arith.constant 0 : index
    %199 = vector.load %arg6[%c36, %c0_59] : memref<49x128xf32, #tpu.memory_space<vmem>>, vector<1x128xf32>
    %200 = vector.broadcast %199 : vector<1x128xf32> to vector<32x128xf32>
    %201 = arith.mulf %40, %200 : vector<32x128xf32>
    %202 = arith.addf %198, %201 : vector<32x128xf32>
    %c37 = arith.constant 37 : index
    %c0_60 = arith.constant 0 : index
    %203 = vector.load %arg6[%c37, %c0_60] : memref<49x128xf32, #tpu.memory_space<vmem>>, vector<1x128xf32>
    %204 = vector.broadcast %203 : vector<1x128xf32> to vector<32x128xf32>
    %205 = arith.mulf %41, %204 : vector<32x128xf32>
    %206 = arith.addf %202, %205 : vector<32x128xf32>
    %c38 = arith.constant 38 : index
    %c0_61 = arith.constant 0 : index
    %207 = vector.load %arg6[%c38, %c0_61] : memref<49x128xf32, #tpu.memory_space<vmem>>, vector<1x128xf32>
    %208 = vector.broadcast %207 : vector<1x128xf32> to vector<32x128xf32>
    %209 = arith.mulf %38, %208 : vector<32x128xf32>
    %210 = arith.addf %206, %209 : vector<32x128xf32>
    %c39 = arith.constant 39 : index
    %c0_62 = arith.constant 0 : index
    %211 = vector.load %arg6[%c39, %c0_62] : memref<49x128xf32, #tpu.memory_space<vmem>>, vector<1x128xf32>
    %212 = vector.broadcast %211 : vector<1x128xf32> to vector<32x128xf32>
    %213 = arith.mulf %42, %212 : vector<32x128xf32>
    %214 = arith.addf %210, %213 : vector<32x128xf32>
    %c40 = arith.constant 40 : index
    %c0_63 = arith.constant 0 : index
    %215 = vector.load %arg6[%c40, %c0_63] : memref<49x128xf32, #tpu.memory_space<vmem>>, vector<1x128xf32>
    %216 = vector.broadcast %215 : vector<1x128xf32> to vector<32x128xf32>
    %217 = arith.mulf %43, %216 : vector<32x128xf32>
    %218 = arith.addf %214, %217 : vector<32x128xf32>
    %c41 = arith.constant 41 : index
    %c0_64 = arith.constant 0 : index
    %219 = vector.load %arg6[%c41, %c0_64] : memref<49x128xf32, #tpu.memory_space<vmem>>, vector<1x128xf32>
    %220 = vector.broadcast %219 : vector<1x128xf32> to vector<32x128xf32>
    %221 = arith.mulf %44, %220 : vector<32x128xf32>
    %222 = arith.addf %218, %221 : vector<32x128xf32>
    %c30_i32 = arith.constant 30 : i32
    %223 = tpu.dynamic_rotate %222 by %c30_i32 dim 0 : vector<32x128xf32>, i32 -> vector<32x128xf32>
    %cst_65 = arith.constant 0.000000e+00 : f32
    %224 = vector.broadcast %cst_65 : f32 to vector<32x128xf32>
    %225 = arith.select %28, %223, %224 : vector<32x128xi1>, vector<32x128xf32>
    %226 = arith.addf %195, %225 : vector<32x128xf32>
    %c42 = arith.constant 42 : index
    %c0_66 = arith.constant 0 : index
    %227 = vector.load %arg6[%c42, %c0_66] : memref<49x128xf32, #tpu.memory_space<vmem>>, vector<1x128xf32>
    %228 = vector.broadcast %227 : vector<1x128xf32> to vector<32x128xf32>
    %229 = arith.mulf %39, %228 : vector<32x128xf32>
    %c43 = arith.constant 43 : index
    %c0_67 = arith.constant 0 : index
    %230 = vector.load %arg6[%c43, %c0_67] : memref<49x128xf32, #tpu.memory_space<vmem>>, vector<1x128xf32>
    %231 = vector.broadcast %230 : vector<1x128xf32> to vector<32x128xf32>
    %232 = arith.mulf %40, %231 : vector<32x128xf32>
    %233 = arith.addf %229, %232 : vector<32x128xf32>
    %c44 = arith.constant 44 : index
    %c0_68 = arith.constant 0 : index
    %234 = vector.load %arg6[%c44, %c0_68] : memref<49x128xf32, #tpu.memory_space<vmem>>, vector<1x128xf32>
    %235 = vector.broadcast %234 : vector<1x128xf32> to vector<32x128xf32>
    %236 = arith.mulf %41, %235 : vector<32x128xf32>
    %237 = arith.addf %233, %236 : vector<32x128xf32>
    %c45 = arith.constant 45 : index
    %c0_69 = arith.constant 0 : index
    %238 = vector.load %arg6[%c45, %c0_69] : memref<49x128xf32, #tpu.memory_space<vmem>>, vector<1x128xf32>
    %239 = vector.broadcast %238 : vector<1x128xf32> to vector<32x128xf32>
    %240 = arith.mulf %38, %239 : vector<32x128xf32>
    %241 = arith.addf %237, %240 : vector<32x128xf32>
    %c46 = arith.constant 46 : index
    %c0_70 = arith.constant 0 : index
    %242 = vector.load %arg6[%c46, %c0_70] : memref<49x128xf32, #tpu.memory_space<vmem>>, vector<1x128xf32>
    %243 = vector.broadcast %242 : vector<1x128xf32> to vector<32x128xf32>
    %244 = arith.mulf %42, %243 : vector<32x128xf32>
    %245 = arith.addf %241, %244 : vector<32x128xf32>
    %c47 = arith.constant 47 : index
    %c0_71 = arith.constant 0 : index
    %246 = vector.load %arg6[%c47, %c0_71] : memref<49x128xf32, #tpu.memory_space<vmem>>, vector<1x128xf32>
    %247 = vector.broadcast %246 : vector<1x128xf32> to vector<32x128xf32>
    %248 = arith.mulf %43, %247 : vector<32x128xf32>
    %249 = arith.addf %245, %248 : vector<32x128xf32>
    %c48 = arith.constant 48 : index
    %c0_72 = arith.constant 0 : index
    %250 = vector.load %arg6[%c48, %c0_72] : memref<49x128xf32, #tpu.memory_space<vmem>>, vector<1x128xf32>
    %251 = vector.broadcast %250 : vector<1x128xf32> to vector<32x128xf32>
    %252 = arith.mulf %44, %251 : vector<32x128xf32>
    %253 = arith.addf %249, %252 : vector<32x128xf32>
    %c29_i32 = arith.constant 29 : i32
    %254 = tpu.dynamic_rotate %253 by %c29_i32 dim 0 : vector<32x128xf32>, i32 -> vector<32x128xf32>
    %cst_73 = arith.constant 0.000000e+00 : f32
    %255 = vector.broadcast %cst_73 : f32 to vector<32x128xf32>
    %256 = arith.select %30, %254, %255 : vector<32x128xi1>, vector<32x128xf32>
    %257 = arith.addf %226, %256 : vector<32x128xf32>
    %c0_74 = arith.constant 0 : index
    %c0_75 = arith.constant 0 : index
    %258 = vector.load %arg7[%c0_74, %c0_75] : memref<1x128xf32, #tpu.memory_space<vmem>>, vector<1x128xf32>
    %259 = vector.broadcast %258 : vector<1x128xf32> to vector<32x128xf32>
    %260 = arith.addf %257, %259 : vector<32x128xf32>
    %c0_76 = arith.constant 0 : index
    %c0_77 = arith.constant 0 : index
    %261 = vector.load %arg8[%c0_76, %c0_77] : memref<128x128xf32, #tpu.memory_space<vmem>>, vector<128x128xf32>
    %cst_78 = arith.constant dense<0.000000e+00> : vector<32x128xf32>
    %262 = tpu.matmul %260, %261, %cst_78 {dimension_numbers = #tpu.dot_dimension_numbers<[1], [0], [0], [1], [0, 0, 1, 1], [], []>} : vector<32x128xf32>, vector<128x128xf32>, vector<32x128xf32> -> vector<32x128xf32>
    %c0_79 = arith.constant 0 : index
    %c0_80 = arith.constant 0 : index
    %263 = vector.load %arg9[%c0_79, %c0_80] : memref<1x128xf32, #tpu.memory_space<vmem>>, vector<1x128xf32>
    %264 = vector.broadcast %263 : vector<1x128xf32> to vector<32x128xf32>
    %265 = arith.addf %262, %264 : vector<32x128xf32>
    %c24_i32_81 = arith.constant 24 : i32
    %266 = tpu.dynamic_rotate %265 by %c24_i32_81 dim 1 : vector<32x128xf32>, i32 -> vector<32x128xf32>
    %c16_i32_82 = arith.constant 16 : i32
    %267 = tpu.dynamic_rotate %265 by %c16_i32_82 dim 1 : vector<32x128xf32>, i32 -> vector<32x128xf32>
    %c8_i32_83 = arith.constant 8 : i32
    %268 = tpu.dynamic_rotate %265 by %c8_i32_83 dim 1 : vector<32x128xf32>, i32 -> vector<32x128xf32>
    %c120_i32_84 = arith.constant 120 : i32
    %269 = tpu.dynamic_rotate %265 by %c120_i32_84 dim 1 : vector<32x128xf32>, i32 -> vector<32x128xf32>
    %c112_i32_85 = arith.constant 112 : i32
    %270 = tpu.dynamic_rotate %265 by %c112_i32_85 dim 1 : vector<32x128xf32>, i32 -> vector<32x128xf32>
    %c104_i32_86 = arith.constant 104 : i32
    %271 = tpu.dynamic_rotate %265 by %c104_i32_86 dim 1 : vector<32x128xf32>, i32 -> vector<32x128xf32>
    %c21_87 = arith.constant 21 : index
    %c0_88 = arith.constant 0 : index
    %272 = vector.load %arg10[%c21_87, %c0_88] : memref<49x128xf32, #tpu.memory_space<vmem>>, vector<1x128xf32>
    %273 = vector.broadcast %272 : vector<1x128xf32> to vector<32x128xf32>
    %274 = arith.mulf %266, %273 : vector<32x128xf32>
    %c22_89 = arith.constant 22 : index
    %c0_90 = arith.constant 0 : index
    %275 = vector.load %arg10[%c22_89, %c0_90] : memref<49x128xf32, #tpu.memory_space<vmem>>, vector<1x128xf32>
    %276 = vector.broadcast %275 : vector<1x128xf32> to vector<32x128xf32>
    %277 = arith.mulf %267, %276 : vector<32x128xf32>
    %278 = arith.addf %274, %277 : vector<32x128xf32>
    %c23_91 = arith.constant 23 : index
    %c0_92 = arith.constant 0 : index
    %279 = vector.load %arg10[%c23_91, %c0_92] : memref<49x128xf32, #tpu.memory_space<vmem>>, vector<1x128xf32>
    %280 = vector.broadcast %279 : vector<1x128xf32> to vector<32x128xf32>
    %281 = arith.mulf %268, %280 : vector<32x128xf32>
    %282 = arith.addf %278, %281 : vector<32x128xf32>
    %c24_93 = arith.constant 24 : index
    %c0_94 = arith.constant 0 : index
    %283 = vector.load %arg10[%c24_93, %c0_94] : memref<49x128xf32, #tpu.memory_space<vmem>>, vector<1x128xf32>
    %284 = vector.broadcast %283 : vector<1x128xf32> to vector<32x128xf32>
    %285 = arith.mulf %265, %284 : vector<32x128xf32>
    %286 = arith.addf %282, %285 : vector<32x128xf32>
    %c25_95 = arith.constant 25 : index
    %c0_96 = arith.constant 0 : index
    %287 = vector.load %arg10[%c25_95, %c0_96] : memref<49x128xf32, #tpu.memory_space<vmem>>, vector<1x128xf32>
    %288 = vector.broadcast %287 : vector<1x128xf32> to vector<32x128xf32>
    %289 = arith.mulf %269, %288 : vector<32x128xf32>
    %290 = arith.addf %286, %289 : vector<32x128xf32>
    %c26_97 = arith.constant 26 : index
    %c0_98 = arith.constant 0 : index
    %291 = vector.load %arg10[%c26_97, %c0_98] : memref<49x128xf32, #tpu.memory_space<vmem>>, vector<1x128xf32>
    %292 = vector.broadcast %291 : vector<1x128xf32> to vector<32x128xf32>
    %293 = arith.mulf %270, %292 : vector<32x128xf32>
    %294 = arith.addf %290, %293 : vector<32x128xf32>
    %c27_99 = arith.constant 27 : index
    %c0_100 = arith.constant 0 : index
    %295 = vector.load %arg10[%c27_99, %c0_100] : memref<49x128xf32, #tpu.memory_space<vmem>>, vector<1x128xf32>
    %296 = vector.broadcast %295 : vector<1x128xf32> to vector<32x128xf32>
    %297 = arith.mulf %271, %296 : vector<32x128xf32>
    %298 = arith.addf %294, %297 : vector<32x128xf32>
    %c0_101 = arith.constant 0 : index
    %c0_102 = arith.constant 0 : index
    %299 = vector.load %arg10[%c0_101, %c0_102] : memref<49x128xf32, #tpu.memory_space<vmem>>, vector<1x128xf32>
    %300 = vector.broadcast %299 : vector<1x128xf32> to vector<32x128xf32>
    %301 = arith.mulf %266, %300 : vector<32x128xf32>
    %c1_103 = arith.constant 1 : index
    %c0_104 = arith.constant 0 : index
    %302 = vector.load %arg10[%c1_103, %c0_104] : memref<49x128xf32, #tpu.memory_space<vmem>>, vector<1x128xf32>
    %303 = vector.broadcast %302 : vector<1x128xf32> to vector<32x128xf32>
    %304 = arith.mulf %267, %303 : vector<32x128xf32>
    %305 = arith.addf %301, %304 : vector<32x128xf32>
    %c2_105 = arith.constant 2 : index
    %c0_106 = arith.constant 0 : index
    %306 = vector.load %arg10[%c2_105, %c0_106] : memref<49x128xf32, #tpu.memory_space<vmem>>, vector<1x128xf32>
    %307 = vector.broadcast %306 : vector<1x128xf32> to vector<32x128xf32>
    %308 = arith.mulf %268, %307 : vector<32x128xf32>
    %309 = arith.addf %305, %308 : vector<32x128xf32>
    %c3_107 = arith.constant 3 : index
    %c0_108 = arith.constant 0 : index
    %310 = vector.load %arg10[%c3_107, %c0_108] : memref<49x128xf32, #tpu.memory_space<vmem>>, vector<1x128xf32>
    %311 = vector.broadcast %310 : vector<1x128xf32> to vector<32x128xf32>
    %312 = arith.mulf %265, %311 : vector<32x128xf32>
    %313 = arith.addf %309, %312 : vector<32x128xf32>
    %c4_109 = arith.constant 4 : index
    %c0_110 = arith.constant 0 : index
    %314 = vector.load %arg10[%c4_109, %c0_110] : memref<49x128xf32, #tpu.memory_space<vmem>>, vector<1x128xf32>
    %315 = vector.broadcast %314 : vector<1x128xf32> to vector<32x128xf32>
    %316 = arith.mulf %269, %315 : vector<32x128xf32>
    %317 = arith.addf %313, %316 : vector<32x128xf32>
    %c5_111 = arith.constant 5 : index
    %c0_112 = arith.constant 0 : index
    %318 = vector.load %arg10[%c5_111, %c0_112] : memref<49x128xf32, #tpu.memory_space<vmem>>, vector<1x128xf32>
    %319 = vector.broadcast %318 : vector<1x128xf32> to vector<32x128xf32>
    %320 = arith.mulf %270, %319 : vector<32x128xf32>
    %321 = arith.addf %317, %320 : vector<32x128xf32>
    %c6_113 = arith.constant 6 : index
    %c0_114 = arith.constant 0 : index
    %322 = vector.load %arg10[%c6_113, %c0_114] : memref<49x128xf32, #tpu.memory_space<vmem>>, vector<1x128xf32>
    %323 = vector.broadcast %322 : vector<1x128xf32> to vector<32x128xf32>
    %324 = arith.mulf %271, %323 : vector<32x128xf32>
    %325 = arith.addf %321, %324 : vector<32x128xf32>
    %c3_i32_115 = arith.constant 3 : i32
    %326 = tpu.dynamic_rotate %325 by %c3_i32_115 dim 0 : vector<32x128xf32>, i32 -> vector<32x128xf32>
    %cst_116 = arith.constant 0.000000e+00 : f32
    %327 = vector.broadcast %cst_116 : f32 to vector<32x128xf32>
    %328 = arith.select %20, %326, %327 : vector<32x128xi1>, vector<32x128xf32>
    %329 = arith.addf %298, %328 : vector<32x128xf32>
    %c7_117 = arith.constant 7 : index
    %c0_118 = arith.constant 0 : index
    %330 = vector.load %arg10[%c7_117, %c0_118] : memref<49x128xf32, #tpu.memory_space<vmem>>, vector<1x128xf32>
    %331 = vector.broadcast %330 : vector<1x128xf32> to vector<32x128xf32>
    %332 = arith.mulf %266, %331 : vector<32x128xf32>
    %c8_119 = arith.constant 8 : index
    %c0_120 = arith.constant 0 : index
    %333 = vector.load %arg10[%c8_119, %c0_120] : memref<49x128xf32, #tpu.memory_space<vmem>>, vector<1x128xf32>
    %334 = vector.broadcast %333 : vector<1x128xf32> to vector<32x128xf32>
    %335 = arith.mulf %267, %334 : vector<32x128xf32>
    %336 = arith.addf %332, %335 : vector<32x128xf32>
    %c9_121 = arith.constant 9 : index
    %c0_122 = arith.constant 0 : index
    %337 = vector.load %arg10[%c9_121, %c0_122] : memref<49x128xf32, #tpu.memory_space<vmem>>, vector<1x128xf32>
    %338 = vector.broadcast %337 : vector<1x128xf32> to vector<32x128xf32>
    %339 = arith.mulf %268, %338 : vector<32x128xf32>
    %340 = arith.addf %336, %339 : vector<32x128xf32>
    %c10_123 = arith.constant 10 : index
    %c0_124 = arith.constant 0 : index
    %341 = vector.load %arg10[%c10_123, %c0_124] : memref<49x128xf32, #tpu.memory_space<vmem>>, vector<1x128xf32>
    %342 = vector.broadcast %341 : vector<1x128xf32> to vector<32x128xf32>
    %343 = arith.mulf %265, %342 : vector<32x128xf32>
    %344 = arith.addf %340, %343 : vector<32x128xf32>
    %c11_125 = arith.constant 11 : index
    %c0_126 = arith.constant 0 : index
    %345 = vector.load %arg10[%c11_125, %c0_126] : memref<49x128xf32, #tpu.memory_space<vmem>>, vector<1x128xf32>
    %346 = vector.broadcast %345 : vector<1x128xf32> to vector<32x128xf32>
    %347 = arith.mulf %269, %346 : vector<32x128xf32>
    %348 = arith.addf %344, %347 : vector<32x128xf32>
    %c12_127 = arith.constant 12 : index
    %c0_128 = arith.constant 0 : index
    %349 = vector.load %arg10[%c12_127, %c0_128] : memref<49x128xf32, #tpu.memory_space<vmem>>, vector<1x128xf32>
    %350 = vector.broadcast %349 : vector<1x128xf32> to vector<32x128xf32>
    %351 = arith.mulf %270, %350 : vector<32x128xf32>
    %352 = arith.addf %348, %351 : vector<32x128xf32>
    %c13_129 = arith.constant 13 : index
    %c0_130 = arith.constant 0 : index
    %353 = vector.load %arg10[%c13_129, %c0_130] : memref<49x128xf32, #tpu.memory_space<vmem>>, vector<1x128xf32>
    %354 = vector.broadcast %353 : vector<1x128xf32> to vector<32x128xf32>
    %355 = arith.mulf %271, %354 : vector<32x128xf32>
    %356 = arith.addf %352, %355 : vector<32x128xf32>
    %c2_i32_131 = arith.constant 2 : i32
    %357 = tpu.dynamic_rotate %356 by %c2_i32_131 dim 0 : vector<32x128xf32>, i32 -> vector<32x128xf32>
    %cst_132 = arith.constant 0.000000e+00 : f32
    %358 = vector.broadcast %cst_132 : f32 to vector<32x128xf32>
    %359 = arith.select %22, %357, %358 : vector<32x128xi1>, vector<32x128xf32>
    %360 = arith.addf %329, %359 : vector<32x128xf32>
    %c14_133 = arith.constant 14 : index
    %c0_134 = arith.constant 0 : index
    %361 = vector.load %arg10[%c14_133, %c0_134] : memref<49x128xf32, #tpu.memory_space<vmem>>, vector<1x128xf32>
    %362 = vector.broadcast %361 : vector<1x128xf32> to vector<32x128xf32>
    %363 = arith.mulf %266, %362 : vector<32x128xf32>
    %c15_135 = arith.constant 15 : index
    %c0_136 = arith.constant 0 : index
    %364 = vector.load %arg10[%c15_135, %c0_136] : memref<49x128xf32, #tpu.memory_space<vmem>>, vector<1x128xf32>
    %365 = vector.broadcast %364 : vector<1x128xf32> to vector<32x128xf32>
    %366 = arith.mulf %267, %365 : vector<32x128xf32>
    %367 = arith.addf %363, %366 : vector<32x128xf32>
    %c16_137 = arith.constant 16 : index
    %c0_138 = arith.constant 0 : index
    %368 = vector.load %arg10[%c16_137, %c0_138] : memref<49x128xf32, #tpu.memory_space<vmem>>, vector<1x128xf32>
    %369 = vector.broadcast %368 : vector<1x128xf32> to vector<32x128xf32>
    %370 = arith.mulf %268, %369 : vector<32x128xf32>
    %371 = arith.addf %367, %370 : vector<32x128xf32>
    %c17_139 = arith.constant 17 : index
    %c0_140 = arith.constant 0 : index
    %372 = vector.load %arg10[%c17_139, %c0_140] : memref<49x128xf32, #tpu.memory_space<vmem>>, vector<1x128xf32>
    %373 = vector.broadcast %372 : vector<1x128xf32> to vector<32x128xf32>
    %374 = arith.mulf %265, %373 : vector<32x128xf32>
    %375 = arith.addf %371, %374 : vector<32x128xf32>
    %c18_141 = arith.constant 18 : index
    %c0_142 = arith.constant 0 : index
    %376 = vector.load %arg10[%c18_141, %c0_142] : memref<49x128xf32, #tpu.memory_space<vmem>>, vector<1x128xf32>
    %377 = vector.broadcast %376 : vector<1x128xf32> to vector<32x128xf32>
    %378 = arith.mulf %269, %377 : vector<32x128xf32>
    %379 = arith.addf %375, %378 : vector<32x128xf32>
    %c19_143 = arith.constant 19 : index
    %c0_144 = arith.constant 0 : index
    %380 = vector.load %arg10[%c19_143, %c0_144] : memref<49x128xf32, #tpu.memory_space<vmem>>, vector<1x128xf32>
    %381 = vector.broadcast %380 : vector<1x128xf32> to vector<32x128xf32>
    %382 = arith.mulf %270, %381 : vector<32x128xf32>
    %383 = arith.addf %379, %382 : vector<32x128xf32>
    %c20_145 = arith.constant 20 : index
    %c0_146 = arith.constant 0 : index
    %384 = vector.load %arg10[%c20_145, %c0_146] : memref<49x128xf32, #tpu.memory_space<vmem>>, vector<1x128xf32>
    %385 = vector.broadcast %384 : vector<1x128xf32> to vector<32x128xf32>
    %386 = arith.mulf %271, %385 : vector<32x128xf32>
    %387 = arith.addf %383, %386 : vector<32x128xf32>
    %c1_i32_147 = arith.constant 1 : i32
    %388 = tpu.dynamic_rotate %387 by %c1_i32_147 dim 0 : vector<32x128xf32>, i32 -> vector<32x128xf32>
    %cst_148 = arith.constant 0.000000e+00 : f32
    %389 = vector.broadcast %cst_148 : f32 to vector<32x128xf32>
    %390 = arith.select %24, %388, %389 : vector<32x128xi1>, vector<32x128xf32>
    %391 = arith.addf %360, %390 : vector<32x128xf32>
    %c28_149 = arith.constant 28 : index
    %c0_150 = arith.constant 0 : index
    %392 = vector.load %arg10[%c28_149, %c0_150] : memref<49x128xf32, #tpu.memory_space<vmem>>, vector<1x128xf32>
    %393 = vector.broadcast %392 : vector<1x128xf32> to vector<32x128xf32>
    %394 = arith.mulf %266, %393 : vector<32x128xf32>
    %c29_151 = arith.constant 29 : index
    %c0_152 = arith.constant 0 : index
    %395 = vector.load %arg10[%c29_151, %c0_152] : memref<49x128xf32, #tpu.memory_space<vmem>>, vector<1x128xf32>
    %396 = vector.broadcast %395 : vector<1x128xf32> to vector<32x128xf32>
    %397 = arith.mulf %267, %396 : vector<32x128xf32>
    %398 = arith.addf %394, %397 : vector<32x128xf32>
    %c30_153 = arith.constant 30 : index
    %c0_154 = arith.constant 0 : index
    %399 = vector.load %arg10[%c30_153, %c0_154] : memref<49x128xf32, #tpu.memory_space<vmem>>, vector<1x128xf32>
    %400 = vector.broadcast %399 : vector<1x128xf32> to vector<32x128xf32>
    %401 = arith.mulf %268, %400 : vector<32x128xf32>
    %402 = arith.addf %398, %401 : vector<32x128xf32>
    %c31_155 = arith.constant 31 : index
    %c0_156 = arith.constant 0 : index
    %403 = vector.load %arg10[%c31_155, %c0_156] : memref<49x128xf32, #tpu.memory_space<vmem>>, vector<1x128xf32>
    %404 = vector.broadcast %403 : vector<1x128xf32> to vector<32x128xf32>
    %405 = arith.mulf %265, %404 : vector<32x128xf32>
    %406 = arith.addf %402, %405 : vector<32x128xf32>
    %c32_157 = arith.constant 32 : index
    %c0_158 = arith.constant 0 : index
    %407 = vector.load %arg10[%c32_157, %c0_158] : memref<49x128xf32, #tpu.memory_space<vmem>>, vector<1x128xf32>
    %408 = vector.broadcast %407 : vector<1x128xf32> to vector<32x128xf32>
    %409 = arith.mulf %269, %408 : vector<32x128xf32>
    %410 = arith.addf %406, %409 : vector<32x128xf32>
    %c33_159 = arith.constant 33 : index
    %c0_160 = arith.constant 0 : index
    %411 = vector.load %arg10[%c33_159, %c0_160] : memref<49x128xf32, #tpu.memory_space<vmem>>, vector<1x128xf32>
    %412 = vector.broadcast %411 : vector<1x128xf32> to vector<32x128xf32>
    %413 = arith.mulf %270, %412 : vector<32x128xf32>
    %414 = arith.addf %410, %413 : vector<32x128xf32>
    %c34_161 = arith.constant 34 : index
    %c0_162 = arith.constant 0 : index
    %415 = vector.load %arg10[%c34_161, %c0_162] : memref<49x128xf32, #tpu.memory_space<vmem>>, vector<1x128xf32>
    %416 = vector.broadcast %415 : vector<1x128xf32> to vector<32x128xf32>
    %417 = arith.mulf %271, %416 : vector<32x128xf32>
    %418 = arith.addf %414, %417 : vector<32x128xf32>
    %c31_i32_163 = arith.constant 31 : i32
    %419 = tpu.dynamic_rotate %418 by %c31_i32_163 dim 0 : vector<32x128xf32>, i32 -> vector<32x128xf32>
    %cst_164 = arith.constant 0.000000e+00 : f32
    %420 = vector.broadcast %cst_164 : f32 to vector<32x128xf32>
    %421 = arith.select %26, %419, %420 : vector<32x128xi1>, vector<32x128xf32>
    %422 = arith.addf %391, %421 : vector<32x128xf32>
    %c35_165 = arith.constant 35 : index
    %c0_166 = arith.constant 0 : index
    %423 = vector.load %arg10[%c35_165, %c0_166] : memref<49x128xf32, #tpu.memory_space<vmem>>, vector<1x128xf32>
    %424 = vector.broadcast %423 : vector<1x128xf32> to vector<32x128xf32>
    %425 = arith.mulf %266, %424 : vector<32x128xf32>
    %c36_167 = arith.constant 36 : index
    %c0_168 = arith.constant 0 : index
    %426 = vector.load %arg10[%c36_167, %c0_168] : memref<49x128xf32, #tpu.memory_space<vmem>>, vector<1x128xf32>
    %427 = vector.broadcast %426 : vector<1x128xf32> to vector<32x128xf32>
    %428 = arith.mulf %267, %427 : vector<32x128xf32>
    %429 = arith.addf %425, %428 : vector<32x128xf32>
    %c37_169 = arith.constant 37 : index
    %c0_170 = arith.constant 0 : index
    %430 = vector.load %arg10[%c37_169, %c0_170] : memref<49x128xf32, #tpu.memory_space<vmem>>, vector<1x128xf32>
    %431 = vector.broadcast %430 : vector<1x128xf32> to vector<32x128xf32>
    %432 = arith.mulf %268, %431 : vector<32x128xf32>
    %433 = arith.addf %429, %432 : vector<32x128xf32>
    %c38_171 = arith.constant 38 : index
    %c0_172 = arith.constant 0 : index
    %434 = vector.load %arg10[%c38_171, %c0_172] : memref<49x128xf32, #tpu.memory_space<vmem>>, vector<1x128xf32>
    %435 = vector.broadcast %434 : vector<1x128xf32> to vector<32x128xf32>
    %436 = arith.mulf %265, %435 : vector<32x128xf32>
    %437 = arith.addf %433, %436 : vector<32x128xf32>
    %c39_173 = arith.constant 39 : index
    %c0_174 = arith.constant 0 : index
    %438 = vector.load %arg10[%c39_173, %c0_174] : memref<49x128xf32, #tpu.memory_space<vmem>>, vector<1x128xf32>
    %439 = vector.broadcast %438 : vector<1x128xf32> to vector<32x128xf32>
    %440 = arith.mulf %269, %439 : vector<32x128xf32>
    %441 = arith.addf %437, %440 : vector<32x128xf32>
    %c40_175 = arith.constant 40 : index
    %c0_176 = arith.constant 0 : index
    %442 = vector.load %arg10[%c40_175, %c0_176] : memref<49x128xf32, #tpu.memory_space<vmem>>, vector<1x128xf32>
    %443 = vector.broadcast %442 : vector<1x128xf32> to vector<32x128xf32>
    %444 = arith.mulf %270, %443 : vector<32x128xf32>
    %445 = arith.addf %441, %444 : vector<32x128xf32>
    %c41_177 = arith.constant 41 : index
    %c0_178 = arith.constant 0 : index
    %446 = vector.load %arg10[%c41_177, %c0_178] : memref<49x128xf32, #tpu.memory_space<vmem>>, vector<1x128xf32>
    %447 = vector.broadcast %446 : vector<1x128xf32> to vector<32x128xf32>
    %448 = arith.mulf %271, %447 : vector<32x128xf32>
    %449 = arith.addf %445, %448 : vector<32x128xf32>
    %c30_i32_179 = arith.constant 30 : i32
    %450 = tpu.dynamic_rotate %449 by %c30_i32_179 dim 0 : vector<32x128xf32>, i32 -> vector<32x128xf32>
    %cst_180 = arith.constant 0.000000e+00 : f32
    %451 = vector.broadcast %cst_180 : f32 to vector<32x128xf32>
    %452 = arith.select %28, %450, %451 : vector<32x128xi1>, vector<32x128xf32>
    %453 = arith.addf %422, %452 : vector<32x128xf32>
    %c42_181 = arith.constant 42 : index
    %c0_182 = arith.constant 0 : index
    %454 = vector.load %arg10[%c42_181, %c0_182] : memref<49x128xf32, #tpu.memory_space<vmem>>, vector<1x128xf32>
    %455 = vector.broadcast %454 : vector<1x128xf32> to vector<32x128xf32>
    %456 = arith.mulf %266, %455 : vector<32x128xf32>
    %c43_183 = arith.constant 43 : index
    %c0_184 = arith.constant 0 : index
    %457 = vector.load %arg10[%c43_183, %c0_184] : memref<49x128xf32, #tpu.memory_space<vmem>>, vector<1x128xf32>
    %458 = vector.broadcast %457 : vector<1x128xf32> to vector<32x128xf32>
    %459 = arith.mulf %267, %458 : vector<32x128xf32>
    %460 = arith.addf %456, %459 : vector<32x128xf32>
    %c44_185 = arith.constant 44 : index
    %c0_186 = arith.constant 0 : index
    %461 = vector.load %arg10[%c44_185, %c0_186] : memref<49x128xf32, #tpu.memory_space<vmem>>, vector<1x128xf32>
    %462 = vector.broadcast %461 : vector<1x128xf32> to vector<32x128xf32>
    %463 = arith.mulf %268, %462 : vector<32x128xf32>
    %464 = arith.addf %460, %463 : vector<32x128xf32>
    %c45_187 = arith.constant 45 : index
    %c0_188 = arith.constant 0 : index
    %465 = vector.load %arg10[%c45_187, %c0_188] : memref<49x128xf32, #tpu.memory_space<vmem>>, vector<1x128xf32>
    %466 = vector.broadcast %465 : vector<1x128xf32> to vector<32x128xf32>
    %467 = arith.mulf %265, %466 : vector<32x128xf32>
    %468 = arith.addf %464, %467 : vector<32x128xf32>
    %c46_189 = arith.constant 46 : index
    %c0_190 = arith.constant 0 : index
    %469 = vector.load %arg10[%c46_189, %c0_190] : memref<49x128xf32, #tpu.memory_space<vmem>>, vector<1x128xf32>
    %470 = vector.broadcast %469 : vector<1x128xf32> to vector<32x128xf32>
    %471 = arith.mulf %269, %470 : vector<32x128xf32>
    %472 = arith.addf %468, %471 : vector<32x128xf32>
    %c47_191 = arith.constant 47 : index
    %c0_192 = arith.constant 0 : index
    %473 = vector.load %arg10[%c47_191, %c0_192] : memref<49x128xf32, #tpu.memory_space<vmem>>, vector<1x128xf32>
    %474 = vector.broadcast %473 : vector<1x128xf32> to vector<32x128xf32>
    %475 = arith.mulf %270, %474 : vector<32x128xf32>
    %476 = arith.addf %472, %475 : vector<32x128xf32>
    %c48_193 = arith.constant 48 : index
    %c0_194 = arith.constant 0 : index
    %477 = vector.load %arg10[%c48_193, %c0_194] : memref<49x128xf32, #tpu.memory_space<vmem>>, vector<1x128xf32>
    %478 = vector.broadcast %477 : vector<1x128xf32> to vector<32x128xf32>
    %479 = arith.mulf %271, %478 : vector<32x128xf32>
    %480 = arith.addf %476, %479 : vector<32x128xf32>
    %c29_i32_195 = arith.constant 29 : i32
    %481 = tpu.dynamic_rotate %480 by %c29_i32_195 dim 0 : vector<32x128xf32>, i32 -> vector<32x128xf32>
    %cst_196 = arith.constant 0.000000e+00 : f32
    %482 = vector.broadcast %cst_196 : f32 to vector<32x128xf32>
    %483 = arith.select %30, %481, %482 : vector<32x128xi1>, vector<32x128xf32>
    %484 = arith.addf %453, %483 : vector<32x128xf32>
    %c0_197 = arith.constant 0 : index
    %c0_198 = arith.constant 0 : index
    %485 = vector.load %arg11[%c0_197, %c0_198] : memref<1x128xf32, #tpu.memory_space<vmem>>, vector<1x128xf32>
    %486 = vector.broadcast %485 : vector<1x128xf32> to vector<32x128xf32>
    %487 = arith.addf %484, %486 : vector<32x128xf32>
    %c0_199 = arith.constant 0 : index
    %c0_200 = arith.constant 0 : index
    %488 = vector.load %arg12[%c0_199, %c0_200] : memref<128x128xf32, #tpu.memory_space<vmem>>, vector<128x128xf32>
    %cst_201 = arith.constant dense<0.000000e+00> : vector<32x128xf32>
    %489 = tpu.matmul %487, %488, %cst_201 {dimension_numbers = #tpu.dot_dimension_numbers<[1], [0], [0], [1], [0, 0, 1, 1], [], []>} : vector<32x128xf32>, vector<128x128xf32>, vector<32x128xf32> -> vector<32x128xf32>
    %c0_202 = arith.constant 0 : index
    %c0_203 = arith.constant 0 : index
    %490 = vector.load %arg13[%c0_202, %c0_203] : memref<1x128xf32, #tpu.memory_space<vmem>>, vector<1x128xf32>
    %491 = vector.broadcast %490 : vector<1x128xf32> to vector<32x128xf32>
    %492 = arith.addf %489, %491 : vector<32x128xf32>
    %493 = arith.negf %492 : vector<32x128xf32>
    %494 = math.exp %493 : vector<32x128xf32>
    %cst_204 = arith.constant 1.000000e+00 : f32
    %495 = vector.broadcast %cst_204 : f32 to vector<32x128xf32>
    %496 = arith.addf %495, %494 : vector<32x128xf32>
    %497 = arith.divf %495, %496 : vector<32x128xf32>
    %498 = arith.mulf %0, %497 : vector<32x128xf32>
    %c0_205 = arith.constant 0 : index
    %c0_206 = arith.constant 0 : index
    %499 = vector.load %arg14[%c0_205, %c0_206] : memref<128x128xf32, #tpu.memory_space<vmem>>, vector<128x128xf32>
    %cst_207 = arith.constant dense<0.000000e+00> : vector<32x128xf32>
    %500 = tpu.matmul %498, %499, %cst_207 {dimension_numbers = #tpu.dot_dimension_numbers<[1], [0], [0], [1], [0, 0, 1, 1], [], []>} : vector<32x128xf32>, vector<128x128xf32>, vector<32x128xf32> -> vector<32x128xf32>
    %c0_208 = arith.constant 0 : index
    %c0_209 = arith.constant 0 : index
    %501 = vector.load %arg15[%c0_208, %c0_209] : memref<128x128xf32, #tpu.memory_space<vmem>>, vector<128x128xf32>
    %cst_210 = arith.constant dense<0.000000e+00> : vector<32x128xf32>
    %502 = tpu.matmul %0, %501, %cst_210 {dimension_numbers = #tpu.dot_dimension_numbers<[1], [0], [0], [1], [0, 0, 1, 1], [], []>} : vector<32x128xf32>, vector<128x128xf32>, vector<32x128xf32> -> vector<32x128xf32>
    %503 = arith.addf %500, %502 : vector<32x128xf32>
    %c0_211 = arith.constant 0 : index
    %c0_212 = arith.constant 0 : index
    %504 = vector.load %arg16[%c0_211, %c0_212] : memref<1x128xf32, #tpu.memory_space<vmem>>, vector<1x128xf32>
    %505 = vector.broadcast %504 : vector<1x128xf32> to vector<32x128xf32>
    %506 = arith.addf %503, %505 : vector<32x128xf32>
    %c0_213 = arith.constant 0 : index
    %c0_214 = arith.constant 0 : index
    %507 = vector.load %arg20[%c0_213, %c0_214] : memref<32x128xf32, #tpu.memory_space<vmem>>, vector<32x128xf32>
    tpu.vector_store %arg20[%c0_213, %c0_214], %506 {strides = array<i32>} : memref<32x128xf32, #tpu.memory_space<vmem>>, vector<32x128xf32>,
    %508 = arith.mulf %1, %497 : vector<32x128xf32>
    %c0_215 = arith.constant 0 : index
    %c0_216 = arith.constant 0 : index
    %509 = vector.load %arg17[%c0_215, %c0_216] : memref<128x128xf32, #tpu.memory_space<vmem>>, vector<128x128xf32>
    %cst_217 = arith.constant dense<0.000000e+00> : vector<32x128xf32>
    %510 = tpu.matmul %508, %509, %cst_217 {dimension_numbers = #tpu.dot_dimension_numbers<[1], [0], [0], [1], [0, 0, 1, 1], [], []>} : vector<32x128xf32>, vector<128x128xf32>, vector<32x128xf32> -> vector<32x128xf32>
    %c0_218 = arith.constant 0 : index
    %c0_219 = arith.constant 0 : index
    %511 = vector.load %arg18[%c0_218, %c0_219] : memref<128x128xf32, #tpu.memory_space<vmem>>, vector<128x128xf32>
    %cst_220 = arith.constant dense<0.000000e+00> : vector<32x128xf32>
    %512 = tpu.matmul %1, %511, %cst_220 {dimension_numbers = #tpu.dot_dimension_numbers<[1], [0], [0], [1], [0, 0, 1, 1], [], []>} : vector<32x128xf32>, vector<128x128xf32>, vector<32x128xf32> -> vector<32x128xf32>
    %513 = arith.addf %510, %512 : vector<32x128xf32>
    %c0_221 = arith.constant 0 : index
    %c0_222 = arith.constant 0 : index
    %514 = vector.load %arg19[%c0_221, %c0_222] : memref<1x128xf32, #tpu.memory_space<vmem>>, vector<1x128xf32>
    %515 = vector.broadcast %514 : vector<1x128xf32> to vector<32x128xf32>
    %516 = arith.addf %513, %515 : vector<32x128xf32>
    %c0_223 = arith.constant 0 : index
    %c0_224 = arith.constant 0 : index
    %517 = vector.load %arg21[%c0_223, %c0_224] : memref<32x128xf32, #tpu.memory_space<vmem>>, vector<32x128xf32>
    tpu.vector_store %arg21[%c0_223, %c0_224], %516 {strides = array<i32>} : memref<32x128xf32, #tpu.memory_space<vmem>>, vector<32x128xf32>,
    return
  }
  func.func @transform_0(%arg0: i32) -> (i32, i32) {
    %c0_i32 = arith.constant 0 : i32
    %c0_i32_0 = arith.constant 0 : i32
    return %arg0, %c0_i32 : i32, i32
  }
  func.func @transform_1(%arg0: i32) -> (i32, i32) {
    %c0_i32 = arith.constant 0 : i32
    %c0_i32_0 = arith.constant 0 : i32
    return %arg0, %c0_i32 : i32, i32
  }
  func.func @transform_2(%arg0: i32) -> (i32, i32) {
    %c0_i32 = arith.constant 0 : i32
    %c0_i32_0 = arith.constant 0 : i32
    %c0_i32_1 = arith.constant 0 : i32
    return %c0_i32, %c0_i32_0 : i32, i32
  }
  func.func @transform_3(%arg0: i32) -> (i32, i32) {
    %c0_i32 = arith.constant 0 : i32
    %c0_i32_0 = arith.constant 0 : i32
    %c0_i32_1 = arith.constant 0 : i32
    return %c0_i32, %c0_i32_0 : i32, i32
  }
  func.func @transform_4(%arg0: i32) -> (i32, i32) {
    %c0_i32 = arith.constant 0 : i32
    %c0_i32_0 = arith.constant 0 : i32
    %c0_i32_1 = arith.constant 0 : i32
    return %c0_i32, %c0_i32_0 : i32, i32
  }
  func.func @transform_5(%arg0: i32) -> (i32, i32) {
    %c0_i32 = arith.constant 0 : i32
    %c0_i32_0 = arith.constant 0 : i32
    %c0_i32_1 = arith.constant 0 : i32
    return %c0_i32, %c0_i32_0 : i32, i32
  }
  func.func @transform_6(%arg0: i32) -> (i32, i32) {
    %c0_i32 = arith.constant 0 : i32
    %c0_i32_0 = arith.constant 0 : i32
    %c0_i32_1 = arith.constant 0 : i32
    return %c0_i32, %c0_i32_0 : i32, i32
  }
  func.func @transform_7(%arg0: i32) -> (i32, i32) {
    %c0_i32 = arith.constant 0 : i32
    %c0_i32_0 = arith.constant 0 : i32
    %c0_i32_1 = arith.constant 0 : i32
    return %c0_i32, %c0_i32_0 : i32, i32
  }
  func.func @transform_8(%arg0: i32) -> (i32, i32) {
    %c0_i32 = arith.constant 0 : i32
    %c0_i32_0 = arith.constant 0 : i32
    %c0_i32_1 = arith.constant 0 : i32
    return %c0_i32, %c0_i32_0 : i32, i32
  }
  func.func @transform_9(%arg0: i32) -> (i32, i32) {
    %c0_i32 = arith.constant 0 : i32
    %c0_i32_0 = arith.constant 0 : i32
    %c0_i32_1 = arith.constant 0 : i32
    return %c0_i32, %c0_i32_0 : i32, i32
  }
  func.func @transform_10(%arg0: i32) -> (i32, i32) {
    %c0_i32 = arith.constant 0 : i32
    %c0_i32_0 = arith.constant 0 : i32
    %c0_i32_1 = arith.constant 0 : i32
    return %c0_i32, %c0_i32_0 : i32, i32
  }
  func.func @transform_11(%arg0: i32) -> (i32, i32) {
    %c0_i32 = arith.constant 0 : i32
    %c0_i32_0 = arith.constant 0 : i32
    %c0_i32_1 = arith.constant 0 : i32
    return %c0_i32, %c0_i32_0 : i32, i32
  }
  func.func @transform_12(%arg0: i32) -> (i32, i32) {
    %c0_i32 = arith.constant 0 : i32
    %c0_i32_0 = arith.constant 0 : i32
    %c0_i32_1 = arith.constant 0 : i32
    return %c0_i32, %c0_i32_0 : i32, i32
  }
  func.func @transform_13(%arg0: i32) -> (i32, i32) {
    %c0_i32 = arith.constant 0 : i32
    %c0_i32_0 = arith.constant 0 : i32
    %c0_i32_1 = arith.constant 0 : i32
    return %c0_i32, %c0_i32_0 : i32, i32
  }
  func.func @transform_14(%arg0: i32) -> (i32, i32) {
    %c0_i32 = arith.constant 0 : i32
    %c0_i32_0 = arith.constant 0 : i32
    %c0_i32_1 = arith.constant 0 : i32
    return %c0_i32, %c0_i32_0 : i32, i32
  }
  func.func @transform_15(%arg0: i32) -> (i32, i32) {
    %c0_i32 = arith.constant 0 : i32
    %c0_i32_0 = arith.constant 0 : i32
    %c0_i32_1 = arith.constant 0 : i32
    return %c0_i32, %c0_i32_0 : i32, i32
  }
  func.func @transform_16(%arg0: i32) -> (i32, i32) {
    %c0_i32 = arith.constant 0 : i32
    %c0_i32_0 = arith.constant 0 : i32
    %c0_i32_1 = arith.constant 0 : i32
    return %c0_i32, %c0_i32_0 : i32, i32
  }
  func.func @transform_17(%arg0: i32) -> (i32, i32) {
    %c0_i32 = arith.constant 0 : i32
    %c0_i32_0 = arith.constant 0 : i32
    %c0_i32_1 = arith.constant 0 : i32
    return %c0_i32, %c0_i32_0 : i32, i32
  }
  func.func @transform_18(%arg0: i32) -> (i32, i32) {
    %c0_i32 = arith.constant 0 : i32
    %c0_i32_0 = arith.constant 0 : i32
    %c0_i32_1 = arith.constant 0 : i32
    return %c0_i32, %c0_i32_0 : i32, i32
  }
  func.func @transform_19(%arg0: i32) -> (i32, i32) {
    %c0_i32 = arith.constant 0 : i32
    %c0_i32_0 = arith.constant 0 : i32
    return %arg0, %c0_i32 : i32, i32
  }
  func.func @transform_20(%arg0: i32) -> (i32, i32) {
    %c0_i32 = arith.constant 0 : i32
    %c0_i32_0 = arith.constant 0 : i32
    return %arg0, %c0_i32 : i32, i32
  }
}

</mosaic_0001>

<bundles_post_ra>
// kernel: tpu_custom_call.1
= control target key start
LH: loop header
LB: loop body
LE: loop exit
PB: predicated region body
PF: predicated region fallthrough
CT: control target
= control target key end

     0   :  { %s6091_s0 = inlined_call_operand.hbm [shape: f32[32,128], index: 0, kind: input, shape index: {}]   ;;  %s6092_s1 = inlined_call_operand.hbm [shape: f32[32,128], index: 1, kind: input, shape index: {}]   ;;  %s6093_s2 = inlined_call_operand.hbm [shape: f32[128,128], index: 2, kind: input, shape index: {}]   ;;  %s6094_s3 = inlined_call_operand.hbm [shape: f32[128,128], index: 3, kind: input, shape index: {}]   ;;  %s6095_s4 = inlined_call_operand.vmem [shape: f32[1,128], index: 4, kind: input, shape index: {}]   ;;  %s6096_s5 = inlined_call_operand.hbm [shape: f32[49,128], index: 5, kind: input, shape index: {}]   ;;  %s6097_s6 = inlined_call_operand.vmem [shape: f32[1,128], index: 6, kind: input, shape index: {}]   ;;  %s6098_s7 = inlined_call_operand.hbm [shape: f32[128,128], index: 7, kind: input, shape index: {}]   ;;  %s6099_s8 = inlined_call_operand.vmem [shape: f32[1,128], index: 8, kind: input, shape index: {}]   ;;  %s6100_s9 = inlined_call_operand.hbm [shape: f32[49,128], index: 9, kind: input, shape index: {}]   ;;  %s6101_s10 = inlined_call_operand.vmem [shape: f32[1,128], index: 10, kind: input, shape index: {}]   ;;  %s6102_s11 = inlined_call_operand.hbm [shape: f32[128,128], index: 11, kind: input, shape index: {}]   ;;  %s6103_s12 = inlined_call_operand.vmem [shape: f32[1,128], index: 12, kind: input, shape index: {}]   ;;  %s6104_s13 = inlined_call_operand.hbm [shape: f32[128,128], index: 13, kind: input, shape index: {}]   ;;  %s6105_s14 = inlined_call_operand.hbm [shape: f32[128,128], index: 14, kind: input, shape index: {}]   ;;  %s6106_s15 = inlined_call_operand.vmem [shape: f32[1,128], index: 15, kind: input, shape index: {}]   ;;  %s6107_s16 = inlined_call_operand.hbm [shape: f32[128,128], index: 16, kind: input, shape index: {}]   ;;  %s6108_s17 = inlined_call_operand.hbm [shape: f32[128,128], index: 17, kind: input, shape index: {}]   ;;  %s6109_s18 = inlined_call_operand.vmem [shape: f32[1,128], index: 18, kind: input, shape index: {}]   ;;  %s6110_s19 = inlined_call_operand.hbm [shape: f32[32,128], index: 19, kind: output, shape index: {0}]   ;;  %s6111_s20 = inlined_call_operand.hbm [shape: f32[32,128], index: 20, kind: output, shape index: {1}]  }
   0x1   :  { %6198 = sst [smem:[#allocation109_spill]] %s6091_s0 }
   0x2   :  { %6199 = sst [smem:[#allocation110_spill]] %s6092_s1 }
   0x3   :  { %6200 = sst [smem:[#allocation111_spill]] %s6093_s2 }
   0x4   :  { %6201 = sst [smem:[#allocation112_spill]] %s6094_s3 }
   0x5   :  { %6202 = sst [smem:[#allocation113_spill]] %s6095_s4 }
   0x6   :  { %6203 = sst [smem:[#allocation114_spill]] %s6110_s19 }
   0x7   :  { %6204 = sst [smem:[#allocation115_spill]] %s6111_s20 }
   0x8   :  { %26 = vsyncpa [#allocation3], 0 }
   0x9   :  { %27 = vsyncpa [#allocation6], 0 }
   0xa   :  { %28 = vsyncpa [#allocation9], 0 }
   0xb   :  { %29 = vsyncpa [#allocation12], 0 }
   0xc   :  { %30 = vsyncpa [#allocation15], 0 }
   0xd   :  { %31 = vsyncpa [#allocation18], 0 }
   0xe   :  { %32 = vsyncpa [#allocation21], 0 }
   0xf   :  { %33 = vsyncpa [#allocation4], 0 }
  0x10   :  { %34 = vsyncpa [#allocation24], 0  ;;  %s3995_s1 = smov [#allocation5]   ;;  %s3996_s23 = smov [#allocation8]  }
  0x11   :  { %s52_s22 = sshll.u32 %s3995_s1, 4  ;;  %s76_s24 = sshll.u32 %s3996_s23, 4  ;;  %s53_s22 = int_to_ptr.vmem [resolvable:$true] %s52_s22  ;;  %s4121_s24 = int_to_ptr.vmem [resolvable:$true] %s76_s24 }
  0x12   :  { %s6205_s3 = sld [smem:[#allocation110_spill]] }
  0x18   :  { %s3669_s26 = scalar_lea.hbm %s6205_s3, 512 }
  0x19   :  { %p3670_p0 = scmp.ne.s32.totalorder %s6205_s3, %s3669_s26  ;;  %p3673_p1 = scmp.lt.u32.totalorder %s3669_s26, %s6205_s3 }
  0x1b   :  { %p3675_p2 = pnand %p3673_p1, %p3670_p0 }
  0x1d   :  { %3678 = shalt.err (!%p3675_p2)
}
  0x1e   :  { %s3679_s30 = scalar_lea.vmem %s53_s22, 512  ;;  %p3684_p4 = scmp.lt.s32.totalorder %s53_s22, %s53_s22 }
  0x1f   :  { %p3680_p3 = scmp.ne.s32.totalorder %s53_s22, %s3679_s30  ;;  %p3685_p5 = scmp.lt.s32.totalorder %s3679_s30, %s3679_s30 }
  0x21   :  { %p3686_p6 = por %p3685_p5, %p3684_p4 }
  0x23   :  { %p3687_p7 = pnand %p3686_p6, %p3680_p3 }
  0x25   :  { %3690 = shalt.err (!%p3687_p7)
}
  0x26   :  { %s3997_s0 = smov 128   ;;  %s3998_s21 = smov 8  }
  0x27   :  { %58 = dma.hbm_to_vmem [thread:$0]  %s6205_s3, 512, %s53_s22, [#allocation6], %s3997_s0, %s3997_s0, %s3998_s21  }
  0x28   :  { %s6206_s26 = sld [smem:[#allocation112_spill]] }
  0x2e   :  { %s3691_s27 = scalar_lea.hbm %s6206_s26, 2048 }
  0x2f   :  { %p3692_p8 = scmp.ne.s32.totalorder %s6206_s26, %s3691_s27  ;;  %p3695_p9 = scmp.lt.u32.totalorder %s3691_s27, %s6206_s26 }
  0x31   :  { %p3697_p10 = pnand %p3695_p9, %p3692_p8 }
  0x33   :  { %3700 = shalt.err (!%p3697_p10)
}
  0x34   :  { %s3701_s20 = scalar_lea.vmem %s4121_s24, 2048  ;;  %p3706_p12 = scmp.lt.s32.totalorder %s4121_s24, %s4121_s24 }
  0x35   :  { %p3702_p11 = scmp.ne.s32.totalorder %s4121_s24, %s3701_s20  ;;  %p3707_p13 = scmp.lt.s32.totalorder %s3701_s20, %s3701_s20 }
  0x37   :  { %p3708_p0 = por %p3707_p13, %p3706_p12 }
  0x39   :  { %p3709_p1 = pnand %p3708_p0, %p3702_p11 }
  0x3b   :  { %3712 = shalt.err (!%p3709_p1)
}
  0x3c   :  { %82 = dma.hbm_to_vmem [thread:$0]  %s6206_s26, 2048, %s4121_s24, [#allocation9], %s3997_s0, %s3997_s0, %s3998_s21  }
  0x3d   :  { %s3999_s1 = smov [#allocation11]   ;;  %s4000_s2 = smov [#allocation14]  }
  0x3e   :  { %s104_s23 = sshll.u32 %s3999_s1, 4  ;;  %s132_s25 = sshll.u32 %s4000_s2, 4  ;;  %s105_s23 = int_to_ptr.vmem [resolvable:$true] %s104_s23  ;;  %s4158_s25 = int_to_ptr.vmem [resolvable:$true] %s132_s25 }
  0x3f   :  { %s3713_s28 = scalar_lea.hbm %s6098_s7, 2048 }
  0x40   :  { %p3714_p2 = scmp.ne.s32.totalorder %s6098_s7, %s3713_s28  ;;  %p3717_p3 = scmp.lt.u32.totalorder %s3713_s28, %s6098_s7 }
  0x42   :  { %p3719_p4 = pnand %p3717_p3, %p3714_p2 }
  0x44   :  { %3722 = shalt.err (!%p3719_p4)
}
  0x45   :  { %s3723_s24 = scalar_lea.vmem %s105_s23, 2048  ;;  %p3728_p6 = scmp.lt.s32.totalorder %s105_s23, %s105_s23 }
  0x46   :  { %p3724_p5 = scmp.ne.s32.totalorder %s105_s23, %s3723_s24  ;;  %p3729_p7 = scmp.lt.s32.totalorder %s3723_s24, %s3723_s24 }
  0x48   :  { %p3730_p8 = por %p3729_p7, %p3728_p6 }
  0x4a   :  { %p3731_p9 = pnand %p3730_p8, %p3724_p5 }
  0x4c   :  { %3734 = shalt.err (!%p3731_p9)
}
  0x4d   :  { %110 = dma.hbm_to_vmem [thread:$0]  %s6098_s7, 2048, %s105_s23, [#allocation12], %s3997_s0, %s3997_s0, %s3998_s21  }
  0x4e   :  { %s3735_s19 = scalar_lea.hbm %s6102_s11, 2048 }
  0x4f   :  { %p3736_p10 = scmp.ne.s32.totalorder %s6102_s11, %s3735_s19  ;;  %p3739_p11 = scmp.lt.u32.totalorder %s3735_s19, %s6102_s11 }
  0x51   :  { %p3741_p12 = pnand %p3739_p11, %p3736_p10 }
  0x53   :  { %3744 = shalt.err (!%p3741_p12)
}
  0x54   :  { %s3745_s4 = scalar_lea.vmem %s4158_s25, 2048  ;;  %p3750_p0 = scmp.lt.s32.totalorder %s4158_s25, %s4158_s25 }
  0x55   :  { %p3746_p13 = scmp.ne.s32.totalorder %s4158_s25, %s3745_s4  ;;  %p3751_p1 = scmp.lt.s32.totalorder %s3745_s4, %s3745_s4 }
  0x57   :  { %p3752_p2 = por %p3751_p1, %p3750_p0 }
  0x59   :  { %p3753_p3 = pnand %p3752_p2, %p3746_p13 }
  0x5b   :  { %3756 = shalt.err (!%p3753_p3)
}
  0x5c   :  { %138 = dma.hbm_to_vmem [thread:$0]  %s6102_s11, 2048, %s4158_s25, [#allocation15], %s3997_s0, %s3997_s0, %s3998_s21  }
  0x5d   :  { %s4001_s29 = smov [#allocation17]   ;;  %s4002_s24 = smov [#allocation2]  }
  0x5e   :  { %s158_s30 = sshll.u32 %s4001_s29, 4  ;;  %s40_s26 = sshll.u32 %s4002_s24, 4  ;;  %s159_s30 = int_to_ptr.vmem [resolvable:$true] %s158_s30  ;;  %s4195_s26 = int_to_ptr.vmem [resolvable:$true] %s40_s26 }
  0x5f   :  { %s3757_s1 = scalar_lea.hbm %s6105_s14, 2048 }
  0x60   :  { %p3758_p4 = scmp.ne.s32.totalorder %s6105_s14, %s3757_s1  ;;  %p3761_p5 = scmp.lt.u32.totalorder %s3757_s1, %s6105_s14 }
  0x62   :  { %p3763_p6 = pnand %p3761_p5, %p3758_p4 }
  0x64   :  { %3766 = shalt.err (!%p3763_p6)
}
  0x65   :  { %s3767_s11 = scalar_lea.vmem %s159_s30, 2048  ;;  %p3772_p8 = scmp.lt.s32.totalorder %s159_s30, %s159_s30 }
  0x66   :  { %p3768_p7 = scmp.ne.s32.totalorder %s159_s30, %s3767_s11  ;;  %p3773_p9 = scmp.lt.s32.totalorder %s3767_s11, %s3767_s11 }
  0x68   :  { %p3774_p10 = por %p3773_p9, %p3772_p8 }
  0x6a   :  { %p3775_p11 = pnand %p3774_p10, %p3768_p7 }
  0x6c   :  { %3778 = shalt.err (!%p3775_p11)
}
  0x6d   :  { %164 = dma.hbm_to_vmem [thread:$0]  %s6105_s14, 2048, %s159_s30, [#allocation18], %s3997_s0, %s3997_s0, %s3998_s21  }
  0x6e   :  { %s6207_s23 = sld [smem:[#allocation109_spill]] }
  0x74   :  { %s3779_s29 = scalar_lea.hbm %s6207_s23, 512 }
  0x75   :  { %p3780_p12 = scmp.ne.s32.totalorder %s6207_s23, %s3779_s29  ;;  %p3783_p13 = scmp.lt.u32.totalorder %s3779_s29, %s6207_s23 }
  0x77   :  { %p3785_p0 = pnand %p3783_p13, %p3780_p12 }
  0x79   :  { %3788 = shalt.err (!%p3785_p0)
}
  0x7a   :  { %s3789_s19 = scalar_lea.vmem %s4195_s26, 512  ;;  %p3794_p2 = scmp.lt.s32.totalorder %s4195_s26, %s4195_s26 }
  0x7b   :  { %p3790_p1 = scmp.ne.s32.totalorder %s4195_s26, %s3789_s19  ;;  %p3795_p3 = scmp.lt.s32.totalorder %s3789_s19, %s3789_s19 }
  0x7d   :  { %p3796_p4 = por %p3795_p3, %p3794_p2 }
  0x7f   :  { %p3797_p5 = pnand %p3796_p4, %p3790_p1 }
  0x81   :  { %3800 = shalt.err (!%p3797_p5)
}
  0x82   :  { %46 = dma.hbm_to_vmem [thread:$0]  %s6207_s23, 512, %s4195_s26, [#allocation3], %s3997_s0, %s3997_s0, %s3998_s21  }
  0x83   :  { %s4003_s2 = smov [#allocation7]   ;;  %s4004_s20 = smov [#allocation10]  }
  0x84   :  { %s64_s27 = sshll.u32 %s4003_s2, 4  ;;  %s90_s11 = sshll.u32 %s4004_s20, 4  ;;  %s65_s27 = int_to_ptr.vmem [resolvable:$true] %s64_s27  ;;  %s4232_s11 = int_to_ptr.vmem [resolvable:$true] %s90_s11 }
  0x85   :  { %s6208_s4 = sld [smem:[#allocation111_spill]] }
  0x8b   :  { %s3801_s7 = scalar_lea.hbm %s6208_s4, 2048 }
  0x8c   :  { %p3802_p6 = scmp.ne.s32.totalorder %s6208_s4, %s3801_s7  ;;  %p3805_p7 = scmp.lt.u32.totalorder %s3801_s7, %s6208_s4 }
  0x8e   :  { %p3807_p8 = pnand %p3805_p7, %p3802_p6 }
  0x90   :  { %3810 = shalt.err (!%p3807_p8)
}
  0x91   :  { %s3811_s26 = scalar_lea.vmem %s65_s27, 2048  ;;  %p3816_p10 = scmp.lt.s32.totalorder %s65_s27, %s65_s27 }
  0x92   :  { %p3812_p9 = scmp.ne.s32.totalorder %s65_s27, %s3811_s26  ;;  %p3817_p11 = scmp.lt.s32.totalorder %s3811_s26, %s3811_s26 }
  0x94   :  { %p3818_p12 = por %p3817_p11, %p3816_p10 }
  0x96   :  { %p3819_p13 = pnand %p3818_p12, %p3812_p9 }
  0x98   :  { %3822 = shalt.err (!%p3819_p13)
}
  0x99   :  { %70 = dma.hbm_to_vmem [thread:$0]  %s6208_s4, 2048, %s65_s27, [#allocation6], %s3997_s0, %s3997_s0, %s3998_s21  }
  0x9a   :  { %s3823_s30 = scalar_lea.hbm %s6096_s5, 896 }
  0x9b   :  { %p3824_p0 = scmp.ne.s32.totalorder %s6096_s5, %s3823_s30  ;;  %p3827_p1 = scmp.lt.u32.totalorder %s3823_s30, %s6096_s5 }
  0x9d   :  { %p3829_p2 = pnand %p3827_p1, %p3824_p0 }
  0x9f   :  { %3832 = shalt.err (!%p3829_p2)
}
  0xa0   :  { %s3833_s7 = scalar_lea.vmem %s4232_s11, 896  ;;  %p3838_p4 = scmp.lt.s32.totalorder %s4232_s11, %s4232_s11 }
  0xa1   :  { %p3834_p3 = scmp.ne.s32.totalorder %s4232_s11, %s3833_s7  ;;  %p3839_p5 = scmp.lt.s32.totalorder %s3833_s7, %s3833_s7 }
  0xa3   :  { %p3840_p6 = por %p3839_p5, %p3838_p4 }
  0xa5   :  { %p3841_p7 = pnand %p3840_p6, %p3834_p3 }
  0xa7   :  { %3844 = shalt.err (!%p3841_p7)
}
  0xa8   :  { %96 = dma.hbm_to_vmem [thread:$0]  %s6096_s5, 896, %s4232_s11, [#allocation9], %s3997_s0, %s3997_s0, %s3998_s21  }
  0xa9   :  { %s4005_s29 = smov [#allocation13]   ;;  %s4006_s22 = smov [#allocation16]  }
  0xaa   :  { %s118_s24 = sshll.u32 %s4005_s29, 4  ;;  %s146_s3 = sshll.u32 %s4006_s22, 4  ;;  %s119_s24 = int_to_ptr.vmem [resolvable:$true] %s118_s24  ;;  %s4269_s3 = int_to_ptr.vmem [resolvable:$true] %s146_s3 }
  0xab   :  { %s3845_s1 = scalar_lea.hbm %s6100_s9, 896 }
  0xac   :  { %p3846_p8 = scmp.ne.s32.totalorder %s6100_s9, %s3845_s1  ;;  %p3849_p9 = scmp.lt.u32.totalorder %s3845_s1, %s6100_s9 }
  0xae   :  { %p3851_p10 = pnand %p3849_p9, %p3846_p8 }
  0xb0   :  { %3854 = shalt.err (!%p3851_p10)
}
  0xb1   :  { %s3855_s5 = scalar_lea.vmem %s119_s24, 896  ;;  %p3860_p12 = scmp.lt.s32.totalorder %s119_s24, %s119_s24 }
  0xb2   :  { %p3856_p11 = scmp.ne.s32.totalorder %s119_s24, %s3855_s5  ;;  %p3861_p13 = scmp.lt.s32.totalorder %s3855_s5, %s3855_s5 }
  0xb4   :  { %p3862_p0 = por %p3861_p13, %p3860_p12 }
  0xb6   :  { %p3863_p1 = pnand %p3862_p0, %p3856_p11 }
  0xb8   :  { %3866 = shalt.err (!%p3863_p1)
}
  0xb9   :  { %124 = dma.hbm_to_vmem [thread:$0]  %s6100_s9, 896, %s119_s24, [#allocation12], %s3997_s0, %s3997_s0, %s3998_s21  }
  0xba   :  { %s3867_s7 = scalar_lea.hbm %s6104_s13, 2048 }
  0xbb   :  { %p3868_p2 = scmp.ne.s32.totalorder %s6104_s13, %s3867_s7  ;;  %p3871_p3 = scmp.lt.u32.totalorder %s3867_s7, %s6104_s13 }
  0xbd   :  { %p3873_p4 = pnand %p3871_p3, %p3868_p2 }
  0xbf   :  { %3876 = shalt.err (!%p3873_p4)
}
  0xc0   :  { %s3877_s26 = scalar_lea.vmem %s4269_s3, 2048  ;;  %p3882_p6 = scmp.lt.s32.totalorder %s4269_s3, %s4269_s3 }
  0xc1   :  { %p3878_p5 = scmp.ne.s32.totalorder %s4269_s3, %s3877_s26  ;;  %p3883_p7 = scmp.lt.s32.totalorder %s3877_s26, %s3877_s26 }
  0xc3   :  { %p3884_p8 = por %p3883_p7, %p3882_p6 }
  0xc5   :  { %p3885_p9 = pnand %p3884_p8, %p3878_p5 }
  0xc7   :  { %3888 = shalt.err (!%p3885_p9)
}
  0xc8   :  { %152 = dma.hbm_to_vmem [thread:$0]  %s6104_s13, 2048, %s4269_s3, [#allocation15], %s3997_s0, %s3997_s0, %s3998_s21  }
  0xc9   :  { %s4007_s23 = smov [#allocation19]   ;;  %s4008_s19 = smov [#allocation20]  }
  0xca   :  { %s172_s1 = sshll.u32 %s4007_s23, 4  ;;  %s184_s14 = sshll.u32 %s4008_s19, 4  ;;  %s173_s1 = int_to_ptr.vmem [resolvable:$true] %s172_s1  ;;  %s4306_s14 = int_to_ptr.vmem [resolvable:$true] %s184_s14 }
  0xcb   :  { %s3889_s5 = scalar_lea.hbm %s6107_s16, 2048 }
  0xcc   :  { %p3890_p10 = scmp.ne.s32.totalorder %s6107_s16, %s3889_s5  ;;  %p3893_p11 = scmp.lt.u32.totalorder %s3889_s5, %s6107_s16 }
  0xce   :  { %p3895_p12 = pnand %p3893_p11, %p3890_p10 }
  0xd0   :  { %3898 = shalt.err (!%p3895_p12)
}
  0xd1   :  { %s3899_s13 = scalar_lea.vmem %s173_s1, 2048  ;;  %p3904_p0 = scmp.lt.s32.totalorder %s173_s1, %s173_s1 }
  0xd2   :  { %p3900_p13 = scmp.ne.s32.totalorder %s173_s1, %s3899_s13  ;;  %p3905_p1 = scmp.lt.s32.totalorder %s3899_s13, %s3899_s13 }
  0xd4   :  { %p3906_p2 = por %p3905_p1, %p3904_p0 }
  0xd6   :  { %p3907_p3 = pnand %p3906_p2, %p3900_p13 }
  0xd8   :  { %3910 = shalt.err (!%p3907_p3)
}
  0xd9   :  { %178 = dma.hbm_to_vmem [thread:$0]  %s6107_s16, 2048, %s173_s1, [#allocation18], %s3997_s0, %s3997_s0, %s3998_s21  }
  0xda   :  { %s3911_s29 = scalar_lea.hbm %s6108_s17, 2048 }
  0xdb   :  { %p3912_p4 = scmp.ne.s32.totalorder %s6108_s17, %s3911_s29  ;;  %p3915_p5 = scmp.lt.u32.totalorder %s3911_s29, %s6108_s17 }
  0xdd   :  { %p3917_p6 = pnand %p3915_p5, %p3912_p4 }
  0xdf   :  { %3920 = shalt.err (!%p3917_p6)
}
  0xe0   :  { %s3921_s23 = scalar_lea.vmem %s4306_s14, 2048  ;;  %p3926_p8 = scmp.lt.s32.totalorder %s4306_s14, %s4306_s14 }
  0xe1   :  { %p3922_p7 = scmp.ne.s32.totalorder %s4306_s14, %s3921_s23  ;;  %p3927_p9 = scmp.lt.s32.totalorder %s3921_s23, %s3921_s23 }
  0xe3   :  { %p3928_p10 = por %p3927_p9, %p3926_p8 }
  0xe5   :  { %p3929_p11 = pnand %p3928_p10, %p3922_p7 }
  0xe7   :  { %3932 = shalt.err (!%p3929_p11)
}
  0xe8   :  { %190 = dma.hbm_to_vmem [thread:$0]  %s6108_s17, 2048, %s4306_s14, [#allocation21], %s3997_s0, %s3997_s0, %s3998_s21  }
  0xe9   :  { %3977 = dma.done.wait [#allocation3], 512  }
  0xea   :  { %3978 = vsyncadd [#allocation3], 4294966784 }
  0xeb   :  { %3979 = dma.done.wait [#allocation6], 2560  }
  0xec   :  { %3980 = vsyncadd [#allocation6], 4294964736 }
  0xed   :  { %3981 = dma.done.wait [#allocation9], 2944  }
  0xee   :  { %3982 = vsyncadd [#allocation9], 4294964352 }
  0xef   :  { %3983 = dma.done.wait [#allocation12], 2944  }
  0xf0   :  { %3984 = vsyncadd [#allocation12], 4294964352 }
  0xf1   :  { %3985 = dma.done.wait [#allocation15], 4096  }
  0xf2   :  { %3986 = vsyncadd [#allocation15], 4294963200 }
  0xf3   :  { %3987 = dma.done.wait [#allocation18], 4096  }
  0xf4   :  { %3988 = vsyncadd [#allocation18], 4294963200 }
  0xf5   :  { %3989 = dma.done.wait [#allocation21], 2048  }
  0xf6   :  { %3990 = vsyncadd [#allocation21], 4294965248  ;;  %v330_v0 = vld [vmem:[#allocation8] sm:$0xff]  ;;  %v331_v1 = vld [vmem:[#allocation8 + $0x8] sm:$0xff]  ;;  %s6209_s14 = sld [smem:[#allocation113_spill]]  ;;  %s4009_s30 = smov 16  }
  0xf7   :  { %v332_v2 = vld [vmem:[#allocation8 + $0x10] sm:$0xff]  ;;  %v3355_v3 = vpack.c.bf16 %v331_v1, %v330_v0  ;;  %v333_v4 = vld [vmem:[#allocation8 + $0x18] sm:$0xff]  ;;  %v334_v6 = vld [vmem:[#allocation8 + $0x20] sm:$0xff]  ;;  %s4010_s2 = smov 24   ;;  %s4011_s5 = smov 120  }
  0xf8   :  { %v3359_v5 = vpack.c.bf16 %v333_v4, %v332_v2  ;;  %v335_v7 = vld [vmem:[#allocation8 + $0x28] sm:$0xff]  ;;  %v233_v9 = vld [vmem:[#allocation5] sm:$0xff]  ;;  %v336_v10 = vld [vmem:[#allocation8 + $0x30] sm:$0xff]  ;;  %s4012_s11 = smov 112   ;;  %s4013_s20 = smov 104  }
  0xf9   :  { %3356 = vmatprep.subr.bf16.mxu0 %v3355_v3  ;;  %v3363_v8 = vpack.c.bf16 %v335_v7, %v334_v6  ;;  %v337_v11 = vld [vmem:[#allocation8 + $0x38] sm:$0xff]  ;;  %3083 = vmatprep.mubr.f32.mxu0 %v233_v9  ;;  %v338_v13 = vld [vmem:[#allocation8 + $0x40] sm:$0xff]  ;;  %v339_v14 = vld [vmem:[#allocation8 + $0x48] sm:$0xff]  ;;  %s4014_s22 = smov [#allocation22]  }
  0xfa   :  { %3358 = vmatpush3.bf16.msra.mxu0 %v3355_v3  ;;  %v3367_v12 = vpack.c.bf16 %v337_v11, %v336_v10  ;;  %v3371_v15 = vpack.c.bf16 %v339_v14, %v338_v13  ;;  %v340_v16 = vld [vmem:[#allocation8 + $0x50] sm:$0xff]  ;;  %v341_v17 = vld [vmem:[#allocation8 + $0x58] sm:$0xff]  ;;  %v342_v19 = vld [vmem:[#allocation8 + $0x60] sm:$0xff]  ;;  %s2748_s26 = sshll.u32 %s4014_s22, 4  ;;  %s2749_s26 = int_to_ptr.vmem [resolvable:$true] %s2748_s26 }
  0xfb   :  { %3360 = vmatprep.subr.bf16.mxu0 %v3359_v5  ;;  %v3375_v18 = vpack.c.bf16 %v341_v17, %v340_v16  ;;  %v343_v20 = vld [vmem:[#allocation8 + $0x68] sm:$0xff]  ;;  %v344_v22 = vld [vmem:[#allocation8 + $0x70] sm:$0xff]  ;;  %v345_v23 = vld [vmem:[#allocation8 + $0x78] sm:$0xff]  ;;  %p3938_p13 = scmp.lt.s32.totalorder %s2749_s26, %s2749_s26 }
  0xfc   :  { %v3379_v21 = vpack.c.bf16 %v343_v20, %v342_v19  ;;  %v3383_v24 = vpack.c.bf16 %v345_v23, %v344_v22  ;;  %v314_v25 = vld [vmem:[#allocation7] sm:$0xff]  ;;  %v315_v26 = vld [vmem:[#allocation7 + $0x8] sm:$0xff]  ;;  %v316_v28 = vld [vmem:[#allocation7 + $0x10] sm:$0xff] }
  0xfd   :  { %v3387_v27 = vpack.c.bf16 %v315_v26, %v314_v25  ;;  %v317_v29 = vld [vmem:[#allocation7 + $0x18] sm:$0xff]  ;;  %v234_v30 = vld [vmem:[#allocation5 + $0x8] sm:$0xff]  ;;  %v235_v32 = vld [vmem:[#allocation5 + $0x10] sm:$0xff] }
  0xfe   :  { %3362 = vmatpush3.bf16.msra.mxu0 %v3359_v5  ;;  %v3391_v31 = vpack.c.bf16 %v317_v29, %v316_v28  ;;  %v318_v33 = vld [vmem:[#allocation7 + $0x20] sm:$0xff]  ;;  %v319_v34 = vld [vmem:[#allocation7 + $0x28] sm:$0xff]  ;;  %v236_v35 = vld [vmem:[#allocation5 + $0x18] sm:$0xff]  ;;  %v237_v29 = vlaneseq }
  0xff   :  { %3364 = vmatprep.subr.bf16.mxu0 %v3363_v8  ;;  %v3395_v36 = vpack.c.bf16 %v319_v34, %v318_v33  ;;  %v229_v37 = vld [vmem:[#allocation2] sm:$0xff]  ;;  %v320_v38 = vld [vmem:[#allocation7 + $0x30] sm:$0xff]  ;;  %v321_v39 = vld [vmem:[#allocation7 + $0x38] sm:$0xff] }
 0x100   :  { %v3399_v40 = vpack.c.bf16 %v321_v39, %v320_v38  ;;  %v322_v41 = vld [vmem:[#allocation7 + $0x40] sm:$0xff]  ;;  %v323_v42 = vld [vmem:[#allocation7 + $0x48] sm:$0xff]  ;;  %v324_v44 = vld [vmem:[#allocation7 + $0x50] sm:$0xff] }
 0x101   :  { %v3403_v43 = vpack.c.bf16 %v323_v42, %v322_v41  ;;  %v325_v45 = vld [vmem:[#allocation7 + $0x58] sm:$0xff]  ;;  %v326_v47 = vld [vmem:[#allocation7 + $0x60] sm:$0xff]  ;;  %v327_v48 = vld [vmem:[#allocation7 + $0x68] sm:$0xff]  ;;  %v4426_v41 = vshrl.u32 %v237_v29, 7 }
 0x102   :  { %3366 = vmatpush3.bf16.msra.mxu0 %v3363_v8  ;;  %v3407_v46 = vpack.c.bf16 %v325_v45, %v324_v44  ;;  %v3411_v49 = vpack.c.bf16 %v327_v48, %v326_v47  ;;  %v328_v50 = vld [vmem:[#allocation7 + $0x70] sm:$0xff]  ;;  %v329_v51 = vld [vmem:[#allocation7 + $0x78] sm:$0xff]  ;;  %v230_v53 = vld [vmem:[#allocation2 + $0x8] sm:$0xff] }
 0x103   :  { %3368 = vmatprep.subr.bf16.mxu0 %v3367_v12  ;;  %v3415_v52 = vpack.c.bf16 %v329_v51, %v328_v50  ;;  %v231_v54 = vld [vmem:[#allocation2 + $0x10] sm:$0xff]  ;;  %v232_v55 = vld [vmem:[#allocation2 + $0x18] sm:$0xff]  ;;  %v2782_v56 = vld [vmem:[%s6209_s14] ss:$0 sm:$0xff]  ;;  %6210 = vst [vmem:[#allocation34_spill] sm:$0xff] %v4426_v41 }
 0x104   :  { %v1297_v1 = vld [vmem:[#allocation11] sm:$0xff]  ;;  %v1298_v2 = vld [vmem:[#allocation11 + $0x8] sm:$0xff]  ;;  %v1299_v4 = vld [vmem:[#allocation11 + $0x10] sm:$0xff] }
 0x105   :  { %v3419_v3 = vpack.c.bf16 %v1298_v2, %v1297_v1  ;;  %v1300_v5 = vld [vmem:[#allocation11 + $0x18] sm:$0xff]  ;;  %v1301_v7 = vld [vmem:[#allocation11 + $0x20] sm:$0xff]  ;;  %v1302_v8 = vld [vmem:[#allocation11 + $0x28] sm:$0xff] }
 0x106   :  { %3370 = vmatpush3.bf16.msra.mxu0 %v3367_v12  ;;  %v3423_v6 = vpack.c.bf16 %v1300_v5, %v1299_v4  ;;  %v3427_v9 = vpack.c.bf16 %v1302_v8, %v1301_v7  ;;  %v1303_v10 = vld [vmem:[#allocation11 + $0x30] sm:$0xff]  ;;  %v1304_v11 = vld [vmem:[#allocation11 + $0x38] sm:$0xff]  ;;  %v1305_v13 = vld [vmem:[#allocation11 + $0x40] sm:$0xff] }
 0x107   :  { %3372 = vmatprep.subr.bf16.mxu0 %v3371_v15  ;;  %3420 = vmatprep.subr.bf16.mxu1 %v3419_v3  ;;  %v3431_v12 = vpack.c.bf16 %v1304_v11, %v1303_v10  ;;  %v1306_v14 = vld [vmem:[#allocation11 + $0x48] sm:$0xff]  ;;  %v1307_v16 = vld [vmem:[#allocation11 + $0x50] sm:$0xff]  ;;  %v1308_v17 = vld [vmem:[#allocation11 + $0x58] sm:$0xff] }
 0x108   :  { %3422 = vmatpush3.bf16.msra.mxu1 %v3419_v3  ;;  %v1309_v19 = vld [vmem:[#allocation11 + $0x60] sm:$0xff]  ;;  %v1310_v20 = vld [vmem:[#allocation11 + $0x68] sm:$0xff]  ;;  %v1311_v22 = vld [vmem:[#allocation11 + $0x70] sm:$0xff] }
 0x109   :  { %3424 = vmatprep.subr.bf16.mxu1 %v3423_v6  ;;  %v1312_v23 = vld [vmem:[#allocation11 + $0x78] sm:$0xff]  ;;  %v2786_v25 = vld [vmem:[#allocation10 + $0x18] ss:$0 sm:$0xff]  ;;  %v2793_v26 = vld [vmem:[#allocation10 + $0x3] ss:$0 sm:$0xff] }
 0x10a   :  { %3374 = vmatpush3.bf16.msra.mxu0 %v3371_v15  ;;  %v3435_v15 = vpack.c.bf16 %v1306_v14, %v1305_v13  ;;  %v2807_v28 = vld [vmem:[#allocation10 + $0x11] ss:$0 sm:$0xff]  ;;  %v2821_v34 = vld [vmem:[#allocation10 + $0x26] ss:$0 sm:$0xff]  ;;  %v4446_v48 = vld [vmem:[#allocation10 + $0x16] ss:$0 sm:$0xff] }
 0x10b   :  { %3376 = vmatprep.subr.bf16.mxu0 %v3375_v18  ;;  %v4478_v1 = vld [vmem:[#allocation10 + $0x2b] ss:$0 sm:$0xff]  ;;  %v4480_v2 = vld [vmem:[#allocation10 + $0x15] ss:$0 sm:$0xff]  ;;  %v4494_v7 = vld [vmem:[#allocation10] ss:$0 sm:$0xff] }
 0x10c   :  { %3426 = vmatpush3.bf16.msra.mxu1 %v3423_v6  ;;  %v4496_v8 = vld [vmem:[#allocation10 + $0x7] ss:$0 sm:$0xff]  ;;  %v4512_v14 = vld [vmem:[#allocation10 + $0x1c] ss:$0 sm:$0xff] }
 0x10d   :  { %3428 = vmatprep.subr.bf16.mxu1 %v3427_v9  ;;  %6231 = vst [vmem:[#allocation55_spill] sm:$0xff] %v4512_v14 }
 0x10e   :  { %3378 = vmatpush3.bf16.msra.mxu0 %v3375_v18  ;;  %v3439_v18 = vpack.c.bf16 %v1308_v17, %v1307_v16  ;;  %v4515_v16 = vand.u32 15, %v4426_v41 }
 0x10f   :  { %3380 = vmatprep.subr.bf16.mxu0 %v3379_v21 }
 0x110   :  { %3430 = vmatpush3.bf16.msra.mxu1 %v3427_v9  ;;  %v4498_v9 = vld [vmem:[#allocation10 + $0xe] ss:$0 sm:$0xff]  ;;  %6232 = vst [vmem:[#allocation56_spill] sm:$0xff] %v4515_v16 }
 0x111   :  { %3432 = vmatprep.subr.bf16.mxu1 %v3431_v12 }
 0x112   :  { %3382 = vmatpush3.bf16.msra.mxu0 %v3379_v21  ;;  %v3443_v21 = vpack.c.bf16 %v1310_v20, %v1309_v19 }
 0x113   :  { %3384 = vmatprep.subr.bf16.mxu0 %v3383_v24 }
 0x114   :  { %3434 = vmatpush3.bf16.msra.mxu1 %v3431_v12 }
 0x115   :  { %3436 = vmatprep.subr.bf16.mxu1 %v3435_v15 }
 0x116   :  { %3386 = vmatpush3.bf16.msra.mxu0 %v3383_v24  ;;  %v3447_v24 = vpack.c.bf16 %v1312_v23, %v1311_v22  ;;  %v4526_v22 = vld [vmem:[#allocation10 + $0x23] ss:$0 sm:$0xff]  ;;  %v4528_v23 = vld [vmem:[#allocation10 + $0x2a] ss:$0 sm:$0xff] }
 0x117   :  { %3388 = vmatprep.subr.bf16.mxu0 %v3387_v27  ;;  %6235 = vst [vmem:[#allocation59_spill] sm:$0xff] %v4526_v22 }
 0x118   :  { %3438 = vmatpush3.bf16.msra.mxu1 %v3435_v15 }
 0x119   :  { %3084 = vmatmul.mubr.f32.vlgmr.msra.gmra.mrb[0].mxu0 %v234_v30  ;;  %3440 = vmatprep.subr.bf16.mxu1 %v3439_v18  ;;  %v2814_v30 = vld [vmem:[#allocation10 + $0x1f] ss:$0 sm:$0xff] }
 0x11a   :  { %3390 = vmatpush3.bf16.msra.mxu0 %v3387_v27  ;;  %3086 = vmatprep.mubr.f32.mxu0 %v235_v32  ;;  %v2800_v27 = vld [vmem:[#allocation10 + $0xa] ss:$0 sm:$0xff] }
 0x11b   :  { %3392 = vmatprep.subr.bf16.mxu0 %v3391_v31 }
 0x11c   :  { %3442 = vmatpush3.bf16.msra.mxu1 %v3439_v18 }
 0x11d   :  { %3087 = vmatmul.mubr.f32.gmra.mrb[2].mxu0 %v236_v35  ;;  %3444 = vmatprep.subr.bf16.mxu1 %v3443_v21  ;;  %v2828_v35 = vld [vmem:[#allocation10 + $0x2d] ss:$0 sm:$0xff] }
 0x11e   :  { %3394 = vmatpush3.bf16.msra.mxu0 %v3391_v31  ;;  %3121 = vmatprep.mubr.f32.mxu0 %v229_v37 }
 0x11f   :  { %3396 = vmatprep.subr.bf16.mxu0 %v3395_v36 }
 0x120   :  { %3446 = vmatpush3.bf16.msra.mxu1 %v3443_v21 }
 0x121   :  { %3448 = vmatprep.subr.bf16.mxu1 %v3447_v24 }
 0x122   :  { %3398 = vmatpush3.bf16.msra.mxu0 %v3395_v36 }
 0x123   :  { %3400 = vmatprep.subr.bf16.mxu0 %v3399_v40 }
 0x124   :  { %3450 = vmatpush3.bf16.msra.mxu1 %v3447_v24 }
 0x126   :  { %3402 = vmatpush3.bf16.msra.mxu0 %v3399_v40 }
 0x127   :  { %3404 = vmatprep.subr.bf16.mxu0 %v3403_v43 }
 0x12a   :  { %3406 = vmatpush3.bf16.msra.mxu0 %v3403_v43 }
 0x12b   :  { %3408 = vmatprep.subr.bf16.mxu0 %v3407_v46 }
 0x12e   :  { %3410 = vmatpush3.bf16.msra.mxu0 %v3407_v46 }
 0x12f   :  { %3412 = vmatprep.subr.bf16.mxu0 %v3411_v49 }
 0x132   :  { %3414 = vmatpush3.bf16.msra.mxu0 %v3411_v49  ;;  %v4448_v49 = vld [vmem:[#allocation10 + $0x1] ss:$0 sm:$0xff] }
 0x133   :  { %3416 = vmatprep.subr.bf16.mxu0 %v3415_v52 }
 0x136   :  { %3418 = vmatpush3.bf16.msra.mxu0 %v3415_v52  ;;  %v239_v52 = vadd.s32 8, %v4426_v41 }
 0x138   :  { %v4517_v17 = vand.u32 15, %v239_v52  ;;  %v4540_v52 = vld [vmem:[#allocation10 + $0x2] ss:$0 sm:$0xff] }
 0x139   :  { %3122 = vmatmul.mubr.f32.vlgmr.msra.gmra.mrb[0].mxu0 %v230_v53  ;;  %v240_v53 = vadd.s32 16, %v4426_v41 }
 0x13a   :  { %3124 = vmatprep.mubr.f32.mxu0 %v231_v54  ;;  %v4458_v54 = vld [vmem:[#allocation10 + $0x8] ss:$0 sm:$0xff]  ;;  %6233 = vst [vmem:[#allocation57_spill] sm:$0xff] %v4517_v17 }
 0x13b   :  { %v4519_v18 = vand.u32 15, %v240_v53  ;;  %v4542_v53 = vld [vmem:[#allocation10 + $0x9] ss:$0 sm:$0xff] }
 0x13d   :  { %3125 = vmatmul.mubr.f32.gmra.mrb[2].mxu0 %v232_v55  ;;  %v4460_v55 = vld [vmem:[#allocation10 + $0xf] ss:$0 sm:$0xff]  ;;  %6234 = vst [vmem:[#allocation58_spill] sm:$0xff] %v4519_v18 }
 0x13e   :  { %3235 = vmatprep.mubr.f32.mxu0 %v229_v37 }
 0x20c   :  { %v3123_v57 = vpop.f32.mrb[0].mxu0 }
 0x20d   :  { %v4346_v58 = vadd.f32 %v3123_v57, %v2782_v56  ;;  %v497_v59 = vpop.f32.mrb[1].mxu0 }
 0x20e   :  { %v4352_v61 = vadd.f32 %v2782_v56, %v497_v59 }
 0x20f   :  { %537 = vrot.lane.b32.xlu1 %v4346_v58, %s4009_s30  ;;  %529 = vrot.lane.b32.xlu0 %v4346_v58, %s4010_s2  ;;  %v4403_v31 = vmul.f32 %v2786_v25, %v4346_v58  ;;  %v4406_v32 = vmul.f32 %v2793_v26, %v4346_v58  ;;  %v4409_v33 = vmul.f32 %v2800_v27, %v4346_v58 }
 0x210   :  { %v3126_v60 = vpop.f32.mrb[2].mxu0  ;;  %v4412_v36 = vmul.f32 %v2807_v28, %v4346_v58  ;;  %v4415_v37 = vmul.f32 %v2786_v25, %v4352_v61  ;;  %v4418_v38 = vmul.f32 %v2793_v26, %v4352_v61  ;;  %v4421_v39 = vmul.f32 %v2800_v27, %v4352_v61 }
 0x211   :  { %v507_v62 = vpop.f32.mrb[3].mxu0  ;;  %v4366_v63 = vadd.f32 %v3126_v60, %v2782_v56  ;;  %v4424_v40 = vmul.f32 %v2807_v28, %v4352_v61  ;;  %v4429_v42 = vmul.f32 %v2814_v30, %v4352_v61  ;;  %v4432_v43 = vmul.f32 %v2814_v30, %v4346_v58 }
 0x212   :  { %v4380_v0 = vadd.f32 %v2782_v56, %v507_v62  ;;  %v4438_v45 = vmul.f32 %v2821_v34, %v4352_v61  ;;  %v4441_v46 = vmul.f32 %v2821_v34, %v4346_v58  ;;  %v4444_v47 = vmul.f32 %v2828_v35, %v4352_v61  ;;  %v4462_v56 = vld [vmem:[#allocation10 + $0x1d] ss:$0 sm:$0xff]  ;;  %v4476_v62 = vld [vmem:[#allocation10 + $0x24] ss:$0 sm:$0xff] }
 0x213   :  { %545 = vrot.lane.b32.xlu0 %v4346_v58, %s3998_s21  ;;  %535 = vrot.lane.b32.xlu1 %v4352_v61, %s4009_s30  ;;  %6211 = vst [vmem:[#allocation35_spill] sm:$0xff] %v4429_v42  ;;  %6212 = vst [vmem:[#allocation36_spill] sm:$0xff] %v4432_v43  ;;  %v4435_v44 = vmul.f32 %v2786_v25, %v4366_v63  ;;  %v4451_v50 = vmul.f32 %v2793_v26, %v4366_v63 }
 0x214   :  { %6214 = vst [vmem:[#allocation38_spill] sm:$0xff] %v4438_v45  ;;  %6215 = vst [vmem:[#allocation39_spill] sm:$0xff] %v4441_v46  ;;  %v4454_v51 = vmul.f32 %v2800_v27, %v4366_v63  ;;  %v4465_v57 = vmul.f32 %v2814_v30, %v4366_v63  ;;  %v4468_v59 = vmul.f32 %v2786_v25, %v4380_v0 }
 0x215   :  { %6213 = vst [vmem:[#allocation37_spill] sm:$0xff] %v4435_v44  ;;  %6216 = vst [vmem:[#allocation40_spill] sm:$0xff] %v4444_v47  ;;  %v4471_v60 = vmul.f32 %v2793_v26, %v4380_v0  ;;  %v4483_v3 = vmul.f32 %v2807_v28, %v4380_v0  ;;  %v4486_v4 = vmul.f32 %v2814_v30, %v4380_v0 }
 0x216   :  { %6217 = vst [vmem:[#allocation41_spill] sm:$0xff] %v4451_v50  ;;  %6218 = vst [vmem:[#allocation42_spill] sm:$0xff] %v4454_v51  ;;  %v4489_v5 = vmul.f32 %v2807_v28, %v4366_v63  ;;  %v4492_v6 = vmul.f32 %v2828_v35, %v4346_v58  ;;  %v4501_v10 = vmul.f32 %v2821_v34, %v4380_v0  ;;  %v4534_v28 = vld [vmem:[#allocation10 + $0x17] ss:$0 sm:$0xff] }
 0x217   :  { %553 = vrot.lane.b32.xlu0 %v4346_v58, %s4011_s5  ;;  %559 = vrot.lane.b32.xlu1 %v4352_v61, %s4012_s11  ;;  %6219 = vst [vmem:[#allocation43_spill] sm:$0xff] %v4465_v57  ;;  %6220 = vst [vmem:[#allocation44_spill] sm:$0xff] %v4468_v59  ;;  %v4504_v11 = vmul.f32 %v2828_v35, %v4380_v0  ;;  %v4507_v12 = vmul.f32 %v2821_v34, %v4366_v63 }
 0x218   :  { %6221 = vst [vmem:[#allocation45_spill] sm:$0xff] %v4471_v60  ;;  %6223 = vst [vmem:[#allocation47_spill] sm:$0xff] %v4483_v3  ;;  %v4510_v13 = vmul.f32 %v2828_v35, %v4366_v63  ;;  %v4621_v3 = vld [vmem:[#allocation10 + $0xc] ss:$0 sm:$0xff] }
 0x219   :  { %6224 = vst [vmem:[#allocation48_spill] sm:$0xff] %v4486_v4  ;;  %6225 = vst [vmem:[#allocation49_spill] sm:$0xff] %v4489_v5  ;;  %v4554_v5 = vld [vmem:[#allocation10 + $0x2c] ss:$0 sm:$0xff] }
 0x21a   :  { %6226 = vst [vmem:[#allocation50_spill] sm:$0xff] %v4492_v6  ;;  %6227 = vst [vmem:[#allocation51_spill] sm:$0xff] %v4501_v10  ;;  %v4548_v10 = vld [vmem:[#allocation10 + $0x1e] ss:$0 sm:$0xff]  ;;  %v4550_v6 = vld [vmem:[#allocation10 + $0x25] ss:$0 sm:$0xff] }
 0x21b   :  { %561 = vrot.lane.b32.xlu0 %v4346_v58, %s4012_s11  ;;  %567 = vrot.lane.b32.xlu1 %v4352_v61, %s4013_s20  ;;  %6228 = vst [vmem:[#allocation52_spill] sm:$0xff] %v4504_v11  ;;  %6229 = vst [vmem:[#allocation53_spill] sm:$0xff] %v4507_v12 }
 0x21c   :  { %6230 = vst [vmem:[#allocation54_spill] sm:$0xff] %v4510_v13  ;;  %6236 = vst [vmem:[#allocation60_spill] sm:$0xff] %v4534_v28  ;;  %v4544_v13 = vld [vmem:[#allocation10 + $0x10] ss:$0 sm:$0xff] }
 0x21d   :  { %6246 = vst [vmem:[#allocation70_spill] sm:$0xff] %v4621_v3 }
 0x21f   :  { %527 = vrot.lane.b32.xlu0 %v4352_v61, %s4010_s2  ;;  %541 = vrot.lane.b32.xlu1 %v4366_v63, %s4009_s30 }
 0x223   :  { %543 = vrot.lane.b32.xlu0 %v4352_v61, %s3998_s21  ;;  %549 = vrot.lane.b32.xlu1 %v4366_v63, %s3998_s21 }
 0x227   :  { %551 = vrot.lane.b32.xlu0 %v4352_v61, %s4011_s5  ;;  %557 = vrot.lane.b32.xlu1 %v4366_v63, %s4011_s5  ;;  %v4474_v61 = vmul.f32 %v2800_v27, %v4380_v0 }
 0x229   :  { %6222 = vst [vmem:[#allocation46_spill] sm:$0xff] %v4474_v61 }
 0x22b   :  { %533 = vrot.lane.b32.xlu0 %v4366_v63, %s4010_s2  ;;  %539 = vrot.lane.b32.xlu1 %v4380_v0, %s4009_s30 }
 0x22f   :  { %565 = vrot.lane.b32.xlu0 %v4366_v63, %s4012_s11  ;;  %547 = vrot.lane.b32.xlu1 %v4380_v0, %s3998_s21 }
 0x233   :  { %555 = vrot.lane.b32.xlu1 %v4380_v0, %s4011_s5  ;;  %531 = vrot.lane.b32.xlu0 %v4380_v0, %s4010_s2 }
 0x237   :  { %563 = vrot.lane.b32.xlu1 %v4380_v0, %s4012_s11  ;;  %573 = vrot.lane.b32.xlu0 %v4366_v63, %s4013_s20 }
 0x23b   :  { %571 = vrot.lane.b32.xlu1 %v4380_v0, %s4013_s20  ;;  %569 = vrot.lane.b32.xlu0 %v4346_v58, %s4013_s20  ;;  %v241_v0 = vadd.s32 24, %v4426_v41 }
 0x23d   :  { %v4552_v17 = vand.u32 15, %v241_v0 }
 0x23f   :  { %6237 = vst [vmem:[#allocation61_spill] sm:$0xff] %v4552_v17  ;;  %v4611_v17 = vld [vmem:[#allocation10 + $0x1a] ss:$0 sm:$0xff] }
 0x240   :  { %6244 = vst [vmem:[#allocation68_spill] sm:$0xff] %v4611_v17 }
 0x281   :  { %v538_v58 = vpop.permute.xlu1 %537  ;;  %v530_v15 = vpop.permute.xlu0 %529 }
 0x282   :  { %v590_v19 = vmul.f32 %v4446_v48, %v538_v58  ;;  %v677_v20 = vmul.f32 %v4448_v49, %v538_v58  ;;  %v781_v63 = vmul.f32 %v4458_v54, %v538_v58  ;;  %v885_v21 = vmul.f32 %v4460_v55, %v538_v58 }
 0x283   :  { %v989_v24 = vmul.f32 %v4462_v56, %v538_v58  ;;  %v1093_v25 = vmul.f32 %v4476_v62, %v538_v58  ;;  %v1197_v26 = vmul.f32 %v4478_v1, %v538_v58  ;;  %v581_v27 = vmul.f32 %v4480_v2, %v530_v15 }
 0x284   :  { %v668_v29 = vmul.f32 %v4494_v7, %v530_v15  ;;  %v772_v30 = vmul.f32 %v4496_v8, %v530_v15  ;;  %v876_v34 = vmul.f32 %v4498_v9, %v530_v15  ;;  %v980_v35 = vmul.f32 %v4512_v14, %v530_v15 }
 0x285   :  { %v594_v12 = vadd.f32 %v590_v19, %v581_v27  ;;  %v1084_v58 = vmul.f32 %v4526_v22, %v530_v15  ;;  %v1188_v11 = vmul.f32 %v4528_v23, %v530_v15  ;;  %v546_v47 = vpop.permute.xlu0 %545  ;;  %v536_v18 = vpop.permute.xlu1 %535 }
 0x286   :  { %v681_v46 = vadd.f32 %v677_v20, %v668_v29  ;;  %v785_v45 = vadd.f32 %v781_v63, %v772_v30  ;;  %v889_v43 = vadd.f32 %v885_v21, %v876_v34  ;;  %v993_v42 = vadd.f32 %v989_v24, %v980_v35 }
 0x287   :  { %v1097_v16 = vadd.f32 %v1093_v25, %v1084_v58  ;;  %v4556_v19 = vadd.f32 %v1197_v26, %v1188_v11  ;;  %v603_v27 = vmul.f32 %v4534_v28, %v546_v47  ;;  %v690_v15 = vmul.f32 %v4540_v52, %v546_v47  ;;  %v4570_v25 = vld [vmem:[#allocation10 + $0x19] ss:$0 sm:$0xff] }
 0x288   :  { %v794_v41 = vmul.f32 %v4542_v53, %v546_v47  ;;  %v898_v4 = vmul.f32 %v4544_v13, %v546_v47  ;;  %v1002_v0 = vmul.f32 %v4548_v10, %v546_v47  ;;  %v1106_v20 = vmul.f32 %v4550_v6, %v546_v47 }
 0x289   :  { %6238 = vst [vmem:[#allocation62_spill] sm:$0xff] %v4556_v19  ;;  %v607_v63 = vadd.f32 %v603_v27, %v594_v12  ;;  %v694_v21 = vadd.f32 %v690_v15, %v681_v46  ;;  %v4565_v24 = vmul.f32 %v4554_v5, %v546_v47  ;;  %v4568_v11 = vmul.f32 %v4446_v48, %v536_v18  ;;  %v4572_v26 = vpop.permute.xlu0 %553  ;;  %v4574_v29 = vpop.permute.xlu1 %559  ;;  %v4580_v12 = vld [vmem:[#allocation10 + $0x4] ss:$0 sm:$0xff]  ;;  %v4582_v46 = vld [vmem:[#allocation10 + $0xb] ss:$0 sm:$0xff] }
 0x28a   :  { %6240 = vst [vmem:[#allocation64_spill] sm:$0xff] %v4572_v26  ;;  %6241 = vst [vmem:[#allocation65_spill] sm:$0xff] %v4574_v29  ;;  %v798_v30 = vadd.f32 %v794_v41, %v785_v45  ;;  %v902_v34 = vadd.f32 %v898_v4, %v889_v43  ;;  %v4576_v35 = vadd.f32 %v1002_v0, %v993_v42  ;;  %v4596_v42 = vld [vmem:[#allocation10 + $0x12] ss:$0 sm:$0xff]  ;;  %v4598_v43 = vld [vmem:[#allocation10 + $0x20] ss:$0 sm:$0xff] }
 0x28b   :  { %6239 = vst [vmem:[#allocation63_spill] sm:$0xff] %v4565_v24  ;;  %v4578_v58 = vadd.f32 %v1106_v20, %v1097_v16  ;;  %v4585_v47 = vmul.f32 %v4448_v49, %v536_v18  ;;  %v4588_v27 = vmul.f32 %v4458_v54, %v536_v18  ;;  %v4591_v15 = vmul.f32 %v4460_v55, %v536_v18  ;;  %v4606_v16 = vld [vmem:[#allocation10 + $0x27] ss:$0 sm:$0xff] }
 0x28c   :  { %6242 = vst [vmem:[#allocation66_spill] sm:$0xff] %v4576_v35  ;;  %v4594_v41 = vmul.f32 %v4462_v56, %v536_v18  ;;  %v4601_v45 = vmul.f32 %v4476_v62, %v536_v18  ;;  %v4604_v4 = vmul.f32 %v4478_v1, %v536_v18  ;;  %v620_v0 = vadd.f32 %v4403_v31, %v607_v63  ;;  %v4619_v35 = vld [vmem:[#allocation10 + $0x5] ss:$0 sm:$0xff]  ;;  %v4623_v31 = vld [vmem:[#allocation10 + $0x13] ss:$0 sm:$0xff] }
 0x28d   :  { %6243 = vst [vmem:[#allocation67_spill] sm:$0xff] %v4578_v58  ;;  %v629_v20 = vmul.f32 %v4570_v25, %v4572_v26  ;;  %v707_v24 = vadd.f32 %v4406_v32, %v694_v21  ;;  %v716_v19 = vmul.f32 %v4580_v12, %v4572_v26  ;;  %v811_v58 = vadd.f32 %v4409_v33, %v798_v30  ;;  %v4625_v63 = vpop.permute.xlu0 %561  ;;  %v4627_v61 = vpop.permute.xlu1 %567  ;;  %v4636_v30 = vld [vmem:[#allocation10 + $0x21] ss:$0 sm:$0xff] }
 0x28e   :  { %v820_v18 = vmul.f32 %v4582_v46, %v4572_v26  ;;  %6245 = vst [vmem:[#allocation69_spill] sm:$0xff] %v4619_v35  ;;  %6247 = vst [vmem:[#allocation71_spill] sm:$0xff] %v4623_v31  ;;  %v915_v32 = vadd.f32 %v4412_v36, %v902_v34  ;;  %v924_v21 = vmul.f32 %v4596_v42, %v4572_v26  ;;  %v4646_v36 = vld [vmem:[#allocation10 + $0x1b] ss:$0 sm:$0xff]  ;;  %v4648_v34 = vld [vmem:[#allocation10 + $0x6] ss:$0 sm:$0xff] }
 0x28f   :  { %6248 = vst [vmem:[#allocation72_spill] sm:$0xff] %v4625_v63  ;;  %6249 = vst [vmem:[#allocation73_spill] sm:$0xff] %v4627_v61  ;;  %v633_v60 = vadd.f32 %v629_v20, %v620_v0  ;;  %v4634_v33 = vmul.f32 %v4598_v43, %v4572_v26  ;;  %v720_v59 = vadd.f32 %v716_v19, %v707_v24 }
 0x290   :  { %6251 = vst [vmem:[#allocation75_spill] sm:$0xff] %v4636_v30  ;;  %v824_v57 = vadd.f32 %v820_v18, %v811_v58  ;;  %v4640_v51 = vmul.f32 %v4606_v16, %v4572_v26  ;;  %v4644_v0 = vmul.f32 %v4611_v17, %v4574_v29  ;;  %6254 = vst [vmem:[#allocation78_spill] sm:$0xff] %v4646_v36  ;;  %v4662_v58 = vld [vmem:[#allocation10 + $0xd] ss:$0 sm:$0xff] }
 0x291   :  { %6250 = vst [vmem:[#allocation74_spill] sm:$0xff] %v4634_v33  ;;  %6255 = vst [vmem:[#allocation79_spill] sm:$0xff] %v4648_v34  ;;  %v928_v20 = vadd.f32 %v924_v21, %v915_v32  ;;  %v4652_v33 = vmul.f32 %v4619_v35, %v4574_v29  ;;  %v4656_v19 = vmul.f32 %v4621_v3, %v4574_v29 }
 0x292   :  { %6252 = vst [vmem:[#allocation76_spill] sm:$0xff] %v4640_v51  ;;  %6253 = vst [vmem:[#allocation77_spill] sm:$0xff] %v4644_v0  ;;  %v4660_v24 = vmul.f32 %v4623_v31, %v4574_v29  ;;  %v4666_v18 = vmul.f32 %v4636_v30, %v4574_v29  ;;  %v642_v32 = vmul.f32 %v4611_v17, %v4625_v63  ;;  %v4674_v51 = vld [vmem:[#allocation10 + $0x14] ss:$0 sm:$0xff]  ;;  %v542_v0 = vpop.permute.xlu1 %541 }
 0x293   :  { %6256 = vst [vmem:[#allocation80_spill] sm:$0xff] %v4656_v19  ;;  %6258 = vst [vmem:[#allocation82_spill] sm:$0xff] %v4662_v58  ;;  %v729_v21 = vmul.f32 %v4619_v35, %v4625_v63  ;;  %v833_v26 = vmul.f32 %v4621_v3, %v4625_v63  ;;  %v528_v19 = vpop.permute.xlu0 %527  ;;  %v4680_v29 = vmul.f32 %v4636_v30, %v4625_v63 }
 0x294   :  { %6257 = vst [vmem:[#allocation81_spill] sm:$0xff] %v4660_v24  ;;  %6259 = vst [vmem:[#allocation83_spill] sm:$0xff] %v4666_v18  ;;  %v937_v24 = vmul.f32 %v4623_v31, %v4625_v63  ;;  %v4684_v18 = vmul.f32 %v4646_v36, %v4627_v61  ;;  %v4688_v35 = vmul.f32 %v4648_v34, %v4627_v61 }
 0x295   :  { %6260 = vst [vmem:[#allocation84_spill] sm:$0xff] %v4674_v51  ;;  %6261 = vst [vmem:[#allocation85_spill] sm:$0xff] %v4680_v29  ;;  %v4690_v3 = vadd.f32 %v642_v32, %v633_v60  ;;  %v4692_v50 = vadd.f32 %v729_v21, %v720_v59  ;;  %v4694_v17 = vadd.f32 %v833_v26, %v824_v57 }
 0x296   :  { %6262 = vst [vmem:[#allocation86_spill] sm:$0xff] %v4684_v18  ;;  %6263 = vst [vmem:[#allocation87_spill] sm:$0xff] %v4688_v35  ;;  %v4698_v31 = vmul.f32 %v4662_v58, %v4627_v61  ;;  %v4700_v63 = vadd.f32 %v937_v24, %v928_v20  ;;  %v4704_v29 = vmul.f32 %v4674_v51, %v4627_v61  ;;  %v550_v21 = vpop.permute.xlu1 %549 }
 0x297   :  { %6264 = vst [vmem:[#allocation88_spill] sm:$0xff] %v4690_v3  ;;  %6265 = vst [vmem:[#allocation89_spill] sm:$0xff] %v4692_v50  ;;  %v580_v18 = vmul.f32 %v4480_v2, %v528_v19  ;;  %v667_v35 = vmul.f32 %v4494_v7, %v528_v19  ;;  %v771_v60 = vmul.f32 %v4496_v8, %v528_v19  ;;  %v544_v32 = vpop.permute.xlu0 %543 }
 0x298   :  { %6266 = vst [vmem:[#allocation90_spill] sm:$0xff] %v4694_v17  ;;  %6267 = vst [vmem:[#allocation91_spill] sm:$0xff] %v4698_v31  ;;  %v875_v59 = vmul.f32 %v4498_v9, %v528_v19  ;;  %v979_v57 = vmul.f32 %v4512_v14, %v528_v19  ;;  %v1083_v26 = vmul.f32 %v4526_v22, %v528_v19 }
 0x299   :  { %6268 = vst [vmem:[#allocation92_spill] sm:$0xff] %v4700_v63  ;;  %6269 = vst [vmem:[#allocation93_spill] sm:$0xff] %v4704_v29  ;;  %v593_v20 = vadd.f32 %v4568_v11, %v580_v18  ;;  %v680_v24 = vadd.f32 %v4585_v47, %v667_v35  ;;  %v1187_v61 = vmul.f32 %v4528_v23, %v528_v19 }
 0x29a   :  { %v4716_v29 = vmul.f32 %v4446_v48, %v542_v0  ;;  %v784_v31 = vadd.f32 %v4588_v27, %v771_v60  ;;  %v888_v63 = vadd.f32 %v4591_v15, %v875_v59  ;;  %v992_v17 = vadd.f32 %v4594_v41, %v979_v57  ;;  %v558_v60 = vpop.permute.xlu1 %557 }
 0x29b   :  { %v1096_v50 = vadd.f32 %v4601_v45, %v1083_v26  ;;  %v4723_v3 = vadd.f32 %v4604_v4, %v1187_v61  ;;  %v679_v11 = vmul.f32 %v4448_v49, %v542_v0  ;;  %v783_v35 = vmul.f32 %v4458_v54, %v542_v0 }
 0x29c   :  { %v4728_v47 = vmul.f32 %v4460_v55, %v542_v0  ;;  %v4731_v19 = vmul.f32 %v4462_v56, %v542_v0  ;;  %v4734_v27 = vmul.f32 %v4476_v62, %v542_v0  ;;  %v4737_v15 = vmul.f32 %v4478_v1, %v542_v0 }
 0x29d   :  { %6270 = vst [vmem:[#allocation94_spill] sm:$0xff] %v4723_v3  ;;  %v602_v41 = vmul.f32 %v4534_v28, %v544_v32  ;;  %v689_v61 = vmul.f32 %v4540_v52, %v544_v32  ;;  %v793_v45 = vmul.f32 %v4542_v53, %v544_v32  ;;  %v897_v4 = vmul.f32 %v4544_v13, %v544_v32  ;;  %v4749_v3 = vpop.permute.xlu0 %551 }
 0x29e   :  { %v1001_v18 = vmul.f32 %v4548_v10, %v544_v32  ;;  %v1105_v57 = vmul.f32 %v4550_v6, %v544_v32  ;;  %v4746_v26 = vmul.f32 %v4554_v5, %v544_v32  ;;  %v605_v0 = vmul.f32 %v4534_v28, %v550_v21  ;;  %6272 = vst [vmem:[#allocation96_spill] sm:$0xff] %v4749_v3 }
 0x29f   :  { %v606_v59 = vadd.f32 %v602_v41, %v593_v20  ;;  %v693_v51 = vadd.f32 %v689_v61, %v680_v24  ;;  %v797_v58 = vadd.f32 %v793_v45, %v784_v31  ;;  %v901_v34 = vadd.f32 %v897_v4, %v888_v63  ;;  %v540_v4 = vpop.permute.xlu1 %539 }
 0x2a0   :  { %6271 = vst [vmem:[#allocation95_spill] sm:$0xff] %v4746_v26  ;;  %v4751_v36 = vadd.f32 %v1001_v18, %v992_v17  ;;  %v4753_v30 = vadd.f32 %v1105_v57, %v1096_v50  ;;  %v692_v44 = vmul.f32 %v4540_v52, %v550_v21  ;;  %v796_v20 = vmul.f32 %v4542_v53, %v550_v21 }
 0x2a1   :  { %v900_v41 = vmul.f32 %v4544_v13, %v550_v21  ;;  %v1004_v32 = vmul.f32 %v4548_v10, %v550_v21  ;;  %v1108_v26 = vmul.f32 %v4550_v6, %v550_v21  ;;  %v1212_v28 = vmul.f32 %v4554_v5, %v550_v21 }
 0x2a2   :  { %6273 = vst [vmem:[#allocation97_spill] sm:$0xff] %v4751_v36  ;;  %6274 = vst [vmem:[#allocation98_spill] sm:$0xff] %v4753_v30  ;;  %v619_v24 = vadd.f32 %v4415_v37, %v606_v59  ;;  %v628_v17 = vmul.f32 %v4570_v25, %v4749_v3  ;;  %v706_v50 = vadd.f32 %v4418_v38, %v693_v51 }
 0x2a3   :  { %v715_v31 = vmul.f32 %v4580_v12, %v4749_v3  ;;  %v810_v63 = vadd.f32 %v4421_v39, %v797_v58  ;;  %v819_v61 = vmul.f32 %v4582_v46, %v4749_v3  ;;  %v914_v45 = vadd.f32 %v4424_v40, %v901_v34  ;;  %v534_v58 = vpop.permute.xlu0 %533 }
 0x2a4   :  { %v923_v21 = vmul.f32 %v4596_v42, %v4749_v3  ;;  %v4775_v37 = vmul.f32 %v4598_v43, %v4749_v3  ;;  %v4777_v18 = vadd.f32 %v628_v17, %v619_v24  ;;  %v4781_v51 = vmul.f32 %v4606_v16, %v4749_v3  ;;  %v4793_v24 = vld [vmem:[#allocation10 + $0x2e] ss:$0 sm:$0xff] }
 0x2a5   :  { %v719_v38 = vadd.f32 %v715_v31, %v706_v50  ;;  %v631_v39 = vmul.f32 %v4570_v25, %v558_v60  ;;  %v4784_v59 = vadd.f32 %v819_v61, %v810_v63  ;;  %v718_v34 = vmul.f32 %v4580_v12, %v558_v60 }
 0x2a6   :  { %6275 = vst [vmem:[#allocation99_spill] sm:$0xff] %v4775_v37  ;;  %6276 = vst [vmem:[#allocation100_spill] sm:$0xff] %v4777_v18  ;;  %v4786_v40 = vadd.f32 %v923_v21, %v914_v45  ;;  %v822_v57 = vmul.f32 %v4582_v46, %v558_v60  ;;  %v4796_v17 = vmul.f32 %v4596_v42, %v558_v60 }
 0x2a7   :  { %6277 = vst [vmem:[#allocation101_spill] sm:$0xff] %v4781_v51  ;;  %6278 = vst [vmem:[#allocation102_spill] sm:$0xff] %v4784_v59  ;;  %v4791_v30 = vadd.f32 %v4652_v33, %v719_v38  ;;  %v1030_v50 = vmul.f32 %v4598_v43, %v558_v60  ;;  %v4800_v31 = vmul.f32 %v4606_v16, %v558_v60 }
 0x2a8   :  { %6279 = vst [vmem:[#allocation103_spill] sm:$0xff] %v4786_v40  ;;  %6281 = vst [vmem:[#allocation105_spill] sm:$0xff] %v4796_v17  ;;  %v4803_v63 = vmul.f32 %v4793_v24, %v558_v60  ;;  %v583_v61 = vmul.f32 %v4480_v2, %v534_v58  ;;  %v670_v45 = vmul.f32 %v4494_v7, %v534_v58 }
 0x2a9   :  { %6280 = vst [vmem:[#allocation104_spill] sm:$0xff] %v4791_v30  ;;  %6282 = vst [vmem:[#allocation106_spill] sm:$0xff] %v4800_v31  ;;  %v774_v33 = vmul.f32 %v4496_v8, %v534_v58  ;;  %v878_v21 = vmul.f32 %v4498_v9, %v534_v58  ;;  %v982_v38 = vmul.f32 %v4512_v14, %v534_v58 }
 0x2aa   :  { %6283 = vst [vmem:[#allocation107_spill] sm:$0xff] %v4803_v63  ;;  %v1086_v3 = vmul.f32 %v4526_v22, %v534_v58  ;;  %v1190_v51 = vmul.f32 %v4528_v23, %v534_v58  ;;  %v596_v37 = vadd.f32 %v4716_v29, %v583_v61  ;;  %v683_v31 = vadd.f32 %v679_v11, %v670_v45  ;;  %v548_v63 = vpop.permute.xlu1 %547  ;;  %v566_v29 = vpop.permute.xlu0 %565 }
 0x2ab   :  { %v787_v17 = vadd.f32 %v783_v35, %v774_v33  ;;  %v4814_v60 = vmul.f32 %v4446_v48, %v540_v4  ;;  %v891_v36 = vadd.f32 %v4728_v47, %v878_v21  ;;  %v995_v40 = vadd.f32 %v4731_v19, %v982_v38  ;;  %v6293_v33 = vld [vmem:[#allocation60_spill] sm:$0xff] }
 0x2ac   :  { %v1099_v59 = vadd.f32 %v4734_v27, %v1086_v3  ;;  %v1203_v30 = vadd.f32 %v4737_v15, %v1190_v51  ;;  %v609_v18 = vadd.f32 %v605_v0, %v596_v37  ;;  %v696_v22 = vadd.f32 %v692_v44, %v683_v31  ;;  %v6284_v15 = vld [vmem:[#allocation37_spill] sm:$0xff]  ;;  %v6285_v0 = vld [vmem:[#allocation68_spill] sm:$0xff]  ;;  %v6289_v37 = vld [vmem:[#allocation70_spill] sm:$0xff] }
 0x2ad   :  { %v800_v14 = vadd.f32 %v796_v20, %v787_v17  ;;  %v678_v58 = vmul.f32 %v4448_v49, %v540_v4  ;;  %v4821_v11 = vadd.f32 %v900_v41, %v891_v36  ;;  %v1008_v35 = vadd.f32 %v1004_v32, %v995_v40  ;;  %v6286_v20 = vld [vmem:[#allocation41_spill] sm:$0xff]  ;;  %v6290_v51 = vld [vmem:[#allocation71_spill] sm:$0xff] }
 0x2ae   :  { %v4823_v48 = vadd.f32 %v1108_v26, %v1099_v59  ;;  %v4825_v61 = vadd.f32 %v1212_v28, %v1203_v30  ;;  %v782_v47 = vmul.f32 %v4458_v54, %v540_v4  ;;  %v886_v19 = vmul.f32 %v4460_v55, %v540_v4  ;;  %v6287_v26 = vld [vmem:[#allocation69_spill] sm:$0xff]  ;;  %v6288_v28 = vld [vmem:[#allocation42_spill] sm:$0xff]  ;;  %v6292_v17 = vld [vmem:[#allocation75_spill] sm:$0xff] }
 0x2af   :  { %v990_v3 = vmul.f32 %v4462_v56, %v540_v4  ;;  %v1094_v27 = vmul.f32 %v4476_v62, %v540_v4  ;;  %v1198_v44 = vmul.f32 %v4478_v1, %v540_v4  ;;  %v622_v49 = vadd.f32 %v6284_v15, %v609_v18  ;;  %v556_v56 = vpop.permute.xlu1 %555  ;;  %v4841_v59 = vld [vmem:[#allocation10 + $0x28] ss:$0 sm:$0xff]  ;;  %v4843_v62 = vld [vmem:[#allocation10 + $0x2f] ss:$0 sm:$0xff]  ;;  %v6291_v18 = vld [vmem:[#allocation43_spill] sm:$0xff] }
 0x2b0   :  { %v644_v36 = vmul.f32 %v6285_v0, %v566_v29  ;;  %v709_v41 = vadd.f32 %v6286_v20, %v696_v22  ;;  %v731_v32 = vmul.f32 %v6287_v26, %v566_v29  ;;  %v813_v30 = vadd.f32 %v6288_v28, %v800_v14 }
 0x2b1   :  { %v835_v54 = vmul.f32 %v6289_v37, %v566_v29  ;;  %v4839_v55 = vmul.f32 %v6290_v51, %v566_v29  ;;  %v635_v1 = vadd.f32 %v631_v39, %v622_v49  ;;  %v1021_v40 = vadd.f32 %v6291_v18, %v1008_v35 }
 0x2b2   :  { %v722_v4 = vadd.f32 %v718_v34, %v709_v41  ;;  %v1043_v22 = vmul.f32 %v6292_v17, %v566_v29  ;;  %v826_v31 = vadd.f32 %v822_v57, %v813_v30  ;;  %v4848_v45 = vmul.f32 %v4841_v59, %v566_v29  ;;  %v532_v41 = vpop.permute.xlu0 %531 }
 0x2b3   :  { %v4851_v14 = vmul.f32 %v4843_v62, %v566_v29  ;;  %v604_v21 = vmul.f32 %v6293_v33, %v548_v63  ;;  %v4854_v38 = vadd.f32 %v644_v36, %v635_v1  ;;  %v1034_v20 = vadd.f32 %v1030_v50, %v1021_v40 }
 0x2b4   :  { %v4856_v15 = vadd.f32 %v731_v32, %v722_v4  ;;  %v691_v39 = vmul.f32 %v4540_v52, %v548_v63  ;;  %v4859_v34 = vadd.f32 %v835_v54, %v826_v31  ;;  %v795_v35 = vmul.f32 %v4542_v53, %v548_v63 }
 0x2b5   :  { %v899_v57 = vmul.f32 %v4544_v13, %v548_v63  ;;  %v1003_v49 = vmul.f32 %v4548_v10, %v548_v63  ;;  %v4864_v29 = vadd.f32 %v1043_v22, %v1034_v20  ;;  %v1107_v28 = vmul.f32 %v4550_v6, %v548_v63  ;;  %v564_v13 = vpop.permute.xlu1 %563 }
 0x2b6   :  { %v1211_v36 = vmul.f32 %v4554_v5, %v548_v63  ;;  %v630_v32 = vmul.f32 %v4570_v25, %v556_v56  ;;  %v717_v50 = vmul.f32 %v4580_v12, %v556_v56  ;;  %v821_v52 = vmul.f32 %v4582_v46, %v556_v56  ;;  %v6294_v46 = vld [vmem:[#allocation55_spill] sm:$0xff] }
 0x2b7   :  { %v925_v30 = vmul.f32 %v4596_v42, %v556_v56  ;;  %v1029_v53 = vmul.f32 %v4598_v43, %v556_v56  ;;  %v4874_v10 = vmul.f32 %v4606_v16, %v556_v56  ;;  %v4877_v54 = vmul.f32 %v4793_v24, %v556_v56  ;;  %v6295_v42 = vld [vmem:[#allocation59_spill] sm:$0xff] }
 0x2b8   :  { %v582_v6 = vmul.f32 %v4480_v2, %v532_v41  ;;  %v669_v5 = vmul.f32 %v4494_v7, %v532_v41  ;;  %v773_v25 = vmul.f32 %v4496_v8, %v532_v41  ;;  %v877_v12 = vmul.f32 %v4498_v9, %v532_v41 }
 0x2b9   :  { %v981_v63 = vmul.f32 %v6294_v46, %v532_v41  ;;  %v1085_v1 = vmul.f32 %v6295_v42, %v532_v41  ;;  %v1189_v16 = vmul.f32 %v4528_v23, %v532_v41  ;;  %v643_v56 = vmul.f32 %v6285_v0, %v564_v13  ;;  %v6297_v41 = vld [vmem:[#allocation45_spill] sm:$0xff] }
 0x2ba   :  { %v595_v43 = vadd.f32 %v4814_v60, %v582_v6  ;;  %v682_v4 = vadd.f32 %v678_v58, %v669_v5  ;;  %v786_v18 = vadd.f32 %v782_v47, %v773_v25  ;;  %v890_v40 = vadd.f32 %v886_v19, %v877_v12  ;;  %v6296_v58 = vld [vmem:[#allocation44_spill] sm:$0xff]  ;;  %v4896_v19 = vpop.permute.xlu0 %573 }
 0x2bb   :  { %v994_v2 = vadd.f32 %v990_v3, %v981_v63  ;;  %v1098_v22 = vadd.f32 %v1094_v27, %v1085_v1  ;;  %v1202_v8 = vadd.f32 %v1198_v44, %v1189_v16  ;;  %v730_v9 = vmul.f32 %v6287_v26, %v564_v13  ;;  %v6298_v3 = vld [vmem:[#allocation46_spill] sm:$0xff]  ;;  %v6299_v44 = vld [vmem:[#allocation47_spill] sm:$0xff] }
 0x2bc   :  { %v608_v7 = vadd.f32 %v604_v21, %v595_v43  ;;  %v695_v31 = vadd.f32 %v691_v39, %v682_v4  ;;  %v799_v33 = vadd.f32 %v795_v35, %v786_v18  ;;  %v903_v20 = vadd.f32 %v899_v57, %v890_v40  ;;  %v6300_v39 = vld [vmem:[#allocation48_spill] sm:$0xff]  ;;  %v6301_v1 = vld [vmem:[#allocation78_spill] sm:$0xff]  ;;  %v6302_v43 = vld [vmem:[#allocation79_spill] sm:$0xff] }
 0x2bd   :  { %v1007_v46 = vadd.f32 %v1003_v49, %v994_v2  ;;  %v4889_v42 = vadd.f32 %v1107_v28, %v1098_v22  ;;  %v4891_v60 = vadd.f32 %v1211_v36, %v1202_v8  ;;  %v834_v47 = vmul.f32 %v6289_v37, %v564_v13  ;;  %v6304_v40 = vld [vmem:[#allocation84_spill] sm:$0xff] }
 0x2be   :  { %v621_v23 = vadd.f32 %v6296_v58, %v608_v7  ;;  %v708_v0 = vadd.f32 %v6297_v41, %v695_v31  ;;  %v812_v27 = vadd.f32 %v6298_v3, %v799_v33  ;;  %v916_v21 = vadd.f32 %v6299_v44, %v903_v20  ;;  %v4934_v7 = vpop.permute.xlu0 %569  ;;  %v6305_v31 = vld [vmem:[#allocation34_spill] sm:$0xff]  ;;  %v6306_v33 = vld [vmem:[#allocation56_spill] sm:$0xff] }
 0x2bf   :  { %v938_v26 = vmul.f32 %v6290_v51, %v564_v13  ;;  %v1020_v35 = vadd.f32 %v6300_v39, %v1007_v46  ;;  %v1042_v28 = vmul.f32 %v6292_v17, %v564_v13  ;;  %v4904_v36 = vmul.f32 %v4841_v59, %v564_v13  ;;  %v6329_v39 = vld [vmem:[#allocation73_spill] sm:$0xff] }
 0x2c0   :  { %v634_v57 = vadd.f32 %v630_v32, %v621_v23  ;;  %v721_v49 = vadd.f32 %v717_v50, %v708_v0  ;;  %v825_v6 = vadd.f32 %v821_v52, %v812_v27  ;;  %v929_v5 = vadd.f32 %v925_v30, %v916_v21  ;;  %v4913_v50 = vpop.permute.xlu1 %571  ;;  %v2817_v52 = vld [vmem:[#allocation10 + $0x22] ss:$0 sm:$0xff]  ;;  %v6303_v30 = vld [vmem:[#allocation82_spill] sm:$0xff] }
 0x2c1   :  { %v1033_v37 = vadd.f32 %v1029_v53, %v1020_v35  ;;  %v4907_v25 = vmul.f32 %v4843_v62, %v564_v13  ;;  %v657_v51 = vmul.f32 %v6301_v1, %v4896_v19  ;;  %v744_v32 = vmul.f32 %v6302_v43, %v4896_v19  ;;  %v4919_v13 = vld [vmem:[#allocation10 + $0x29] ss:$0 sm:$0xff]  ;;  %v6327_v35 = vld [vmem:[#allocation66_spill] sm:$0xff] }
 0x2c2   :  { %v647_v12 = vadd.f32 %v643_v56, %v634_v57  ;;  %v734_v63 = vadd.f32 %v730_v9, %v721_v49  ;;  %v838_v17 = vadd.f32 %v834_v47, %v825_v6  ;;  %v942_v4 = vadd.f32 %v938_v26, %v929_v5  ;;  %v6307_v57 = vld [vmem:[#allocation88_spill] sm:$0xff]  ;;  %v6309_v6 = vld [vmem:[#allocation77_spill] sm:$0xff] }
 0x2c3   :  { %v4915_v16 = vadd.f32 %v1042_v28, %v1033_v37  ;;  %v848_v53 = vmul.f32 %v6303_v30, %v4896_v19  ;;  %v4922_v56 = vadd.f32 %v657_v51, %v4854_v38  ;;  %v4925_v18 = vadd.f32 %v744_v32, %v4856_v15  ;;  %v6308_v28 = vld [vmem:[#allocation100_spill] sm:$0xff] }
 0x2c4   :  { %v4929_v2 = vmul.f32 %v6304_v40, %v4896_v19  ;;  %v4932_v22 = vmul.f32 %v2817_v52, %v4896_v19  ;;  %vm753_vm0 = vcmp.lt.s32.totalorder %v6305_v31, 3  ;;  %v4939_v8 = vmul.f32 %v4919_v13, %v4896_v19 }
 0x2c5   :  { %v656_v38 = vmul.f32 %v6301_v1, %v4913_v50  ;;  %v743_v15 = vmul.f32 %v6302_v43, %v4913_v50  ;;  %v847_v9 = vmul.f32 %v6303_v30, %v4913_v50  ;;  %vm290_vm1 = vcmp.ge.s32.totalorder %v6306_v33, 3 }
 0x2c6   :  { %v6153_v20 = vrot.slane %v4925_v18, 5  ;;  %v951_v46 = vmul.f32 %v6304_v40, %v4913_v50  ;;  %v4952_v58 = vmul.f32 %v2817_v52, %v4913_v50  ;;  %v4956_v23 = vmul.f32 %v4919_v13, %v4913_v50 }
 0x2c7   :  { %vm857_vm2 = vcmp.lt.s32.totalorder %v6305_v31, 2  ;;  %v4959_v41 = vadd.f32 %v656_v38, %v647_v12  ;;  %v4961_v0 = vadd.f32 %v743_v15, %v734_v63  ;;  %v4963_v47 = vadd.f32 %v847_v9, %v838_v17  ;;  %v6310_v12 = vld [vmem:[#allocation89_spill] sm:$0xff]  ;;  %v6313_v17 = vld [vmem:[#allocation86_spill] sm:$0xff]  ;;  %v6317_v9 = vld [vmem:[#allocation80_spill] sm:$0xff] }
 0x2c8   :  { %v655_v3 = vmul.f32 %v6301_v1, %v4934_v7  ;;  %vm294_vm3 = vcmp.ge.s32.totalorder %v6306_v33, 2  ;;  %v4968_v27 = vadd.f32 %v951_v46, %v942_v4  ;;  %v742_v44 = vmul.f32 %v6302_v43, %v4934_v7  ;;  %v6311_v1 = vld [vmem:[#allocation90_spill] sm:$0xff]  ;;  %v6312_v43 = vld [vmem:[#allocation92_spill] sm:$0xff] }
 0x2c9   :  { %v846_v21 = vmul.f32 %v6303_v30, %v4934_v7  ;;  %v950_v26 = vmul.f32 %v6304_v40, %v4934_v7  ;;  %v645_v5 = vadd.f32 %v6309_v6, %v6308_v28  ;;  %v6314_v30 = vld [vmem:[#allocation104_spill] sm:$0xff]  ;;  %v6315_v40 = vld [vmem:[#allocation87_spill] sm:$0xff]  ;;  %v6316_v15 = vld [vmem:[#allocation102_spill] sm:$0xff]  ;;  %vm961_vm4 = vcmp.lt.s32.totalorder %v6305_v31, 1 }
 0x2ca   :  { %v4979_v49 = vadd.f32 %v655_v3, %v6307_v57  ;;  %v4985_v63 = vadd.f32 %v742_v44, %v6310_v12  ;;  %v4996_v38 = vadd.f32 %v6315_v40, %v6314_v30  ;;  %v836_v46 = vadd.f32 %v6317_v9, %v6316_v15  ;;  %v6320_v28 = vld [vmem:[#allocation103_spill] sm:$0xff]  ;;  %v6321_v6 = vld [vmem:[#allocation81_spill] sm:$0xff] }
 0x2cb   :  { %v4988_v51 = vadd.f32 %v846_v21, %v6311_v1  ;;  %v4991_v32 = vadd.f32 %v950_v26, %v6312_v43  ;;  %v658_v4 = vadd.f32 %v6313_v17, %v645_v5  ;;  %v5001_v3 = vadd.f32 %v848_v53, %v4859_v34  ;;  %v6319_v26 = vld [vmem:[#allocation49_spill] sm:$0xff]  ;;  %v6322_v1 = vld [vmem:[#allocation91_spill] sm:$0xff]  ;;  %v6334_v21 = vld [vmem:[#allocation38_spill] sm:$0xff] }
 0x2cc   :  { %vm298_vm5 = vcmp.ge.s32.totalorder %v6306_v33, 1  ;;  %v917_v57 = vadd.f32 %v6319_v26, %v4821_v11  ;;  %v940_v5 = vadd.f32 %v6321_v6, %v6320_v28  ;;  %v6154_v12 = vrot.slane %v4996_v38, 5  ;;  %v6323_v53 = vld [vmem:[#allocation97_spill] sm:$0xff]  ;;  %v6324_v17 = vld [vmem:[#allocation35_spill] sm:$0xff]  ;;  %v6328_v11 = vld [vmem:[#allocation36_spill] sm:$0xff] }
 0x2cd   :  { %6318 = vst [vmem:[#allocation37_spill] sm:$0xff] %v5001_v3  ;;  %v5013_v43 = vadd.f32 %v6322_v1, %v836_v46  ;;  %v6155_v34 = vrot.slane %v5001_v3, 6  ;;  %v1018_v30 = vadd.f32 %v6324_v17, %v6323_v53  ;;  %v6325_v40 = vld [vmem:[#allocation105_spill] sm:$0xff]  ;;  %v1019_v26 = vadd.f32 %v6328_v11, %v6327_v35  ;;  %v6330_v1 = vld [vmem:[#allocation99_spill] sm:$0xff]  ;;  %v6350_v3 = vld [vmem:[#allocation58_spill] sm:$0xff] }
 0x2ce   :  { %v930_v15 = vadd.f32 %v6325_v40, %v917_v57  ;;  %v6326_v9 = vld [vmem:[#allocation93_spill] sm:$0xff]  ;;  %v1053_v28 = vmul.f32 %v2817_v52, %v6329_v39  ;;  %v757_v46 = vsel %vm753_vm0, %v6153_v20, %v6154_v12  ;;  %v1054_v57 = vmul.f32 %v2817_v52, %v4934_v7  ;;  %v6331_v40 = vld [vmem:[#allocation74_spill] sm:$0xff]  ;;  %v6332_v52 = vld [vmem:[#allocation83_spill] sm:$0xff] }
 0x2cf   :  { %v5020_v37 = vadd.f32 %v6326_v9, %v940_v5  ;;  %v6156_v6 = vrot.slane %v5013_v43, 6  ;;  %v1031_v53 = vadd.f32 %v6330_v1, %v1018_v30  ;;  %vm1065_vm6 = vcmp.lt.s32.totalorder %v6305_v31, 7  ;;  %v6333_v20 = vld [vmem:[#allocation98_spill] sm:$0xff] }
 0x2d0   :  { %v758_v35 = vsel %vm290_vm1, %v757_v46, 0.0  ;;  %v943_v5 = vadd.f32 %v4839_v55, %v930_v15  ;;  %v1032_v9 = vadd.f32 %v6331_v40, %v1019_v26  ;;  %v1122_v12 = vadd.f32 %v6334_v21, %v6333_v20  ;;  %v6336_v26 = vld [vmem:[#allocation85_spill] sm:$0xff]  ;;  %v6337_v46 = vld [vmem:[#allocation67_spill] sm:$0xff] }
 0x2d1   :  { %v762_v11 = vadd.f32 %v758_v35, %v658_v4  ;;  %v861_v30 = vsel %vm857_vm2, %v6155_v34, %v6156_v6  ;;  %v1044_v1 = vadd.f32 %v6332_v52, %v1031_v53  ;;  %v6338_v35 = vld [vmem:[#allocation39_spill] sm:$0xff]  ;;  %v6339_v34 = vld [vmem:[#allocation101_spill] sm:$0xff]  ;;  %vm1169_vm7 = vcmp.lt.s32.totalorder %v6305_v31, 6 }
 0x2d2   :  { %v862_v55 = vsel %vm294_vm3, %v861_v30, 0.0  ;;  %v5052_v15 = vadd.f32 %v4929_v2, %v943_v5  ;;  %v1045_v4 = vadd.f32 %v6336_v26, %v1032_v9  ;;  %v1123_v40 = vadd.f32 %v6338_v35, %v6337_v46  ;;  %v6340_v53 = vld [vmem:[#allocation65_spill] sm:$0xff]  ;;  %v6341_v2 = vld [vmem:[#allocation76_spill] sm:$0xff] }
 0x2d3   :  { %v866_v44 = vadd.f32 %v862_v55, %v762_v11  ;;  %v5057_v17 = vadd.f32 %v1053_v28, %v1044_v1  ;;  %v1135_v6 = vadd.f32 %v6339_v34, %v1122_v12  ;;  %v1144_v52 = vmul.f32 %v4841_v59, %v6340_v53  ;;  %v6342_v30 = vld [vmem:[#allocation72_spill] sm:$0xff] }
 0x2d4   :  { %6335 = vst [vmem:[#allocation68_spill] sm:$0xff] %v5052_v15  ;;  %v960_v20 = vrot.slane %v5052_v15, 7  ;;  %v1058_v21 = vadd.f32 %v1054_v57, %v1045_v4  ;;  %v1136_v5 = vadd.f32 %v6341_v2, %v1123_v40  ;;  %v1145_v9 = vmul.f32 %v4841_v59, %v6342_v30  ;;  %v6344_v4 = vld [vmem:[#allocation94_spill] sm:$0xff]  ;;  %v6345_v59 = vld [vmem:[#allocation95_spill] sm:$0xff]  ;;  %v6348_v2 = vld [vmem:[#allocation96_spill] sm:$0xff] }
 0x2d5   :  { %v1148_v11 = vadd.f32 %v1144_v52, %v1135_v6  ;;  %v1157_v28 = vmul.f32 %v4919_v13, %v6329_v39  ;;  %v1158_v12 = vmul.f32 %v4919_v13, %v4934_v7  ;;  %v6343_v34 = vrot.slane %v5020_v37, 7  ;;  %v6346_v40 = vld [vmem:[#allocation62_spill] sm:$0xff]  ;;  %v6347_v52 = vld [vmem:[#allocation63_spill] sm:$0xff]  ;;  %v6349_v15 = vld [vmem:[#allocation57_spill] sm:$0xff] }
 0x2d6   :  { %v1062_v1 = vrot.slane %v1058_v21, 1  ;;  %v1149_v55 = vadd.f32 %v1145_v9, %v1136_v5  ;;  %v1213_v46 = vadd.f32 %v6345_v59, %v6344_v4  ;;  %v1214_v13 = vadd.f32 %v6347_v52, %v6346_v40  ;;  %v6353_v59 = vld [vmem:[#allocation50_spill] sm:$0xff]  ;;  %v6354_v52 = vld [vmem:[#allocation64_spill] sm:$0xff] }
 0x2d7   :  { %v965_v57 = vsel %vm961_vm4, %v960_v20, %v6343_v34  ;;  %v5082_v35 = vadd.f32 %v1157_v28, %v1148_v11  ;;  %v1235_v26 = vmul.f32 %v4793_v24, %v6348_v2  ;;  %vm303_vm8 = vcmp.lt.s32.totalorder %v6349_v15, 15  ;;  %v6352_v11 = vld [vmem:[#allocation40_spill] sm:$0xff] }
 0x2d8   :  { %v966_v6 = vsel %vm298_vm5, %v965_v57, 0.0  ;;  %vm292_vm9 = vcmp.ge.s32.totalorder %v6350_v3, 3  ;;  %v6351_v5 = vrot.slane %v5057_v17, 1  ;;  %v5094_v34 = vadd.f32 %v1158_v12, %v1149_v55  ;;  %v5097_v57 = vld [vmem:[#allocation10 + $0x30] ss:$0 sm:$0xff] }
 0x2d9   :  { %v970_v21 = vadd.f32 %v966_v6, %v866_v44  ;;  %v1226_v28 = vadd.f32 %v6352_v11, %v1213_v46  ;;  %vm296_vm10 = vcmp.ge.s32.totalorder %v6350_v3, 2  ;;  %v1165_v4 = vrot.slane %v5082_v35, 2 }
 0x2da   :  { %v1068_v9 = vsel %vm1065_vm6, %v6351_v5, %v1062_v1  ;;  %v1227_v40 = vadd.f32 %v6353_v59, %v1214_v13  ;;  %v1236_v44 = vmul.f32 %v4793_v24, %v6354_v52  ;;  %v1248_v6 = vmul.f32 %v4843_v62, %v6340_v53  ;;  %v6359_v52 = vld [vmem:[#allocation51_spill] sm:$0xff] }
 0x2db   :  { %v1074_v2 = vadd.f32 %v1068_v9, %v970_v21  ;;  %v1166_v12 = vrot.slane %v5094_v34, 2  ;;  %v1239_v55 = vadd.f32 %v1235_v26, %v1226_v28  ;;  %v1249_v46 = vmul.f32 %v4843_v62, %v6342_v30 }
 0x2dc   :  { %vm1273_vm11 = vcmp.lt.s32.totalorder %v6305_v31, 5  ;;  %vm6160_vm12 = vcmp.ge.s32.totalorder %v6350_v3, 1  ;;  %v1240_v5 = vadd.f32 %v1236_v44, %v1227_v40  ;;  %v1261_v13 = vmul.f32 %v5097_v57, %v6329_v39  ;;  %v6360_v44 = vld [vmem:[#allocation52_spill] sm:$0xff] }
 0x2dd   :  { %v1262_v24 = vmul.f32 %v5097_v57, %v4934_v7  ;;  %v6355_v53 = vrot.slane %v4985_v63, 5  ;;  %v6356_v21 = vrot.slane %v4996_v38, 5  ;;  %v1172_v62 = vsel %vm1169_vm7, %v1165_v4, %v1166_v12  ;;  %v2335_v3 = vld [vmem:[#allocation17 + $0x70] sm:$0xff] }
 0x2de   :  { %v1252_v30 = vadd.f32 %v1248_v6, %v1239_v55  ;;  %v6357_v39 = vrot.slane %v4988_v51, 6  ;;  %v6358_v34 = vrot.slane %v5013_v43, 6  ;;  %v1178_v11 = vadd.f32 %v1172_v62, %v1074_v2  ;;  %v2832_v51 = vld [vmem:[%s6097_s6] ss:$0 sm:$0xff] }
 0x2df   :  { %v756_v26 = vsel %vm753_vm0, %v6356_v21, %v6355_v53  ;;  %v1253_v38 = vadd.f32 %v1249_v46, %v1240_v5  ;;  %v958_v28 = vrot.slane %v4991_v32, 7  ;;  %v1059_v59 = vadd.f32 %v4952_v58, %v4915_v16 }
 0x2e0   :  { %v763_v9 = vadd.f32 %v756_v26, %v4979_v49  ;;  %v860_v7 = vsel %vm857_vm2, %v6358_v34, %v6357_v39  ;;  %v5135_v40 = vadd.f32 %v1261_v13, %v1252_v30  ;;  %vm307_vm13 = vcmp.lt.s32.totalorder %v6349_v15, 14 }
 0x2e1   :  { %vm6159_vm14 = vcmp.lt.s32.totalorder %v6349_v15, 13  ;;  %v1124_v43 = vadd.f32 %v6359_v52, %v4889_v42  ;;  %v1228_v6 = vadd.f32 %v6360_v44, %v4891_v60  ;;  %v1266_v2 = vadd.f32 %v1262_v24, %v1253_v38  ;;  %v2336_v15 = vld [vmem:[#allocation17 + $0x78] sm:$0xff] }
 0x2e2   :  { %v867_v49 = vadd.f32 %v860_v7, %v763_v9  ;;  %v6361_v55 = vrot.slane %v5020_v37, 7  ;;  %v1063_v16 = vrot.slane %v1059_v59, 1  ;;  %v1263_v58 = vmul.f32 %v5097_v57, %v4913_v50 }
 0x2e3   :  { %v1269_v46 = vrot.slane %v5135_v40, 3  ;;  %v1137_v13 = vadd.f32 %v4874_v10, %v1124_v43  ;;  %v1241_v42 = vadd.f32 %v4877_v54, %v1228_v6  ;;  %v1270_v53 = vrot.slane %v1266_v2, 3 }
 0x2e4   :  { %v964_v32 = vsel %vm961_vm4, %v6361_v55, %v958_v28  ;;  %v1067_v60 = vsel %vm1065_vm6, %v1062_v1, %v1063_v16  ;;  %v6362_v37 = vrot.slane %v4961_v0, 5  ;;  %v6363_v24 = vrot.slane %v4985_v63, 5 }
 0x2e5   :  { %v971_v5 = vadd.f32 %v964_v32, %v867_v49  ;;  %v6364_v50 = vrot.slane %v4963_v47, 6  ;;  %v6365_v26 = vmov %v6357_v39  ;;  %v1071_v54 = vsel %vm303_vm8, %v1067_v60, 0.0 }
 0x2e6   :  { %v755_v21 = vsel %vm753_vm0, %v6363_v24, %v6362_v37  ;;  %v1150_v62 = vadd.f32 %v4904_v36, %v1137_v13  ;;  %v1254_v1 = vadd.f32 %v4907_v25, %v1241_v42  ;;  %v1276_v30 = vsel %vm1273_vm11, %v1269_v46, %v1270_v53 }
 0x2e7   :  { %v859_v10 = vsel %vm857_vm2, %v6365_v26, %v6364_v50  ;;  %v760_v63 = vsel %vm292_vm9, %v755_v21, 0.0  ;;  %v1075_v9 = vadd.f32 %v1071_v54, %v971_v5  ;;  %v1282_v34 = vadd.f32 %v1276_v30, %v1178_v11  ;;  %v6369_v5 = vld [vmem:[#allocation106_spill] sm:$0xff]  ;;  %v6373_v26 = vld [vmem:[#allocation37_spill] sm:$0xff] }
 0x2e8   :  { %v764_v39 = vadd.f32 %v760_v63, %v4959_v41  ;;  %v864_v36 = vsel %vm296_vm10, %v859_v10, 0.0  ;;  %v1163_v25 = vadd.f32 %v4956_v23, %v1150_v62  ;;  %v1267_v7 = vadd.f32 %v1263_v58, %v1254_v1  ;;  %v6367_v41 = vld [vmem:[#allocation53_spill] sm:$0xff]  ;;  %v6368_v23 = vld [vmem:[#allocation54_spill] sm:$0xff] }
 0x2e9   :  { %v6366_v38 = vrot.slane %v4968_v27, 7  ;;  %v1060_v43 = vadd.f32 %v4932_v22, %v4864_v29  ;;  %v1125_v44 = vadd.f32 %v6367_v41, %v4823_v48  ;;  %v1293_v6 = vadd.f32 %v2832_v51, %v1282_v34  ;;  %v6370_v22 = vld [vmem:[#allocation107_spill] sm:$0xff]  ;;  %v6379_v30 = vld [vmem:[#allocation61_spill] sm:$0xff]  ;;  %v5315_v1 = vld [vmem:[#allocation13 + $0x18] ss:$0 sm:$0xff] }
 0x2ea   :  { %v868_v49 = vadd.f32 %v864_v36, %v764_v39  ;;  %v1167_v11 = vrot.slane %v1163_v25, 2  ;;  %v1271_v2 = vrot.slane %v1267_v7, 3  ;;  %v1229_v55 = vadd.f32 %v6368_v23, %v4825_v61 }
 0x2eb   :  { %v963_v59 = vsel %vm961_vm4, %v958_v28, %v6366_v38  ;;  %v1064_v58 = vrot.slane %v1060_v43, 1  ;;  %v1138_v28 = vadd.f32 %v6369_v5, %v1125_v44  ;;  %v1264_v13 = vmul.f32 %v5097_v57, %v4896_v19  ;;  %3159 = vmatprep.mubr.f32.mxu1 %v1293_v6  ;;  %v2833_v6 = vld [vmem:[%s6099_s8] ss:$0 sm:$0xff]  ;;  %v2170_v5 = vld [vmem:[#allocation14 + $0x8] sm:$0xff] }
 0x2ec   :  { %v968_v52 = vsel %vm6160_vm12, %v963_v59, 0.0  ;;  %v1171_v29 = vsel %vm1169_vm7, %v1166_v12, %v1167_v11  ;;  %v1275_v48 = vsel %vm1273_vm11, %v1270_v53, %v1271_v2  ;;  %v1242_v42 = vadd.f32 %v6370_v22, %v1229_v55  ;;  %v2173_v22 = vld [vmem:[#allocation14 + $0x20] sm:$0xff] }
 0x2ed   :  { %v972_v32 = vadd.f32 %v968_v52, %v868_v49  ;;  %v6371_v60 = vrot.slane %v4925_v18, 5  ;;  %v6372_v61 = vmov %v6362_v37  ;;  %v1175_v24 = vsel %vm307_vm13, %v1171_v29, 0.0  ;;  %v2172_v29 = vld [vmem:[#allocation14 + $0x18] sm:$0xff] }
 0x2ee   :  { %v1279_v19 = vsel %vm6159_vm14, %v1275_v48, 0.0  ;;  %v1066_v57 = vsel %vm1065_vm6, %v1063_v16, %v1064_v58  ;;  %v1151_v12 = vadd.f32 %v4848_v45, %v1138_v28  ;;  %v1179_v53 = vadd.f32 %v1175_v24, %v1075_v9  ;;  %v2177_v24 = vld [vmem:[#allocation14 + $0x40] sm:$0xff] }
 0x2ef   :  { %v754_v37 = vsel %vm753_vm0, %v6372_v61, %v6371_v60  ;;  %v1076_v21 = vadd.f32 %v1066_v57, %v972_v32  ;;  %v1255_v18 = vadd.f32 %v4851_v14, %v1242_v42  ;;  %v6374_v10 = vrot.slane %v6373_v26, 6  ;;  %v2174_v42 = vld [vmem:[#allocation14 + $0x28] sm:$0xff]  ;;  %v2175_v61 = vld [vmem:[#allocation14 + $0x30] sm:$0xff] }
 0x2f0   :  { %v765_v0 = vadd.f32 %v754_v37, %v4922_v56  ;;  %v1164_v50 = vadd.f32 %v4939_v8, %v1151_v12  ;;  %v6375_v54 = vrot.slane %v4963_v47, 6  ;;  %v6377_v16 = vmov %v6366_v38  ;;  %v2176_v37 = vld [vmem:[#allocation14 + $0x38] sm:$0xff]  ;;  %v2178_v57 = vld [vmem:[#allocation14 + $0x48] sm:$0xff] }
 0x2f1   :  { %v962_v45 = vsel %vm961_vm4, %v6377_v16, %v960_v20  ;;  %v6378_v14 = vrot.slane %v5057_v17, 1  ;;  %v1283_v8 = vadd.f32 %v1279_v19, %v1179_v53  ;;  %v1268_v63 = vadd.f32 %v1264_v13, %v1255_v18  ;;  %v2171_v13 = vld [vmem:[#allocation14 + $0x10] sm:$0xff]  ;;  %v2321_v16 = vld [vmem:[#allocation17] sm:$0xff] }
 0x2f2   :  { %v858_v62 = vsel %vm857_vm2, %v6375_v54, %v6374_v10  ;;  %vm305_vm15 = vcmp.lt.s32.totalorder %v6379_v30, 15  ;;  %v1168_v9 = vrot.slane %v1164_v50, 2  ;;  %vm309_vm14 = vcmp.lt.s32.totalorder %v6379_v30, 14  ;;  %v2179_v53 = vld [vmem:[#allocation14 + $0x50] sm:$0xff]  ;;  %v2182_v50 = vld [vmem:[#allocation14 + $0x68] sm:$0xff]  ;;  %v2184_v54 = vld [vmem:[#allocation14 + $0x78] sm:$0xff] }
 0x2f3   :  { %v1069_v56 = vsel %vm1065_vm6, %v1064_v58, %v6378_v14  ;;  %v869_v47 = vadd.f32 %v858_v62, %v765_v0  ;;  %v1294_v39 = vadd.f32 %v2832_v51, %v1283_v8  ;;  %v1272_v36 = vrot.slane %v1268_v63, 3  ;;  %v2169_v58 = vld [vmem:[#allocation14] sm:$0xff]  ;;  %v2183_v10 = vld [vmem:[#allocation14 + $0x70] sm:$0xff]  ;;  %v2543_v8 = vld [vmem:[#allocation20 + $0x8] sm:$0xff] }
 0x2f4   :  { %v1170_v27 = vsel %vm1169_vm7, %v1167_v11, %v1168_v9  ;;  %v1073_v17 = vsel %vm305_vm15, %v1069_v56, 0.0  ;;  %v1173_v20 = vsel %vm1169_vm7, %v1168_v9, %v1165_v4  ;;  %vm313_vm12 = vcmp.lt.s32.totalorder %v6379_v30, 13  ;;  %v2181_v0 = vld [vmem:[#allocation14 + $0x60] sm:$0xff]  ;;  %v2323_v63 = vld [vmem:[#allocation17 + $0x10] sm:$0xff]  ;;  %v2844_v9 = vld [vmem:[#allocation13 + $0x3] ss:$0 sm:$0xff] }
 0x2f5   :  { %v973_v34 = vadd.f32 %v962_v45, %v869_v47  ;;  %3160 = vmatmul.mubr.f32.vlgmr.msra.gmra.mrb[0].mxu1 %v1294_v39  ;;  %v1180_v25 = vadd.f32 %v1170_v27, %v1076_v21  ;;  %v1274_v7 = vsel %vm1273_vm11, %v1271_v2, %v1272_v36  ;;  %v1177_v59 = vsel %vm309_vm14, %v1173_v20, 0.0  ;;  %v2180_v21 = vld [vmem:[#allocation14 + $0x58] sm:$0xff]  ;;  %v2322_v45 = vld [vmem:[#allocation17 + $0x8] sm:$0xff]  ;;  %v2542_v14 = vld [vmem:[#allocation20] sm:$0xff] }
 0x2f6   :  { %v1277_v49 = vsel %vm1273_vm11, %v1272_v36, %v1269_v46  ;;  %v3451_v28 = vpack.c.bf16 %v2170_v5, %v2169_v58  ;;  %v3455_v48 = vpack.c.bf16 %v2172_v29, %v2171_v13  ;;  %v3459_v60 = vpack.c.bf16 %v2174_v42, %v2173_v22  ;;  %v2324_v47 = vld [vmem:[#allocation17 + $0x18] sm:$0xff]  ;;  %v2851_v39 = vld [vmem:[#allocation13 + $0xa] ss:$0 sm:$0xff]  ;;  %v2325_v27 = vld [vmem:[#allocation17 + $0x20] sm:$0xff] }
 0x2f7   :  { %v1077_v38 = vadd.f32 %v1073_v17, %v973_v34  ;;  %v1284_v35 = vadd.f32 %v1274_v7, %v1180_v25  ;;  %v1281_v4 = vsel %vm313_vm12, %v1277_v49, 0.0  ;;  %v3463_v19 = vpack.c.bf16 %v2176_v37, %v2175_v61  ;;  %v2858_v17 = vld [vmem:[#allocation13 + $0x11] ss:$0 sm:$0xff]  ;;  %v2865_v20 = vld [vmem:[#allocation13 + $0x1f] ss:$0 sm:$0xff]  ;;  %v2326_v25 = vld [vmem:[#allocation17 + $0x28] sm:$0xff] }
 0x2f8   :  { %3452 = vmatprep.subr.bf16.mxu1 %v3451_v28  ;;  %v3467_v12 = vpack.c.bf16 %v2178_v57, %v2177_v24  ;;  %v3471_v18 = vpack.c.bf16 %v2180_v21, %v2179_v53  ;;  %v3475_v26 = vpack.c.bf16 %v2182_v50, %v2181_v0  ;;  %v3479_v62 = vpack.c.bf16 %v2184_v54, %v2183_v10  ;;  %v2872_v7 = vld [vmem:[#allocation13 + $0x26] ss:$0 sm:$0xff]  ;;  %v2544_v13 = vld [vmem:[#allocation20 + $0x10] sm:$0xff]  ;;  %v2545_v29 = vld [vmem:[#allocation20 + $0x18] sm:$0xff] }
 0x2f9   :  { %v1181_v52 = vadd.f32 %v1177_v59, %v1077_v38  ;;  %v1295_v43 = vadd.f32 %v2832_v51, %v1284_v35  ;;  %3454 = vmatpush3.bf16.msra.mxu1 %v3451_v28  ;;  %v3483_v56 = vpack.c.bf16 %v2322_v45, %v2321_v16  ;;  %v5317_v36 = vpack.c.bf16 %v2543_v8, %v2542_v14  ;;  %v2879_v59 = vld [vmem:[#allocation13 + $0x2d] ss:$0 sm:$0xff]  ;;  %v5363_v22 = vld [vmem:[#allocation13 + $0x1] ss:$0 sm:$0xff]  ;;  %v5365_v42 = vld [vmem:[#allocation13 + $0x8] ss:$0 sm:$0xff] }
 0x2fa   :  { %3456 = vmatprep.subr.bf16.mxu1 %v3455_v48  ;;  %v3487_v34 = vpack.c.bf16 %v2324_v47, %v2323_v63  ;;  %v3491_v49 = vpack.c.bf16 %v2326_v25, %v2325_v27  ;;  %v2330_v57 = vld [vmem:[#allocation17 + $0x48] sm:$0xff]  ;;  %v2332_v50 = vld [vmem:[#allocation17 + $0x58] sm:$0xff]  ;;  %v5391_v10 = vld [vmem:[#allocation13 + $0x1d] ss:$0 sm:$0xff] }
 0x2fb   :  { %v1285_v41 = vadd.f32 %v1281_v4, %v1181_v52  ;;  %3162 = vmatprep.mubr.f32.mxu1 %v1295_v43  ;;  %6380 = vst [vmem:[#allocation41_spill] sm:$0xff] %v5317_v36  ;;  %3484 = vmatprep.subr.bf16.mxu0 %v3483_v56  ;;  %v5393_v54 = vld [vmem:[#allocation13 + $0x24] ss:$0 sm:$0xff]  ;;  %v5410_v8 = vld [vmem:[#allocation13 + $0x15] ss:$0 sm:$0xff] }
 0x2fc   :  { %3486 = vmatpush3.bf16.msra.mxu0 %v3483_v56  ;;  %6398 = vst [vmem:[#allocation84_spill] sm:$0xff] %v5410_v8  ;;  %v5412_v63 = vld [vmem:[#allocation13] ss:$0 sm:$0xff]  ;;  %v5414_v47 = vld [vmem:[#allocation13 + $0x7] ss:$0 sm:$0xff] }
 0x2fd   :  { %v1296_v44 = vadd.f32 %v2832_v51, %v1285_v41  ;;  %3458 = vmatpush3.bf16.msra.mxu1 %v3455_v48  ;;  %3488 = vmatprep.subr.bf16.mxu0 %v3487_v34  ;;  %v2327_v41 = vld [vmem:[#allocation17 + $0x30] sm:$0xff]  ;;  %v5361_v48 = vld [vmem:[#allocation13 + $0x16] ss:$0 sm:$0xff]  ;;  %6399 = vst [vmem:[#allocation88_spill] sm:$0xff] %v5412_v63  ;;  %6400 = vst [vmem:[#allocation100_spill] sm:$0xff] %v5414_v47 }
 0x2fe   :  { %3460 = vmatprep.subr.bf16.mxu1 %v3459_v60  ;;  %v5430_v25 = vld [vmem:[#allocation13 + $0x1c] ss:$0 sm:$0xff] }
 0x2ff   :  { %3163 = vmatmul.mubr.f32.gmra.mrb[2].mxu1 %v1296_v44  ;;  %v2328_v44 = vld [vmem:[#allocation17 + $0x38] sm:$0xff]  ;;  %6406 = vst [vmem:[#allocation104_spill] sm:$0xff] %v5430_v25 }
 0x300   :  { %3490 = vmatpush3.bf16.msra.mxu0 %v3487_v34  ;;  %v3495_v24 = vpack.c.bf16 %v2328_v44, %v2327_v41  ;;  %v5432_v41 = vld [vmem:[#allocation13 + $0x23] ss:$0 sm:$0xff] }
 0x301   :  { %3462 = vmatpush3.bf16.msra.mxu1 %v3459_v60  ;;  %v5367_v60 = vld [vmem:[#allocation13 + $0xf] ss:$0 sm:$0xff]  ;;  %3492 = vmatprep.subr.bf16.mxu0 %v3491_v49  ;;  %6407 = vst [vmem:[#allocation87_spill] sm:$0xff] %v5432_v41 }
 0x302   :  { %3464 = vmatprep.subr.bf16.mxu1 %v3463_v19 }
 0x304   :  { %3494 = vmatpush3.bf16.msra.mxu0 %v3491_v49 }
 0x305   :  { %3466 = vmatpush3.bf16.msra.mxu1 %v3463_v19  ;;  %v2329_v19 = vld [vmem:[#allocation17 + $0x40] sm:$0xff]  ;;  %3496 = vmatprep.subr.bf16.mxu0 %v3495_v24 }
 0x306   :  { %3468 = vmatprep.subr.bf16.mxu1 %v3467_v12 }
 0x308   :  { %3498 = vmatpush3.bf16.msra.mxu0 %v3495_v24 }
 0x309   :  { %3470 = vmatpush3.bf16.msra.mxu1 %v3467_v12  ;;  %v2331_v12 = vld [vmem:[#allocation17 + $0x50] sm:$0xff] }
 0x30a   :  { %3472 = vmatprep.subr.bf16.mxu1 %v3471_v18  ;;  %v5436_v30 = vpack.c.bf16 %v2332_v50, %v2331_v12 }
 0x30d   :  { %3474 = vmatpush3.bf16.msra.mxu1 %v3471_v18 }
 0x30e   :  { %3476 = vmatprep.subr.bf16.mxu1 %v3475_v26 }
 0x311   :  { %3478 = vmatpush3.bf16.msra.mxu1 %v3475_v26  ;;  %v2334_v26 = vld [vmem:[#allocation17 + $0x68] sm:$0xff] }
 0x312   :  { %3480 = vmatprep.subr.bf16.mxu1 %v3479_v62 }
 0x315   :  { %3482 = vmatpush3.bf16.msra.mxu1 %v3479_v62  ;;  %v5395_v62 = vld [vmem:[#allocation13 + $0x2b] ss:$0 sm:$0xff] }
 0x316   :  { %3548 = vmatprep.subr.bf16.mxu1 %v5317_v36 }
 0x3c8   :  { %v3161_v11 = vpop.f32.mrb[0].mxu1 }
 0x3c9   :  { %v5259_v2 = vadd.f32 %v3161_v11, %v2833_v6  ;;  %v1386_v40 = vpop.f32.mrb[1].mxu1 }
 0x3ca   :  { %v5265_v46 = vadd.f32 %v2833_v6, %v1386_v40 }
 0x3cb   :  { %1415 = vrot.lane.b32.xlu1 %v5259_v2, %s4009_s30  ;;  %1407 = vrot.lane.b32.xlu0 %v5259_v2, %s4010_s2  ;;  %v5322_v38 = vmul.f32 %v5315_v1, %v5259_v2  ;;  %v5325_v35 = vmul.f32 %v2844_v9, %v5259_v2  ;;  %v5328_v52 = vmul.f32 %v2851_v39, %v5259_v2 }
 0x3cc   :  { %v5331_v4 = vmul.f32 %v2858_v17, %v5259_v2  ;;  %v5334_v43 = vmul.f32 %v2865_v20, %v5259_v2  ;;  %v5341_v11 = vmul.f32 %v5315_v1, %v5265_v46  ;;  %v5344_v40 = vmul.f32 %v2844_v9, %v5265_v46 }
 0x3cd   :  { %v5353_v58 = vmul.f32 %v2865_v20, %v5265_v46  ;;  %v5356_v5 = vmul.f32 %v2872_v7, %v5265_v46  ;;  %v5359_v28 = vmul.f32 %v2879_v59, %v5265_v46 }
 0x3ce   :  { %6381 = vst [vmem:[#allocation69_spill] sm:$0xff] %v5341_v11  ;;  %6382 = vst [vmem:[#allocation42_spill] sm:$0xff] %v5344_v40 }
 0x3cf   :  { %1423 = vrot.lane.b32.xlu0 %v5259_v2, %s3998_s21  ;;  %1437 = vrot.lane.b32.xlu1 %v5265_v46, %s4012_s11  ;;  %6385 = vst [vmem:[#allocation43_spill] sm:$0xff] %v5353_v58  ;;  %6386 = vst [vmem:[#allocation75_spill] sm:$0xff] %v5356_v5 }
 0x3d0   :  { %6387 = vst [vmem:[#allocation60_spill] sm:$0xff] %v5359_v28  ;;  %v5458_v28 = vld [vmem:[#allocation13 + $0x9] ss:$0 sm:$0xff] }
 0x3d2   :  { %v3164_v51 = vpop.f32.mrb[2].mxu1 }
 0x3d3   :  { %v1396_v23 = vpop.f32.mrb[3].mxu1  ;;  %1431 = vrot.lane.b32.xlu0 %v5259_v2, %s4011_s5  ;;  %1445 = vrot.lane.b32.xlu1 %v5265_v46, %s4013_s20  ;;  %v5275_v55 = vadd.f32 %v3164_v51, %v2833_v6  ;;  %v5347_v51 = vmul.f32 %v2851_v39, %v5265_v46 }
 0x3d4   :  { %v5293_v32 = vadd.f32 %v2833_v6, %v1396_v23  ;;  %v5337_v6 = vmul.f32 %v2872_v7, %v5259_v2  ;;  %v5350_v23 = vmul.f32 %v2858_v17, %v5265_v46 }
 0x3d5   :  { %6383 = vst [vmem:[#allocation70_spill] sm:$0xff] %v5347_v51  ;;  %v5371_v61 = vmul.f32 %v5315_v1, %v5275_v55  ;;  %v5374_v37 = vmul.f32 %v2844_v9, %v5275_v55  ;;  %v5380_v53 = vmul.f32 %v2851_v39, %v5275_v55  ;;  %v5383_v21 = vmul.f32 %v2858_v17, %v5275_v55 }
 0x3d6   :  { %6384 = vst [vmem:[#allocation71_spill] sm:$0xff] %v5350_v23  ;;  %v5386_v18 = vmul.f32 %v2865_v20, %v5275_v55  ;;  %v5389_v0 = vmul.f32 %v2872_v7, %v5275_v55  ;;  %v5399_v16 = vmul.f32 %v5315_v1, %v5293_v32  ;;  %v5402_v45 = vmul.f32 %v2844_v9, %v5293_v32 }
 0x3d7   :  { %1439 = vrot.lane.b32.xlu0 %v5259_v2, %s4012_s11  ;;  %1411 = vrot.lane.b32.xlu1 %v5275_v55, %s4010_s2  ;;  %6388 = vst [vmem:[#allocation55_spill] sm:$0xff] %v5374_v37  ;;  %6390 = vst [vmem:[#allocation44_spill] sm:$0xff] %v5380_v53  ;;  %v5405_v14 = vmul.f32 %v2851_v39, %v5293_v32  ;;  %v5408_v56 = vmul.f32 %v2858_v17, %v5293_v32  ;;  %v5428_v17 = vld [vmem:[#allocation13 + $0xe] ss:$0 sm:$0xff]  ;;  %v5514_v37 = vld [vmem:[#allocation13 + $0xb] ss:$0 sm:$0xff] }
 0x3d8   :  { %6391 = vst [vmem:[#allocation45_spill] sm:$0xff] %v5383_v21  ;;  %6392 = vst [vmem:[#allocation46_spill] sm:$0xff] %v5386_v18  ;;  %v5417_v34 = vmul.f32 %v2865_v20, %v5293_v32  ;;  %v5420_v1 = vmul.f32 %v2872_v7, %v5293_v32  ;;  %v5423_v9 = vmul.f32 %v2879_v59, %v5293_v32 }
 0x3d9   :  { %6393 = vst [vmem:[#allocation47_spill] sm:$0xff] %v5389_v0  ;;  %6394 = vst [vmem:[#allocation48_spill] sm:$0xff] %v5399_v16  ;;  %v5426_v39 = vmul.f32 %v2879_v59, %v5275_v55  ;;  %v5434_v20 = vpack.c.bf16 %v2545_v29, %v2544_v13  ;;  %v3499_v7 = vpack.c.bf16 %v2330_v57, %v2329_v19 }
 0x3da   :  { %6395 = vst [vmem:[#allocation78_spill] sm:$0xff] %v5402_v45  ;;  %6396 = vst [vmem:[#allocation79_spill] sm:$0xff] %v5405_v14  ;;  %v5468_v45 = vpack.c.bf16 %v2336_v15, %v2335_v3 }
 0x3db   :  { %1405 = vrot.lane.b32.xlu0 %v5265_v46, %s4010_s2  ;;  %1419 = vrot.lane.b32.xlu1 %v5275_v55, %s4009_s30  ;;  %6397 = vst [vmem:[#allocation82_spill] sm:$0xff] %v5408_v56  ;;  %6401 = vst [vmem:[#allocation77_spill] sm:$0xff] %v5417_v34  ;;  %v5466_v34 = vld [vmem:[#allocation13 + $0x25] ss:$0 sm:$0xff] }
 0x3dc   :  { %6402 = vst [vmem:[#allocation89_spill] sm:$0xff] %v5420_v1  ;;  %6403 = vst [vmem:[#allocation90_spill] sm:$0xff] %v5423_v9  ;;  %v5462_v9 = vld [vmem:[#allocation13 + $0x10] ss:$0 sm:$0xff]  ;;  %v5464_v1 = vld [vmem:[#allocation13 + $0x1e] ss:$0 sm:$0xff]  ;;  %3500 = vmatprep.subr.bf16.mxu0 %v3499_v7 }
 0x3dd   :  { %6404 = vst [vmem:[#allocation92_spill] sm:$0xff] %v5426_v39  ;;  %6405 = vst [vmem:[#allocation86_spill] sm:$0xff] %v5428_v17  ;;  %v5444_v39 = vld [vmem:[#allocation13 + $0x2a] ss:$0 sm:$0xff]  ;;  %3502 = vmatpush3.bf16.msra.mxu0 %v3499_v7 }
 0x3de   :  { %6408 = vst [vmem:[#allocation102_spill] sm:$0xff] %v5434_v20  ;;  %6409 = vst [vmem:[#allocation80_spill] sm:$0xff] %v5444_v39  ;;  %v5454_v20 = vld [vmem:[#allocation13 + $0x17] ss:$0 sm:$0xff]  ;;  %3504 = vmatprep.subr.bf16.mxu0 %v5436_v30 }
 0x3df   :  { %1413 = vrot.lane.b32.xlu0 %v5265_v46, %s4009_s30  ;;  %1427 = vrot.lane.b32.xlu1 %v5275_v55, %s3998_s21  ;;  %6418 = vst [vmem:[#allocation66_spill] sm:$0xff] %v5514_v37 }
 0x3e1   :  { %3506 = vmatpush3.bf16.msra.mxu0 %v5436_v30 }
 0x3e3   :  { %1421 = vrot.lane.b32.xlu0 %v5265_v46, %s3998_s21  ;;  %1435 = vrot.lane.b32.xlu1 %v5275_v55, %s4011_s5 }
 0x3e7   :  { %1429 = vrot.lane.b32.xlu0 %v5265_v46, %s4011_s5  ;;  %1417 = vrot.lane.b32.xlu1 %v5293_v32, %s4009_s30  ;;  %v5377_v46 = vmul.f32 %v2879_v59, %v5259_v2 }
 0x3e9   :  { %6389 = vst [vmem:[#allocation59_spill] sm:$0xff] %v5377_v46  ;;  %v5456_v46 = vld [vmem:[#allocation13 + $0x2] ss:$0 sm:$0xff] }
 0x3eb   :  { %1443 = vrot.lane.b32.xlu0 %v5275_v55, %s4012_s11  ;;  %1425 = vrot.lane.b32.xlu1 %v5293_v32, %s3998_s21 }
 0x3ef   :  { %1433 = vrot.lane.b32.xlu1 %v5293_v32, %s4011_s5  ;;  %1409 = vrot.lane.b32.xlu0 %v5293_v32, %s4010_s2 }
 0x3f3   :  { %1441 = vrot.lane.b32.xlu1 %v5293_v32, %s4012_s11  ;;  %1451 = vrot.lane.b32.xlu0 %v5275_v55, %s4013_s20 }
 0x3f7   :  { %1449 = vrot.lane.b32.xlu1 %v5293_v32, %s4013_s20  ;;  %1447 = vrot.lane.b32.xlu0 %v5259_v2, %s4013_s20  ;;  %v2333_v2 = vld [vmem:[#allocation17 + $0x60] sm:$0xff] }
 0x3f8   :  { %v5438_v32 = vpack.c.bf16 %v2334_v26, %v2333_v2 }
 0x3fa   :  { %3508 = vmatprep.subr.bf16.mxu0 %v5438_v32 }
 0x3fb   :  { %3510 = vmatpush3.bf16.msra.mxu0 %v5438_v32 }
 0x3fc   :  { %3512 = vmatprep.subr.bf16.mxu0 %v5468_v45 }
 0x3ff   :  { %3514 = vmatpush3.bf16.msra.mxu0 %v5468_v45 }
 0x43d   :  { %v1416_v27 = vpop.permute.xlu1 %1415  ;;  %v1408_v44 = vpop.permute.xlu0 %1407 }
 0x43e   :  { %v1468_v55 = vmul.f32 %v5361_v48, %v1416_v27  ;;  %v1555_v59 = vmul.f32 %v5363_v22, %v1416_v27  ;;  %v1658_v49 = vmul.f32 %v5365_v42, %v1416_v27  ;;  %v1761_v36 = vmul.f32 %v5367_v60, %v1416_v27 }
 0x43f   :  { %v1864_v13 = vmul.f32 %v5391_v10, %v1416_v27  ;;  %v1967_v29 = vmul.f32 %v5393_v54, %v1416_v27  ;;  %v2070_v19 = vmul.f32 %v5395_v62, %v1416_v27  ;;  %v1459_v57 = vmul.f32 %v5410_v8, %v1408_v44 }
 0x440   :  { %v1546_v12 = vmul.f32 %v5412_v63, %v1408_v44  ;;  %v1649_v50 = vmul.f32 %v5414_v47, %v1408_v44  ;;  %v1752_v2 = vmul.f32 %v5428_v17, %v1408_v44  ;;  %v1855_v26 = vmul.f32 %v5430_v25, %v1408_v44 }
 0x441   :  { %v1472_v33 = vadd.f32 %v1468_v55, %v1459_v57  ;;  %v1958_v27 = vmul.f32 %v5432_v41, %v1408_v44  ;;  %v2061_v31 = vmul.f32 %v5444_v39, %v1408_v44  ;;  %v1424_v56 = vpop.permute.xlu0 %1423  ;;  %v1438_v14 = vpop.permute.xlu1 %1437  ;;  %v5470_v55 = vld [vmem:[#allocation13 + $0x2c] ss:$0 sm:$0xff]  ;;  %v5472_v57 = vld [vmem:[#allocation13 + $0x1a] ss:$0 sm:$0xff] }
 0x442   :  { %v1559_v16 = vadd.f32 %v1555_v59, %v1546_v12  ;;  %v1662_v5 = vadd.f32 %v1658_v49, %v1649_v50  ;;  %v1765_v58 = vadd.f32 %v1761_v36, %v1752_v2  ;;  %v1868_v24 = vadd.f32 %v1864_v13, %v1855_v26  ;;  %v5480_v36 = vld [vmem:[#allocation13 + $0x5] ss:$0 sm:$0xff]  ;;  %v5482_v59 = vld [vmem:[#allocation13 + $0xc] ss:$0 sm:$0xff]  ;;  %v5484_v49 = vld [vmem:[#allocation13 + $0x13] ss:$0 sm:$0xff] }
 0x443   :  { %v1971_v44 = vadd.f32 %v1967_v29, %v1958_v27  ;;  %v2074_v23 = vadd.f32 %v2070_v19, %v2061_v31  ;;  %v1481_v51 = vmul.f32 %v5454_v20, %v1424_v56  ;;  %v1568_v40 = vmul.f32 %v5456_v46, %v1424_v56  ;;  %v5487_v19 = vld [vmem:[#allocation13 + $0x21] ss:$0 sm:$0xff]  ;;  %v5489_v12 = vld [vmem:[#allocation13 + $0x28] ss:$0 sm:$0xff]  ;;  %v5491_v50 = vld [vmem:[#allocation13 + $0x2f] ss:$0 sm:$0xff] }
 0x444   :  { %v1671_v11 = vmul.f32 %v5458_v28, %v1424_v56  ;;  %v1774_v0 = vmul.f32 %v5462_v9, %v1424_v56  ;;  %v1877_v3 = vmul.f32 %v5464_v1, %v1424_v56  ;;  %v1980_v15 = vmul.f32 %v5466_v34, %v1424_v56  ;;  %6410 = vst [vmem:[#allocation49_spill] sm:$0xff] %v5489_v12 }
 0x445   :  { %v1485_v31 = vadd.f32 %v1481_v51, %v1472_v33  ;;  %v1572_v13 = vadd.f32 %v1568_v40, %v1559_v16  ;;  %v2083_v29 = vmul.f32 %v5470_v55, %v1424_v56  ;;  %6411 = vst [vmem:[#allocation103_spill] sm:$0xff] %v5491_v50  ;;  %v5494_v2 = vmul.f32 %v5472_v57, %v1438_v14  ;;  %v1432_v26 = vpop.permute.xlu0 %1431  ;;  %v5496_v27 = vpop.permute.xlu1 %1445  ;;  %v5499_v51 = vld [vmem:[#allocation13 + $0x19] ss:$0 sm:$0xff]  ;;  %v5501_v16 = vld [vmem:[#allocation13 + $0x4] ss:$0 sm:$0xff] }
 0x446   :  { %6413 = vst [vmem:[#allocation91_spill] sm:$0xff] %v5496_v27  ;;  %v1675_v18 = vadd.f32 %v1671_v11, %v1662_v5  ;;  %v1778_v7 = vadd.f32 %v1774_v0, %v1765_v58  ;;  %v1881_v33 = vadd.f32 %v1877_v3, %v1868_v24  ;;  %v1984_v40 = vadd.f32 %v1980_v15, %v1971_v44  ;;  %v5516_v11 = vld [vmem:[#allocation13 + $0x12] ss:$0 sm:$0xff]  ;;  %v5527_v0 = vld [vmem:[#allocation13 + $0x20] ss:$0 sm:$0xff] }
 0x447   :  { %6412 = vst [vmem:[#allocation81_spill] sm:$0xff] %v5494_v2  ;;  %v5503_v56 = vadd.f32 %v2083_v29, %v2074_v23  ;;  %v5506_v21 = vmul.f32 %v5480_v36, %v1438_v14  ;;  %v5509_v2 = vmul.f32 %v5482_v59, %v1438_v14  ;;  %v5512_v53 = vmul.f32 %v5484_v49, %v1438_v14  ;;  %v5531_v44 = vld [vmem:[#allocation13 + $0x27] ss:$0 sm:$0xff]  ;;  %v5533_v3 = vld [vmem:[#allocation13 + $0x2e] ss:$0 sm:$0xff] }
 0x448   :  { %6419 = vst [vmem:[#allocation36_spill] sm:$0xff] %v5516_v11  ;;  %v5519_v58 = vmul.f32 %v5487_v19, %v1438_v14  ;;  %v5522_v5 = vmul.f32 %v5489_v12, %v1438_v14  ;;  %v5525_v23 = vmul.f32 %v5491_v50, %v1438_v14  ;;  %v1498_v24 = vadd.f32 %v5322_v38, %v1485_v31 }
 0x449   :  { %6414 = vst [vmem:[#allocation97_spill] sm:$0xff] %v5503_v56  ;;  %6415 = vst [vmem:[#allocation35_spill] sm:$0xff] %v5506_v21  ;;  %v1507_v15 = vmul.f32 %v5499_v51, %v1432_v26  ;;  %v1585_v29 = vadd.f32 %v5325_v35, %v1572_v13  ;;  %v1594_v56 = vmul.f32 %v5501_v16, %v1432_v26  ;;  %v1440_v14 = vpop.permute.xlu0 %1439  ;;  %v5548_v35 = vld [vmem:[#allocation13 + $0xd] ss:$0 sm:$0xff]  ;;  %v1412_v13 = vpop.permute.xlu1 %1411 }
 0x44a   :  { %6416 = vst [vmem:[#allocation105_spill] sm:$0xff] %v5509_v2  ;;  %6417 = vst [vmem:[#allocation93_spill] sm:$0xff] %v5512_v53  ;;  %v1791_v38 = vadd.f32 %v5331_v4, %v1778_v7  ;;  %v1800_v30 = vmul.f32 %v5516_v11, %v1432_v26  ;;  %v1894_v31 = vadd.f32 %v5334_v43, %v1881_v33  ;;  %v5546_v53 = vld [vmem:[#allocation13 + $0x6] ss:$0 sm:$0xff]  ;;  %v5556_v4 = vld [vmem:[#allocation13 + $0x14] ss:$0 sm:$0xff] }
 0x44b   :  { %6420 = vst [vmem:[#allocation73_spill] sm:$0xff] %v5519_v58  ;;  %6421 = vst [vmem:[#allocation99_spill] sm:$0xff] %v5522_v5  ;;  %v1688_v5 = vadd.f32 %v5328_v52, %v1675_v18  ;;  %v5544_v58 = vld [vmem:[#allocation13 + $0x1b] ss:$0 sm:$0xff]  ;;  %v5550_v2 = vadd.f32 %v1507_v15, %v1498_v24  ;;  %v5552_v52 = vadd.f32 %v1594_v56, %v1585_v29  ;;  %v5558_v7 = vld [vmem:[#allocation13 + $0x22] ss:$0 sm:$0xff] }
 0x44c   :  { %6422 = vst [vmem:[#allocation74_spill] sm:$0xff] %v5525_v23  ;;  %v1697_v23 = vmul.f32 %v5514_v37, %v1432_v26  ;;  %6423 = vst [vmem:[#allocation83_spill] sm:$0xff] %v5544_v58  ;;  %v1903_v18 = vmul.f32 %v5527_v0, %v1432_v26  ;;  %v1997_v21 = vadd.f32 %v5337_v6, %v1984_v40  ;;  %v5560_v43 = vld [vmem:[#allocation13 + $0x29] ss:$0 sm:$0xff] }
 0x44d   :  { %6424 = vst [vmem:[#allocation98_spill] sm:$0xff] %v5546_v53  ;;  %6425 = vst [vmem:[#allocation38_spill] sm:$0xff] %v5548_v35  ;;  %v5564_v11 = vadd.f32 %v1800_v30, %v1791_v38  ;;  %v2006_v37 = vmul.f32 %v5531_v44, %v1432_v26  ;;  %v5568_v24 = vmul.f32 %v5533_v3, %v1432_v26 }
 0x44e   :  { %6426 = vst [vmem:[#allocation85_spill] sm:$0xff] %v5550_v2  ;;  %6427 = vst [vmem:[#allocation67_spill] sm:$0xff] %v5552_v52  ;;  %v5562_v33 = vadd.f32 %v1697_v23, %v1688_v5  ;;  %v5571_v56 = vadd.f32 %v1903_v18, %v1894_v31  ;;  %v5575_v6 = vmul.f32 %v5544_v58, %v5496_v27  ;;  %v1406_v23 = vpop.permute.xlu0 %1405  ;;  %v3661_v2 = vld [vmem:[#allocation2 + $0x10] sm:$0xff] }
 0x44f   :  { %6428 = vst [vmem:[#allocation39_spill] sm:$0xff] %v5556_v4  ;;  %6429 = vst [vmem:[#allocation101_spill] sm:$0xff] %v5558_v7  ;;  %v5579_v40 = vmul.f32 %v5546_v53, %v5496_v27  ;;  %v5583_v5 = vmul.f32 %v5548_v35, %v5496_v27  ;;  %v5586_v26 = vadd.f32 %v2006_v37, %v1997_v21 }
 0x450   :  { %6430 = vst [vmem:[#allocation65_spill] sm:$0xff] %v5560_v43  ;;  %6431 = vst [vmem:[#allocation76_spill] sm:$0xff] %v5562_v33  ;;  %v5590_v32 = vmul.f32 %v5556_v4, %v5496_v27  ;;  %v5594_v15 = vmul.f32 %v5558_v7, %v5496_v27  ;;  %v5598_v29 = vmul.f32 %v5560_v43, %v5496_v27  ;;  %v5635_v33 = vld [vmem:[#allocation2 + $0x8] sm:$0xff] }
 0x451   :  { %6432 = vst [vmem:[#allocation72_spill] sm:$0xff] %v5564_v11  ;;  %6433 = vst [vmem:[#allocation94_spill] sm:$0xff] %v5568_v24  ;;  %v5601_v38 = vmul.f32 %v5472_v57, %v1440_v14  ;;  %v5604_v30 = vmul.f32 %v5480_v36, %v1440_v14  ;;  %v5607_v37 = vmul.f32 %v5482_v59, %v1440_v14  ;;  %3236 = vmatmul.mubr.f32.vlgmr.msra.gmra.mrb[4].mxu0 %v5635_v33 }
 0x452   :  { %6434 = vst [vmem:[#allocation95_spill] sm:$0xff] %v5571_v56  ;;  %6435 = vst [vmem:[#allocation62_spill] sm:$0xff] %v5575_v6  ;;  %v5610_v21 = vmul.f32 %v5484_v49, %v1440_v14  ;;  %v5613_v31 = vmul.f32 %v5487_v19, %v1440_v14  ;;  %v5616_v18 = vmul.f32 %v5489_v12, %v1440_v14  ;;  %3238 = vmatprep.mubr.f32.mxu0 %v3661_v2 }
 0x453   :  { %6436 = vst [vmem:[#allocation63_spill] sm:$0xff] %v5586_v26  ;;  %6437 = vst [vmem:[#allocation96_spill] sm:$0xff] %v5590_v32  ;;  %v5619_v27 = vmul.f32 %v5491_v50, %v1440_v14  ;;  %v1461_v24 = vmul.f32 %v5410_v8, %v1412_v13  ;;  %v1651_v32 = vmul.f32 %v5414_v47, %v1412_v13 }
 0x454   :  { %6438 = vst [vmem:[#allocation40_spill] sm:$0xff] %v5594_v15  ;;  %6439 = vst [vmem:[#allocation50_spill] sm:$0xff] %v5598_v29  ;;  %v1420_v29 = vpop.permute.xlu1 %1419  ;;  %v1548_v15 = vmul.f32 %v5412_v63, %v1412_v13  ;;  %v1754_v6 = vmul.f32 %v5428_v17, %v1412_v13  ;;  %v1857_v26 = vmul.f32 %v5430_v25, %v1412_v13 }
 0x455   :  { %6440 = vst [vmem:[#allocation64_spill] sm:$0xff] %v5601_v38  ;;  %6441 = vst [vmem:[#allocation51_spill] sm:$0xff] %v5604_v30  ;;  %v1458_v14 = vmul.f32 %v5410_v8, %v1406_v23  ;;  %v1648_v56 = vmul.f32 %v5414_v47, %v1406_v23  ;;  %v1751_v45 = vmul.f32 %v5428_v17, %v1406_v23 }
 0x456   :  { %6442 = vst [vmem:[#allocation52_spill] sm:$0xff] %v5607_v37  ;;  %6443 = vst [vmem:[#allocation53_spill] sm:$0xff] %v5610_v21  ;;  %v1854_v21 = vmul.f32 %v5430_v25, %v1406_v23  ;;  %v1957_v11 = vmul.f32 %v5432_v41, %v1406_v23  ;;  %v1414_v37 = vpop.permute.xlu0 %1413  ;;  %v2060_v30 = vmul.f32 %v5444_v39, %v1406_v23 }
 0x457   :  { %6444 = vst [vmem:[#allocation54_spill] sm:$0xff] %v5613_v31  ;;  %6445 = vst [vmem:[#allocation106_spill] sm:$0xff] %v5616_v18  ;;  %v1960_v31 = vmul.f32 %v5432_v41, %v1412_v13  ;;  %v2063_v18 = vmul.f32 %v5444_v39, %v1412_v13  ;;  %v1470_v13 = vmul.f32 %v5361_v48, %v1420_v29 }
 0x458   :  { %6446 = vst [vmem:[#allocation107_spill] sm:$0xff] %v5619_v27  ;;  %v1545_v27 = vmul.f32 %v5412_v63, %v1406_v23  ;;  %6447 = vst [vmem:[#allocation37_spill] sm:$0xff] %v5635_v33  ;;  %v1557_v52 = vmul.f32 %v5363_v22, %v1420_v29  ;;  %v1660_v38 = vmul.f32 %v5365_v42, %v1420_v29  ;;  %v1428_v39 = vpop.permute.xlu1 %1427  ;;  %v5647_v63 = vld [vmem:[#allocation2 + $0x18] sm:$0xff] }
 0x459   :  { %v1763_v43 = vmul.f32 %v5367_v60, %v1420_v29  ;;  %v1866_v7 = vmul.f32 %v5391_v10, %v1420_v29  ;;  %v1969_v4 = vmul.f32 %v5393_v54, %v1420_v29  ;;  %v2072_v35 = vmul.f32 %v5395_v62, %v1420_v29  ;;  %6448 = vst [vmem:[#allocation68_spill] sm:$0xff] %v5647_v63 }
 0x45a   :  { %v1474_v53 = vadd.f32 %v1470_v13, %v1461_v24  ;;  %v1561_v33 = vadd.f32 %v1557_v52, %v1548_v15  ;;  %v1664_v58 = vadd.f32 %v1660_v38, %v1651_v32  ;;  %v1467_v23 = vmul.f32 %v5361_v48, %v1414_v37  ;;  %3239 = vmatmul.mubr.f32.gmra.mrb[6].mxu0 %v5647_v63  ;;  %v1422_v15 = vpop.permute.xlu0 %1421 }
 0x45b   :  { %v1767_v41 = vadd.f32 %v1763_v43, %v1754_v6  ;;  %v1870_v25 = vadd.f32 %v1866_v7, %v1857_v26  ;;  %v1973_v17 = vadd.f32 %v1969_v4, %v1960_v31  ;;  %v2076_v47 = vadd.f32 %v2072_v35, %v2063_v18 }
 0x45c   :  { %v1471_v2 = vadd.f32 %v1467_v23, %v1458_v14  ;;  %v1554_v8 = vmul.f32 %v5363_v22, %v1414_v37  ;;  %v1657_v50 = vmul.f32 %v5365_v42, %v1414_v37  ;;  %v1760_v24 = vmul.f32 %v5367_v60, %v1414_v37 }
 0x45d   :  { %v1863_v52 = vmul.f32 %v5391_v10, %v1414_v37  ;;  %v1966_v32 = vmul.f32 %v5393_v54, %v1414_v37  ;;  %v2069_v43 = vmul.f32 %v5395_v62, %v1414_v37  ;;  %v1483_v4 = vmul.f32 %v5454_v20, %v1428_v39  ;;  %v1436_v37 = vpop.permute.xlu1 %1435 }
 0x45e   :  { %v1558_v35 = vadd.f32 %v1554_v8, %v1545_v27  ;;  %v1661_v7 = vadd.f32 %v1657_v50, %v1648_v56  ;;  %v1764_v6 = vadd.f32 %v1760_v24, %v1751_v45  ;;  %v1570_v26 = vmul.f32 %v5456_v46, %v1428_v39 }
 0x45f   :  { %v1867_v29 = vadd.f32 %v1863_v52, %v1854_v21  ;;  %v1970_v38 = vadd.f32 %v1966_v32, %v1957_v11  ;;  %v2073_v31 = vadd.f32 %v2069_v43, %v2060_v30  ;;  %v1487_v18 = vadd.f32 %v1483_v4, %v1474_v53 }
 0x460   :  { %v1574_v14 = vadd.f32 %v1570_v26, %v1561_v33  ;;  %v1673_v13 = vmul.f32 %v5458_v28, %v1428_v39  ;;  %v1776_v23 = vmul.f32 %v5462_v9, %v1428_v39  ;;  %v1879_v63 = vmul.f32 %v5464_v1, %v1428_v39 }
 0x461   :  { %v1982_v12 = vmul.f32 %v5466_v34, %v1428_v39  ;;  %v2085_v8 = vmul.f32 %v5470_v55, %v1428_v39  ;;  %v1480_v50 = vmul.f32 %v5454_v20, %v1422_v15  ;;  %v1567_v27 = vmul.f32 %v5456_v46, %v1422_v15 }
 0x462   :  { %v1677_v56 = vadd.f32 %v1673_v13, %v1664_v58  ;;  %v1780_v11 = vadd.f32 %v1776_v23, %v1767_v41  ;;  %v1883_v30 = vadd.f32 %v1879_v63, %v1870_v25  ;;  %v1670_v53 = vmul.f32 %v5458_v28, %v1422_v15  ;;  %v6450_v25 = vld [vmem:[#allocation55_spill] sm:$0xff]  ;;  %v6451_v13 = vld [vmem:[#allocation44_spill] sm:$0xff] }
 0x463   :  { %v1986_v33 = vadd.f32 %v1982_v12, %v1973_v17  ;;  %v5666_v21 = vadd.f32 %v2085_v8, %v2076_v47  ;;  %v1484_v45 = vadd.f32 %v1480_v50, %v1471_v2  ;;  %v1571_v24 = vadd.f32 %v1567_v27, %v1558_v35  ;;  %v1418_v35 = vpop.permute.xlu1 %1417  ;;  %v6452_v8 = vld [vmem:[#allocation66_spill] sm:$0xff] }
 0x464   :  { %v1674_v52 = vadd.f32 %v1670_v53, %v1661_v7  ;;  %v1773_v32 = vmul.f32 %v5462_v9, %v1422_v15  ;;  %v1876_v43 = vmul.f32 %v5464_v1, %v1422_v15  ;;  %v1979_v39 = vmul.f32 %v5466_v34, %v1422_v15  ;;  %v6454_v53 = vld [vmem:[#allocation36_spill] sm:$0xff] }
 0x465   :  { %6449 = vst [vmem:[#allocation108_spill] sm:$0xff] %v5666_v21  ;;  %v2082_v4 = vmul.f32 %v5470_v55, %v1422_v15  ;;  %v1500_v58 = vadd.f32 %v5371_v61, %v1487_v18  ;;  %v1509_v63 = vmul.f32 %v5499_v51, %v1436_v37  ;;  %v1587_v41 = vadd.f32 %v6450_v25, %v1574_v14  ;;  %v1430_v15 = vpop.permute.xlu0 %1429  ;;  %v6453_v61 = vld [vmem:[#allocation45_spill] sm:$0xff]  ;;  %v6455_v14 = vld [vmem:[#allocation46_spill] sm:$0xff] }
 0x466   :  { %v1777_v17 = vadd.f32 %v1773_v32, %v1764_v6  ;;  %v1880_v47 = vadd.f32 %v1876_v43, %v1867_v29  ;;  %v1983_v12 = vadd.f32 %v1979_v39, %v1970_v38  ;;  %v1596_v2 = vmul.f32 %v5501_v16, %v1436_v37  ;;  %v6456_v32 = vld [vmem:[#allocation47_spill] sm:$0xff] }
 0x467   :  { %v5676_v7 = vadd.f32 %v2082_v4, %v2073_v31  ;;  %v1513_v26 = vadd.f32 %v1509_v63, %v1500_v58  ;;  %v1690_v23 = vadd.f32 %v6451_v13, %v1677_v56  ;;  %v1699_v50 = vmul.f32 %v6452_v8, %v1436_v37  ;;  %v6458_v4 = vld [vmem:[#allocation69_spill] sm:$0xff] }
 0x468   :  { %v1600_v27 = vadd.f32 %v1596_v2, %v1587_v41  ;;  %v1793_v18 = vadd.f32 %v6453_v61, %v1780_v11  ;;  %v1802_v21 = vmul.f32 %v6454_v53, %v1436_v37  ;;  %v1896_v6 = vadd.f32 %v6455_v14, %v1883_v30  ;;  %v6460_v41 = vld [vmem:[#allocation42_spill] sm:$0xff]  ;;  %v6463_v14 = vld [vmem:[#allocation43_spill] sm:$0xff] }
 0x469   :  { %v1703_v29 = vadd.f32 %v1699_v50, %v1690_v23  ;;  %v1905_v38 = vmul.f32 %v5527_v0, %v1436_v37  ;;  %v1999_v43 = vadd.f32 %v6456_v32, %v1986_v33  ;;  %v2008_v31 = vmul.f32 %v5531_v44, %v1436_v37  ;;  %v6461_v23 = vld [vmem:[#allocation70_spill] sm:$0xff] }
 0x46a   :  { %v1806_v39 = vadd.f32 %v1802_v21, %v1793_v18  ;;  %v5687_v56 = vmul.f32 %v5533_v3, %v1436_v37  ;;  %v1497_v58 = vadd.f32 %v6458_v4, %v1484_v45  ;;  %v1506_v63 = vmul.f32 %v5499_v51, %v1430_v15  ;;  %v6462_v21 = vld [vmem:[#allocation71_spill] sm:$0xff]  ;;  %v1426_v37 = vpop.permute.xlu1 %1425 }
 0x46b   :  { %v1909_v11 = vadd.f32 %v1905_v38, %v1896_v6  ;;  %v5691_v25 = vadd.f32 %v2008_v31, %v1999_v43  ;;  %v1584_v30 = vadd.f32 %v6460_v41, %v1571_v24  ;;  %v1593_v2 = vmul.f32 %v5501_v16, %v1430_v15  ;;  %v6464_v38 = vld [vmem:[#allocation81_spill] sm:$0xff]  ;;  %v6465_v31 = vld [vmem:[#allocation75_spill] sm:$0xff] }
 0x46c   :  { %6457 = vst [vmem:[#allocation55_spill] sm:$0xff] %v5687_v56  ;;  %v1510_v13 = vadd.f32 %v1506_v63, %v1497_v58  ;;  %v1687_v33 = vadd.f32 %v6461_v23, %v1674_v52  ;;  %v1696_v50 = vmul.f32 %v6452_v8, %v1430_v15  ;;  %v1790_v61 = vadd.f32 %v6462_v21, %v1777_v17  ;;  %v6466_v58 = vld [vmem:[#allocation35_spill] sm:$0xff]  ;;  %v6469_v21 = vld [vmem:[#allocation93_spill] sm:$0xff] }
 0x46d   :  { %6459 = vst [vmem:[#allocation44_spill] sm:$0xff] %v5691_v25  ;;  %v1597_v18 = vadd.f32 %v1593_v2, %v1584_v30  ;;  %v1799_v45 = vmul.f32 %v6454_v53, %v1430_v15  ;;  %v1893_v32 = vadd.f32 %v6463_v14, %v1880_v47  ;;  %v1902_v6 = vmul.f32 %v5527_v0, %v1430_v15  ;;  %v6468_v2 = vld [vmem:[#allocation105_spill] sm:$0xff] }
 0x46e   :  { %v5702_v43 = vadd.f32 %v6464_v38, %v1510_v13  ;;  %v1700_v24 = vadd.f32 %v1696_v50, %v1687_v33  ;;  %v1996_v4 = vadd.f32 %v6465_v31, %v1983_v12  ;;  %v2005_v52 = vmul.f32 %v5531_v44, %v1430_v15  ;;  %v1444_v50 = vpop.permute.xlu0 %1443 }
 0x46f   :  { %v1610_v63 = vadd.f32 %v6466_v58, %v1597_v18  ;;  %v1803_v41 = vadd.f32 %v1799_v45, %v1790_v61  ;;  %v5707_v17 = vadd.f32 %v1902_v6, %v1893_v32  ;;  %v5710_v30 = vmul.f32 %v5533_v3, %v1430_v15  ;;  %v1434_v32 = vpop.permute.xlu1 %1433 }
 0x470   :  { %v1713_v47 = vadd.f32 %v6468_v2, %v1700_v24  ;;  %v5713_v23 = vadd.f32 %v2005_v52, %v1996_v4  ;;  %v1469_v13 = vmul.f32 %v5361_v48, %v1418_v35  ;;  %v1556_v33 = vmul.f32 %v5363_v22, %v1418_v35  ;;  %v6470_v24 = vld [vmem:[#allocation49_spill] sm:$0xff] }
 0x471   :  { %6467 = vst [vmem:[#allocation66_spill] sm:$0xff] %v5710_v30  ;;  %v5718_v12 = vadd.f32 %v5579_v40, %v1610_v63  ;;  %v5721_v18 = vadd.f32 %v6469_v21, %v1803_v41  ;;  %v1659_v61 = vmul.f32 %v5365_v42, %v1418_v35  ;;  %v1762_v15 = vmul.f32 %v5367_v60, %v1418_v35 }
 0x472   :  { %v5726_v45 = vadd.f32 %v5583_v5, %v1713_v47  ;;  %v1865_v14 = vmul.f32 %v5391_v10, %v1418_v35  ;;  %v1968_v48 = vmul.f32 %v5393_v54, %v1418_v35  ;;  %v2071_v22 = vmul.f32 %v5395_v62, %v1418_v35  ;;  %v6472_v10 = vld [vmem:[#allocation103_spill] sm:$0xff]  ;;  %v1410_v47 = vpop.permute.xlu0 %1409 }
 0x473   :  { %v1522_v40 = vmul.f32 %v5472_v57, %v1444_v50  ;;  %v1609_v6 = vmul.f32 %v5480_v36, %v1444_v50  ;;  %v1712_v38 = vmul.f32 %v5482_v59, %v1444_v50  ;;  %v1815_v42 = vmul.f32 %v5484_v49, %v1444_v50 }
 0x474   :  { %v1918_v5 = vmul.f32 %v5487_v19, %v1444_v50  ;;  %v5738_v31 = vmul.f32 %v6470_v24, %v1444_v50  ;;  %v5741_v54 = vmul.f32 %v6472_v10, %v1444_v50  ;;  %v1482_v63 = vmul.f32 %v5454_v20, %v1426_v37 }
 0x475   :  { %v1526_v62 = vadd.f32 %v1522_v40, %v1513_v26  ;;  %v1613_v35 = vadd.f32 %v1609_v6, %v1600_v27  ;;  %v1716_v4 = vadd.f32 %v1712_v38, %v1703_v29  ;;  %v1819_v52 = vadd.f32 %v1815_v42, %v1806_v39  ;;  %v6480_v42 = vld [vmem:[#allocation87_spill] sm:$0xff] }
 0x476   :  { %6471 = vst [vmem:[#allocation45_spill] sm:$0xff] %v5738_v31  ;;  %6473 = vst [vmem:[#allocation36_spill] sm:$0xff] %v5741_v54  ;;  %v5743_v58 = vadd.f32 %v1918_v5, %v1909_v11  ;;  %v1569_v41 = vmul.f32 %v5456_v46, %v1426_v37  ;;  %v1672_v2 = vmul.f32 %v5458_v28, %v1426_v37  ;;  %v1442_v46 = vpop.permute.xlu1 %1441  ;;  %v6481_v5 = vld [vmem:[#allocation80_spill] sm:$0xff] }
 0x477   :  { %v1775_v21 = vmul.f32 %v5462_v9, %v1426_v37  ;;  %v1878_v60 = vmul.f32 %v5464_v1, %v1426_v37  ;;  %v1981_v50 = vmul.f32 %v5466_v34, %v1426_v37  ;;  %v2084_v26 = vmul.f32 %v5470_v55, %v1426_v37  ;;  %v6475_v1 = vld [vmem:[#allocation84_spill] sm:$0xff] }
 0x478   :  { %6474 = vst [vmem:[#allocation46_spill] sm:$0xff] %v5743_v58  ;;  %v1508_v27 = vmul.f32 %v5499_v51, %v1434_v32  ;;  %v1595_v29 = vmul.f32 %v5501_v16, %v1434_v32  ;;  %v1698_v39 = vmul.f32 %v6452_v8, %v1434_v32  ;;  %v5756_v20 = vmul.f32 %v6454_v53, %v1434_v32  ;;  %v6476_v51 = vld [vmem:[#allocation88_spill] sm:$0xff]  ;;  %v6478_v8 = vld [vmem:[#allocation86_spill] sm:$0xff]  ;;  %v5776_v58 = vpop.permute.xlu0 %1451 }
 0x479   :  { %v5759_v28 = vmul.f32 %v5527_v0, %v1434_v32  ;;  %v5762_v9 = vmul.f32 %v5531_v44, %v1434_v32  ;;  %v5765_v34 = vmul.f32 %v5533_v3, %v1434_v32  ;;  %v1460_v55 = vmul.f32 %v6475_v1, %v1410_v47  ;;  %v6477_v16 = vld [vmem:[#allocation100_spill] sm:$0xff] }
 0x47a   :  { %v1547_v11 = vmul.f32 %v6476_v51, %v1410_v47  ;;  %v1650_v37 = vmul.f32 %v6477_v16, %v1410_v47  ;;  %v1753_v40 = vmul.f32 %v6478_v8, %v1410_v47  ;;  %v6479_v53 = vld [vmem:[#allocation104_spill] sm:$0xff]  ;;  %v1959_v0 = vmul.f32 %v6480_v42, %v1410_v47 }
 0x47b   :  { %v1856_v6 = vmul.f32 %v6479_v53, %v1410_v47  ;;  %v1473_v38 = vadd.f32 %v1469_v13, %v1460_v55  ;;  %v2062_v54 = vmul.f32 %v6481_v5, %v1410_v47  ;;  %v1521_v44 = vmul.f32 %v5472_v57, %v1442_v46 }
 0x47c   :  { %v1560_v56 = vadd.f32 %v1556_v33, %v1547_v11  ;;  %v1663_v3 = vadd.f32 %v1659_v61, %v1650_v37  ;;  %v1766_v32 = vadd.f32 %v1762_v15, %v1753_v40  ;;  %v1972_v25 = vadd.f32 %v1968_v48, %v1959_v0  ;;  %v1450_v33 = vpop.permute.xlu1 %1449  ;;  %v6490_v40 = vld [vmem:[#allocation79_spill] sm:$0xff] }
 0x47d   :  { %v1869_v31 = vadd.f32 %v1865_v14, %v1856_v6  ;;  %v1486_v1 = vadd.f32 %v1482_v63, %v1473_v38  ;;  %v2075_v51 = vadd.f32 %v2071_v22, %v2062_v54  ;;  %v1608_v16 = vmul.f32 %v5480_v36, %v1442_v46  ;;  %v6482_v36 = vld [vmem:[#allocation83_spill] sm:$0xff]  ;;  %v6488_v63 = vld [vmem:[#allocation48_spill] sm:$0xff] }
 0x47e   :  { %v1573_v8 = vadd.f32 %v1569_v41, %v1560_v56  ;;  %v1676_v53 = vadd.f32 %v1672_v2, %v1663_v3  ;;  %v1779_v13 = vadd.f32 %v1775_v21, %v1766_v32  ;;  %v1985_v42 = vadd.f32 %v1981_v50, %v1972_v25  ;;  %v6483_v56 = vld [vmem:[#allocation98_spill] sm:$0xff] }
 0x47f   :  { %v1882_v55 = vadd.f32 %v1878_v60, %v1869_v31  ;;  %v2088_v30 = vadd.f32 %v2084_v26, %v2075_v51  ;;  %v1711_v47 = vmul.f32 %v5482_v59, %v1442_v46  ;;  %v1814_v57 = vmul.f32 %v5484_v49, %v1442_v46  ;;  %v6484_v25 = vld [vmem:[#allocation38_spill] sm:$0xff]  ;;  %v6485_v59 = vld [vmem:[#allocation39_spill] sm:$0xff]  ;;  %v6486_v49 = vld [vmem:[#allocation101_spill] sm:$0xff] }
 0x480   :  { %v1917_v61 = vmul.f32 %v5487_v19, %v1442_v46  ;;  %v2020_v15 = vmul.f32 %v6470_v24, %v1442_v46  ;;  %v2123_v14 = vmul.f32 %v6472_v10, %v1442_v46  ;;  %v1535_v48 = vmul.f32 %v6482_v36, %v5776_v58  ;;  %v6487_v24 = vld [vmem:[#allocation65_spill] sm:$0xff]  ;;  %v6489_v46 = vld [vmem:[#allocation78_spill] sm:$0xff] }
 0x481   :  { %v1622_v22 = vmul.f32 %v6483_v56, %v5776_v58  ;;  %v1725_v60 = vmul.f32 %v6484_v25, %v5776_v58  ;;  %v1828_v31 = vmul.f32 %v6485_v59, %v5776_v58  ;;  %v5793_v54 = vmul.f32 %v6486_v49, %v5776_v58 }
 0x482   :  { %v5795_v19 = vadd.f32 %v1535_v48, %v1526_v62  ;;  %v5799_v10 = vmul.f32 %v6487_v24, %v5776_v58  ;;  %v1499_v41 = vadd.f32 %v6488_v63, %v1486_v1  ;;  %v1534_v2 = vmul.f32 %v6482_v36, %v1450_v33 }
 0x483   :  { %v5803_v21 = vadd.f32 %v1622_v22, %v1613_v35  ;;  %v5805_v50 = vadd.f32 %v1725_v60, %v1716_v4  ;;  %v5807_v26 = vadd.f32 %v1828_v31, %v1819_v52  ;;  %v1586_v11 = vadd.f32 %v6489_v46, %v1573_v8  ;;  %v6491_v52 = vld [vmem:[#allocation82_spill] sm:$0xff]  ;;  %v6492_v8 = vld [vmem:[#allocation77_spill] sm:$0xff] }
 0x484   :  { %v1512_v37 = vadd.f32 %v1508_v27, %v1499_v41  ;;  %v1621_v62 = vmul.f32 %v6483_v56, %v1450_v33  ;;  %v1689_v6 = vadd.f32 %v6490_v40, %v1676_v53  ;;  %v1724_v38 = vmul.f32 %v6484_v25, %v1450_v33  ;;  %v6493_v22 = vld [vmem:[#allocation89_spill] sm:$0xff] }
 0x485   :  { %v1630_v0 = vrot.slane %v5803_v21, 5  ;;  %v1733_v5 = vrot.slane %v5805_v50, 6  ;;  %v1836_v35 = vrot.slane %v5807_v26, 7  ;;  %v1599_v3 = vadd.f32 %v1595_v29, %v1586_v11 }
 0x486   :  { %v1525_v4 = vadd.f32 %v1521_v44, %v1512_v37  ;;  %v1702_v32 = vadd.f32 %v1698_v39, %v1689_v6  ;;  %v1792_v1 = vadd.f32 %v6491_v52, %v1779_v13  ;;  %v1827_v51 = vmul.f32 %v6485_v59, %v1450_v33  ;;  %v5825_v44 = vld [vmem:[#allocation13 + $0x30] ss:$0 sm:$0xff]  ;;  %v6496_v37 = vld [vmem:[#allocation64_spill] sm:$0xff] }
 0x487   :  { %v1612_v27 = vadd.f32 %v1608_v16, %v1599_v3  ;;  %v1895_v48 = vadd.f32 %v6492_v8, %v1882_v55  ;;  %v1930_v53 = vmul.f32 %v6486_v49, %v1450_v33  ;;  %v1998_v60 = vadd.f32 %v6493_v22, %v1985_v42  ;;  %v6494_v55 = vld [vmem:[#allocation90_spill] sm:$0xff]  ;;  %v6501_v8 = vld [vmem:[#allocation72_spill] sm:$0xff]  ;;  %v6503_v22 = vld [vmem:[#allocation95_spill] sm:$0xff] }
 0x488   :  { %v5821_v31 = vadd.f32 %v1534_v2, %v1525_v4  ;;  %v1715_v63 = vadd.f32 %v1711_v47, %v1702_v32  ;;  %v1805_v41 = vadd.f32 %v5756_v20, %v1792_v1  ;;  %v2033_v29 = vmul.f32 %v6487_v24, %v1450_v33  ;;  %v6495_v47 = vld [vmem:[#allocation85_spill] sm:$0xff]  ;;  %v1448_v32 = vpop.permute.xlu0 %1447 }
 0x489   :  { %v5827_v39 = vadd.f32 %v1621_v62, %v1612_v27  ;;  %v1908_v13 = vadd.f32 %v5759_v28, %v1895_v48  ;;  %v2011_v16 = vadd.f32 %v5762_v9, %v1998_v60  ;;  %v2101_v46 = vadd.f32 %v6494_v55, %v2088_v30  ;;  %v6497_v9 = vld [vmem:[#allocation67_spill] sm:$0xff]  ;;  %v6499_v27 = vld [vmem:[#allocation76_spill] sm:$0xff]  ;;  %v6502_v48 = vld [vmem:[#allocation53_spill] sm:$0xff] }
 0x48a   :  { %v5832_v11 = vadd.f32 %v1724_v38, %v1715_v63  ;;  %v1818_v42 = vadd.f32 %v1814_v57, %v1805_v41  ;;  %v2136_v2 = vmul.f32 %v5825_v44, %v1450_v33  ;;  %v1524_v20 = vadd.f32 %v6496_v37, %v6495_v47  ;;  %v6498_v30 = vld [vmem:[#allocation51_spill] sm:$0xff]  ;;  %v6504_v60 = vld [vmem:[#allocation54_spill] sm:$0xff] }
 0x48b   :  { %v1629_v40 = vrot.slane %v5827_v39, 5  ;;  %v1921_v6 = vadd.f32 %v1917_v61, %v1908_v13  ;;  %v2024_v3 = vadd.f32 %v2020_v15, %v2011_v16  ;;  %v2114_v62 = vadd.f32 %v5765_v34, %v2101_v46  ;;  %v6500_v61 = vld [vmem:[#allocation52_spill] sm:$0xff]  ;;  %v6505_v41 = vld [vmem:[#allocation63_spill] sm:$0xff]  ;;  %v6506_v13 = vld [vmem:[#allocation106_spill] sm:$0xff] }
 0x48c   :  { %v1732_v28 = vrot.slane %v5832_v11, 6  ;;  %v5840_v4 = vadd.f32 %v1827_v51, %v1818_v42  ;;  %v1611_v38 = vadd.f32 %v6498_v30, %v6497_v9  ;;  %v1627_v57 = vrot.slane %v5718_v12, 5  ;;  %v2546_v39 = vld [vmem:[#allocation20 + $0x20] sm:$0xff] }
 0x48d   :  { %v5845_v33 = vadd.f32 %v1930_v53, %v1921_v6  ;;  %v5847_v52 = vadd.f32 %v2033_v29, %v2024_v3  ;;  %v2127_v1 = vadd.f32 %v2123_v14, %v2114_v62  ;;  %v1714_v15 = vadd.f32 %v6500_v61, %v6499_v27 }
 0x48e   :  { %v1835_v34 = vrot.slane %v5840_v4, 7  ;;  %v1817_v51 = vadd.f32 %v6502_v48, %v6501_v8  ;;  %v1920_v63 = vadd.f32 %v6504_v60, %v6503_v22  ;;  %v2023_v12 = vadd.f32 %v6506_v13, %v6505_v41  ;;  %v6511_v48 = vld [vmem:[#allocation96_spill] sm:$0xff]  ;;  %v6512_v22 = vld [vmem:[#allocation73_spill] sm:$0xff]  ;;  %v6537_v4 = vld [vmem:[#allocation102_spill] sm:$0xff] }
 0x48f   :  { %v1938_v53 = vrot.slane %v5845_v33, 1  ;;  %v2041_v29 = vrot.slane %v5847_v52, 2  ;;  %v5860_v16 = vadd.f32 %v2136_v2, %v2127_v1  ;;  %v1533_v14 = vmul.f32 %v6482_v36, %v1448_v32 }
 0x490   :  { %v1620_v55 = vmul.f32 %v6483_v56, %v1448_v32  ;;  %v1723_v46 = vmul.f32 %v6484_v25, %v1448_v32  ;;  %v1826_v42 = vmul.f32 %v6485_v59, %v1448_v32  ;;  %v1929_v47 = vmul.f32 %v6486_v49, %v1448_v32  ;;  %v6507_v56 = vld [vmem:[#allocation62_spill] sm:$0xff] }
 0x491   :  { %v2144_v37 = vrot.slane %v5860_v16, 3  ;;  %v1537_v6 = vadd.f32 %v1533_v14, %v1524_v20  ;;  %v2032_v3 = vmul.f32 %v6487_v24, %v1448_v32  ;;  %v2135_v62 = vmul.f32 %v5825_v44, %v1448_v32 }
 0x492   :  { %v1624_v9 = vadd.f32 %v1620_v55, %v1611_v38  ;;  %v1727_v2 = vadd.f32 %v1723_v46, %v1714_v15  ;;  %v1830_v30 = vadd.f32 %v1826_v42, %v1817_v51  ;;  %v1933_v1 = vadd.f32 %v1929_v47, %v1920_v63  ;;  %v6524_v15 = vld [vmem:[#allocation107_spill] sm:$0xff] }
 0x493   :  { %v2036_v36 = vadd.f32 %v2032_v3, %v2023_v12  ;;  %v1536_v27 = vadd.f32 %v6507_v56, %v5702_v43  ;;  %v1634_v59 = vsel %vm753_vm0, %v1630_v0, %v1627_v57  ;;  %v6509_v49 = vrot.slane %v5726_v45, 6  ;;  %v6516_v45 = vld [vmem:[#allocation60_spill] sm:$0xff] }
 0x494   :  { %v1628_v20 = vrot.slane %v1624_v9, 5  ;;  %v1731_v38 = vrot.slane %v1727_v2, 6  ;;  %v1834_v32 = vrot.slane %v1830_v30, 7  ;;  %v1937_v61 = vrot.slane %v1933_v1, 1  ;;  %v6517_v2 = vld [vmem:[#allocation97_spill] sm:$0xff]  ;;  %v6518_v30 = vld [vmem:[#allocation59_spill] sm:$0xff] }
 0x495   :  { %v1737_v24 = vsel %vm857_vm2, %v1733_v5, %v6509_v49  ;;  %v1635_v8 = vsel %vm290_vm1, %v1634_v59, 0.0  ;;  %v1829_v51 = vadd.f32 %v6511_v48, %v5721_v18  ;;  %v1919_v60 = vadd.f32 %v6512_v22, %v5707_v17  ;;  %v6514_v18 = vld [vmem:[#allocation40_spill] sm:$0xff]  ;;  %v6515_v17 = vld [vmem:[#allocation99_spill] sm:$0xff]  ;;  %v6519_v59 = vld [vmem:[#allocation50_spill] sm:$0xff] }
 0x496   :  { %v1738_v43 = vsel %vm294_vm3, %v1737_v24, 0.0  ;;  %v1633_v63 = vsel %vm753_vm0, %v1627_v57, %v1628_v20  ;;  %v6513_v41 = vmov %v6509_v49  ;;  %v1941_v12 = vsel %vm1065_vm6, %v1937_v61, %v1938_v53 }
 0x497   :  { %v1736_v13 = vsel %vm857_vm2, %v6513_v41, %v1731_v38  ;;  %v1639_v14 = vadd.f32 %v1635_v8, %v1536_v27  ;;  %v1640_v55 = vadd.f32 %v1633_v63, %v1537_v6  ;;  %v1833_v46 = vrot.slane %v1829_v51, 7  ;;  %v6523_v41 = vld [vmem:[#allocation74_spill] sm:$0xff] }
 0x498   :  { %v5901_v42 = vadd.f32 %v6514_v18, %v1919_v60  ;;  %v2022_v47 = vadd.f32 %v6515_v17, %v5713_v23  ;;  %v2040_v3 = vrot.slane %v2036_v36, 2  ;;  %v2099_v9 = vadd.f32 %v6516_v45, %v5676_v7  ;;  %v6520_v36 = vld [vmem:[#allocation66_spill] sm:$0xff]  ;;  %v6525_v18 = vld [vmem:[#allocation57_spill] sm:$0xff] }
 0x499   :  { %v1742_v57 = vadd.f32 %v1738_v43, %v1639_v14  ;;  %v2100_v1 = vadd.f32 %v6518_v30, %v6517_v2  ;;  %v1743_v56 = vadd.f32 %v1736_v13, %v1640_v55  ;;  %v1840_v6 = vsel %vm961_vm4, %v1836_v35, %v1833_v46  ;;  %v6521_v7 = vld [vmem:[#allocation94_spill] sm:$0xff]  ;;  %v6522_v43 = vld [vmem:[#allocation91_spill] sm:$0xff] }
 0x49a   :  { %v1936_v27 = vrot.slane %v5901_v42, 1  ;;  %v5915_v49 = vadd.f32 %v6519_v59, %v2022_v47  ;;  %v1841_v23 = vsel %vm298_vm5, %v1840_v6, 0.0  ;;  %v2112_v24 = vadd.f32 %v6520_v36, %v2099_v9  ;;  %v6526_v30 = vld [vmem:[#allocation58_spill] sm:$0xff] }
 0x49b   :  { %v2113_v8 = vadd.f32 %v6521_v7, %v2100_v1  ;;  %v2134_v48 = vmul.f32 %v5825_v44, %v6522_v43  ;;  %v1845_v51 = vadd.f32 %v1841_v23, %v1742_v57  ;;  %v1839_v63 = vsel %vm961_vm4, %v1833_v46, %v1834_v32  ;;  %v6528_v36 = vld [vmem:[#allocation46_spill] sm:$0xff]  ;;  %v6530_v7 = vld [vmem:[#allocation45_spill] sm:$0xff]  ;;  %v2883_v43 = vld [vmem:[%s6101_s10] ss:$0 sm:$0xff] }
 0x49c   :  { %v1942_v22 = vsel %vm1065_vm6, %v1936_v27, %v1937_v61  ;;  %v2039_v60 = vrot.slane %v5915_v49, 2  ;;  %v2125_v13 = vadd.f32 %v6523_v41, %v2112_v24  ;;  %v1846_v55 = vadd.f32 %v1839_v63, %v1743_v56 }
 0x49d   :  { %v2126_v14 = vadd.f32 %v6524_v15, %v2113_v8  ;;  %v1945_v42 = vsel %vm303_vm8, %v1941_v12, 0.0  ;;  %v1948_v17 = vadd.f32 %v1942_v22, %v1845_v51  ;;  %v2044_v61 = vsel %vm1169_vm7, %v2040_v3, %v2041_v29  ;;  %v6531_v51 = vld [vmem:[#allocation108_spill] sm:$0xff] }
 0x49e   :  { %v2045_v47 = vsel %vm1169_vm7, %v2039_v60, %v2040_v3  ;;  %v1632_v46 = vsel %vm753_vm0, %v1628_v20, %v1629_v40  ;;  %v2138_v57 = vadd.f32 %v2134_v48, %v2125_v13  ;;  %v1949_v9 = vadd.f32 %v1945_v42, %v1846_v55  ;;  %v6532_v22 = vld [vmem:[#allocation92_spill] sm:$0xff]  ;;  %v6534_v42 = vld [vmem:[#allocation55_spill] sm:$0xff] }
 0x49f   :  { %v2139_v45 = vadd.f32 %v2135_v62, %v2126_v14  ;;  %v2048_v12 = vsel %vm307_vm13, %v2044_v61, 0.0  ;;  %v2051_v2 = vadd.f32 %v2045_v47, %v1948_v17  ;;  %v1637_v1 = vsel %vm292_vm9, %v1632_v46, 0.0 }
 0x4a0   :  { %v1735_v3 = vsel %vm857_vm2, %v1731_v38, %v1732_v28  ;;  %v1838_v20 = vsel %vm961_vm4, %v1834_v32, %v1835_v34  ;;  %v2142_v56 = vrot.slane %v2138_v57, 3  ;;  %v2052_v6 = vadd.f32 %v2048_v12, %v1949_v9  ;;  %v6529_v38 = vld [vmem:[#allocation44_spill] sm:$0xff] }
 0x4a1   :  { %v2143_v62 = vrot.slane %v2139_v45, 3  ;;  %v1641_v59 = vadd.f32 %v1637_v1, %v5821_v31  ;;  %v1740_v49 = vsel %vm296_vm10, %v1735_v3, 0.0  ;;  %vm6527_vm1 = vcmp.ge.s32.totalorder %v6526_v30, 1  ;;  %v6535_v9 = vld [vmem:[#allocation36_spill] sm:$0xff] }
 0x4a2   :  { %v1843_v23 = vsel %vm6527_vm1, %v1838_v20, 0.0  ;;  %v1935_v24 = vadd.f32 %v5793_v54, %v6528_v36  ;;  %v2025_v8 = vadd.f32 %v6530_v7, %v6529_v38  ;;  %v2102_v63 = vadd.f32 %v6532_v22, %v6531_v51  ;;  %v2553_v36 = vld [vmem:[#allocation20 + $0x58] sm:$0xff]  ;;  %v2554_v7 = vld [vmem:[#allocation20 + $0x60] sm:$0xff] }
 0x4a3   :  { %v2148_v32 = vsel %vm1273_vm11, %v2142_v56, %v2143_v62  ;;  %v2147_v31 = vsel %vm1273_vm11, %v2143_v62, %v2144_v37  ;;  %v1744_v48 = vadd.f32 %v1740_v49, %v1641_v59  ;;  %vm6533_vm3 = vcmp.lt.s32.totalorder %v6525_v18, 13  ;;  %v2550_v59 = vld [vmem:[#allocation20 + $0x40] sm:$0xff]  ;;  %v2551_v49 = vld [vmem:[#allocation20 + $0x48] sm:$0xff]  ;;  %v6030_v51 = vld [vmem:[#allocation5 + $0x8] sm:$0xff] }
 0x4a4   :  { %v2154_v54 = vadd.f32 %v2148_v32, %v2051_v2  ;;  %v2151_v41 = vsel %vm6533_vm3, %v2147_v31, 0.0  ;;  %v1939_v13 = vrot.slane %v1935_v24, 1  ;;  %v2038_v15 = vadd.f32 %v5799_v10, %v2025_v8  ;;  %v6027_v24 = vld [vmem:[#allocation5] sm:$0xff]  ;;  %v2555_v8 = vld [vmem:[#allocation20 + $0x68] sm:$0xff]  ;;  %v6033_v22 = vld [vmem:[#allocation5 + $0x10] sm:$0xff] }
 0x4a5   :  { %v2155_v14 = vadd.f32 %v2151_v41, %v2052_v6  ;;  %v1847_v55 = vadd.f32 %v1843_v23, %v1744_v48  ;;  %v2115_v17 = vadd.f32 %v6534_v42, %v2102_v63  ;;  %v2137_v47 = vmul.f32 %v5825_v44, %v5776_v58  ;;  %v2552_v23 = vld [vmem:[#allocation20 + $0x50] sm:$0xff]  ;;  %v2557_v48 = vld [vmem:[#allocation20 + $0x78] sm:$0xff]  ;;  %v6036_v63 = vld [vmem:[#allocation5 + $0x18] sm:$0xff] }
 0x4a6   :  { %v2165_v61 = vadd.f32 %v2883_v43, %v2154_v54  ;;  %v1940_v46 = vsel %vm1065_vm6, %v1938_v53, %v1939_v13  ;;  %v2042_v57 = vrot.slane %v2038_v15, 2  ;;  %v1631_v10 = vsel %vm753_vm0, %v1629_v40, %v1630_v0  ;;  %v2547_v40 = vld [vmem:[#allocation20 + $0x28] sm:$0xff]  ;;  %v2556_v31 = vld [vmem:[#allocation20 + $0x70] sm:$0xff]  ;;  %v2305_v54 = vld [vmem:[#allocation16] sm:$0xff] }
 0x4a7   :  { %v2166_v18 = vadd.f32 %v2883_v43, %v2155_v14  ;;  %v1950_v45 = vadd.f32 %v1940_v46, %v1847_v55  ;;  %v2128_v12 = vadd.f32 %v6535_v9, %v2115_v17  ;;  %v1642_v58 = vadd.f32 %v1631_v10, %v5795_v19  ;;  %v2306_v41 = vld [vmem:[#allocation16 + $0x8] sm:$0xff]  ;;  %v2307_v42 = vld [vmem:[#allocation16 + $0x10] sm:$0xff]  ;;  %v2308_v17 = vld [vmem:[#allocation16 + $0x18] sm:$0xff] }
 0x4a8   :  { %3197 = vmatprep.mubr.f32.mxu1 %v2165_v61  ;;  %v2043_v44 = vsel %vm1169_vm7, %v2041_v29, %v2042_v57  ;;  %v1734_v21 = vsel %vm857_vm2, %v1732_v28, %v1733_v5  ;;  %v1837_v19 = vsel %vm961_vm4, %v1835_v34, %v1836_v35  ;;  %v1943_v0 = vsel %vm1065_vm6, %v1939_v13, %v1936_v27  ;;  %v6536_v5 = vld [vmem:[#allocation41_spill] sm:$0xff]  ;;  %v2548_v29 = vld [vmem:[#allocation20 + $0x30] sm:$0xff]  ;;  %v2526_v13 = vld [vmem:[#allocation19] sm:$0xff] }
 0x4a9   :  { %3198 = vmatmul.mubr.f32.vlgmr.msra.gmra.mrb[4].mxu1 %v2166_v18  ;;  %v2053_v33 = vadd.f32 %v2043_v44, %v1950_v45  ;;  %v2141_v50 = vadd.f32 %v2137_v47, %v2128_v12  ;;  %v1745_v52 = vadd.f32 %v1734_v21, %v1642_v58  ;;  %v2046_v11 = vsel %vm1169_vm7, %v2042_v57, %v2039_v60  ;;  %v2549_v27 = vld [vmem:[#allocation20 + $0x38] sm:$0xff]  ;;  %v2527_v14 = vld [vmem:[#allocation19 + $0x8] sm:$0xff]  ;;  %v2528_v47 = vld [vmem:[#allocation19 + $0x10] sm:$0xff] }
 0x4aa   :  { %3550 = vmatpush3.bf16.msra.mxu1 %v6536_v5  ;;  %v3555_v53 = vpack.c.bf16 %v2547_v40, %v2546_v39  ;;  %v1947_v34 = vsel %vm305_vm15, %v1943_v0, 0.0  ;;  %v2050_v3 = vsel %vm309_vm14, %v2046_v11, 0.0  ;;  %v3559_v62 = vpack.c.bf16 %v2549_v27, %v2548_v29  ;;  %v2529_v46 = vld [vmem:[#allocation19 + $0x18] sm:$0xff]  ;;  %v2309_v57 = vld [vmem:[#allocation16 + $0x20] sm:$0xff]  ;;  %v2310_v10 = vld [vmem:[#allocation16 + $0x28] sm:$0xff] }
 0x4ab   :  { %v2145_v26 = vrot.slane %v2141_v50, 3  ;;  %v1848_v28 = vadd.f32 %v1837_v19, %v1745_v52  ;;  %3552 = vmatprep.subr.bf16.mxu1 %v6537_v4  ;;  %v3567_v38 = vpack.c.bf16 %v2553_v36, %v2552_v23  ;;  %v3571_v32 = vpack.c.bf16 %v2555_v8, %v2554_v7  ;;  %v2530_v9 = vld [vmem:[#allocation19 + $0x20] sm:$0xff]  ;;  %v2531_v12 = vld [vmem:[#allocation19 + $0x28] sm:$0xff]  ;;  %v2311_v58 = vld [vmem:[#allocation16 + $0x30] sm:$0xff] }
 0x4ac   :  { %v3515_v15 = vpack.c.bf16 %v2306_v41, %v2305_v54  ;;  %v3579_v55 = vpack.c.bf16 %v2527_v14, %v2526_v13  ;;  %v3519_v61 = vpack.c.bf16 %v2308_v17, %v2307_v42  ;;  %v3583_v18 = vpack.c.bf16 %v2529_v46, %v2528_v47  ;;  %v2312_v21 = vld [vmem:[#allocation16 + $0x38] sm:$0xff]  ;;  %v2532_v19 = vld [vmem:[#allocation19 + $0x30] sm:$0xff]  ;;  %v2314_v50 = vld [vmem:[#allocation16 + $0x48] sm:$0xff] }
 0x4ad   :  { %v2146_v2 = vsel %vm1273_vm11, %v2144_v37, %v2145_v26  ;;  %v1951_v30 = vadd.f32 %v1947_v34, %v1848_v28  ;;  %v2149_v60 = vsel %vm1273_vm11, %v2145_v26, %v2142_v56  ;;  %v3563_v56 = vpack.c.bf16 %v2551_v49, %v2550_v59  ;;  %v2533_v0 = vld [vmem:[#allocation19 + $0x38] sm:$0xff]  ;;  %v2534_v52 = vld [vmem:[#allocation19 + $0x40] sm:$0xff]  ;;  %v2535_v11 = vld [vmem:[#allocation19 + $0x48] sm:$0xff] }
 0x4ae   :  { %v2156_v1 = vadd.f32 %v2146_v2, %v2053_v33  ;;  %3554 = vmatpush3.bf16.msra.mxu1 %v6537_v4  ;;  %v2153_v16 = vsel %vm313_vm12, %v2149_v60, 0.0  ;;  %3516 = vmatprep.subr.bf16.mxu0 %v3515_v15  ;;  %v3523_v45 = vpack.c.bf16 %v2310_v10, %v2309_v57  ;;  %v3587_v44 = vpack.c.bf16 %v2531_v12, %v2530_v9  ;;  %v2313_v33 = vld [vmem:[#allocation16 + $0x40] sm:$0xff]  ;;  %v2315_v28 = vld [vmem:[#allocation16 + $0x50] sm:$0xff]  ;;  %v2316_v4 = vld [vmem:[#allocation16 + $0x58] sm:$0xff] }
 0x4af   :  { %v2054_v20 = vadd.f32 %v2050_v3, %v1951_v30  ;;  %3556 = vmatprep.subr.bf16.mxu1 %v3555_v53  ;;  %3518 = vmatpush3.bf16.msra.mxu0 %v3515_v15  ;;  %v3527_v39 = vpack.c.bf16 %v2312_v21, %v2311_v58  ;;  %v3591_v40 = vpack.c.bf16 %v2533_v0, %v2532_v19  ;;  %v2537_v35 = vld [vmem:[#allocation19 + $0x58] sm:$0xff]  ;;  %v2317_v27 = vld [vmem:[#allocation16 + $0x60] sm:$0xff]  ;;  %v2318_v2 = vld [vmem:[#allocation16 + $0x68] sm:$0xff] }
 0x4b0   :  { %v2167_v6 = vadd.f32 %v2883_v43, %v2156_v1  ;;  %3520 = vmatprep.subr.bf16.mxu0 %v3519_v61  ;;  %v3531_v5 = vpack.c.bf16 %v2314_v50, %v2313_v33  ;;  %v3595_v26 = vpack.c.bf16 %v2535_v11, %v2534_v52  ;;  %v3535_v34 = vpack.c.bf16 %v2316_v4, %v2315_v28  ;;  %v2538_v30 = vld [vmem:[#allocation19 + $0x60] sm:$0xff]  ;;  %v2539_v60 = vld [vmem:[#allocation19 + $0x68] sm:$0xff]  ;;  %v3667_v46 = vld [vmem:[#allocation2] sm:$0xff] }
 0x4b1   :  { %v2157_v37 = vadd.f32 %v2153_v16, %v2054_v20  ;;  %v3539_v1 = vpack.c.bf16 %v2318_v2, %v2317_v27  ;;  %v3603_v3 = vpack.c.bf16 %v2539_v60, %v2538_v30  ;;  %v2319_v20 = vld [vmem:[#allocation16 + $0x70] sm:$0xff]  ;;  %v2541_v16 = vld [vmem:[#allocation19 + $0x78] sm:$0xff]  ;;  %v3668_v21 = vld [vmem:[#allocation2 + $0x10] sm:$0xff] }
 0x4b2   :  { %3200 = vmatprep.mubr.f32.mxu1 %v2167_v6  ;;  %3558 = vmatpush3.bf16.msra.mxu1 %v3555_v53  ;;  %v2536_v53 = vld [vmem:[#allocation19 + $0x50] sm:$0xff] }
 0x4b3   :  { %v2168_v25 = vadd.f32 %v2883_v43, %v2157_v37  ;;  %3560 = vmatprep.subr.bf16.mxu1 %v3559_v62  ;;  %v3575_v43 = vpack.c.bf16 %v2557_v48, %v2556_v31  ;;  %3522 = vmatpush3.bf16.msra.mxu0 %v3519_v61  ;;  %v3599_v29 = vpack.c.bf16 %v2537_v35, %v2536_v53  ;;  %v2540_v6 = vld [vmem:[#allocation19 + $0x70] sm:$0xff] }
 0x4b4   :  { %3524 = vmatprep.subr.bf16.mxu0 %v3523_v45  ;;  %v3607_v49 = vpack.c.bf16 %v2541_v16, %v2540_v6  ;;  %v2884_v37 = vld [vmem:[%s6103_s12] ss:$0 sm:$0xff] }
 0x4b5   :  { %3201 = vmatmul.mubr.f32.gmra.mrb[6].mxu1 %v2168_v25  ;;  %v2890_v33 = vld [vmem:[%s6109_s18] ss:$0 sm:$0xff]  ;;  %s3933_s18 = scalar_lea.vmem %s2749_s26, 512 }
 0x4b6   :  { %3562 = vmatpush3.bf16.msra.mxu1 %v3559_v62  ;;  %3311 = vmatprep.mubr.f32.mxu1 %v6027_v24  ;;  %v2320_v62 = vld [vmem:[#allocation16 + $0x78] sm:$0xff]  ;;  %p3934_p12 = scmp.ne.s32.totalorder %s2749_s26, %s3933_s18  ;;  %p3939_p0 = scmp.lt.s32.totalorder %s3933_s18, %s3933_s18 }
 0x4b7   :  { %3564 = vmatprep.subr.bf16.mxu1 %v3563_v56  ;;  %3526 = vmatpush3.bf16.msra.mxu0 %v3523_v45  ;;  %v3543_v59 = vpack.c.bf16 %v2320_v62, %v2319_v20  ;;  %v6539_v45 = vld [vmem:[#allocation37_spill] sm:$0xff] }
 0x4b8   :  { %3528 = vmatprep.subr.bf16.mxu0 %v3527_v39  ;;  %p3940_p1 = por %p3939_p0, %p3938_p13 }
 0x4ba   :  { %3566 = vmatpush3.bf16.msra.mxu1 %v3563_v56  ;;  %p3941_p2 = pnand %p3940_p1, %p3934_p12 }
 0x4bb   :  { %3568 = vmatprep.subr.bf16.mxu1 %v3567_v38  ;;  %3530 = vmatpush3.bf16.msra.mxu0 %v3527_v39  ;;  %v6540_v39 = vld [vmem:[#allocation68_spill] sm:$0xff] }
 0x4bc   :  { %3532 = vmatprep.subr.bf16.mxu0 %v3531_v5 }
 0x4be   :  { %3570 = vmatpush3.bf16.msra.mxu1 %v3567_v38 }
 0x4bf   :  { %3572 = vmatprep.subr.bf16.mxu1 %v3571_v32  ;;  %3534 = vmatpush3.bf16.msra.mxu0 %v3531_v5 }
 0x4c0   :  { %3536 = vmatprep.subr.bf16.mxu0 %v3535_v34 }
 0x4c2   :  { %3574 = vmatpush3.bf16.msra.mxu1 %v3571_v32 }
 0x4c3   :  { %3576 = vmatprep.subr.bf16.mxu1 %v3575_v43  ;;  %3538 = vmatpush3.bf16.msra.mxu0 %v3535_v34 }
 0x4c4   :  { %3540 = vmatprep.subr.bf16.mxu0 %v3539_v1 }
 0x4c6   :  { %3578 = vmatpush3.bf16.msra.mxu1 %v3575_v43 }
 0x4c7   :  { %3580 = vmatprep.subr.bf16.mxu1 %v3579_v55  ;;  %3542 = vmatpush3.bf16.msra.mxu0 %v3539_v1 }
 0x4c8   :  { %3544 = vmatprep.subr.bf16.mxu0 %v3543_v59 }
 0x4c9   :  { %3312 = vmatmul.mubr.f32.vlgmr.msra.gmra.mrb[8].mxu1 %v6030_v51 }
 0x4ca   :  { %3314 = vmatprep.mubr.f32.mxu1 %v6033_v22  ;;  %3582 = vmatpush3.bf16.msra.mxu1 %v3579_v55 }
 0x4cb   :  { %3584 = vmatprep.subr.bf16.mxu1 %v3583_v18  ;;  %3546 = vmatpush3.bf16.msra.mxu0 %v3543_v59 }
 0x4cd   :  { %3315 = vmatmul.mubr.f32.gmra.mrb[10].mxu1 %v6036_v63 }
 0x4ce   :  { %3586 = vmatpush3.bf16.msra.mxu1 %v3583_v18 }
 0x4cf   :  { %3588 = vmatprep.subr.bf16.mxu1 %v3587_v44 }
 0x4d2   :  { %3590 = vmatpush3.bf16.msra.mxu1 %v3587_v44 }
 0x4d3   :  { %3592 = vmatprep.subr.bf16.mxu1 %v3591_v40 }
 0x4d6   :  { %3594 = vmatpush3.bf16.msra.mxu1 %v3591_v40 }
 0x4d7   :  { %3596 = vmatprep.subr.bf16.mxu1 %v3595_v26 }
 0x4da   :  { %3598 = vmatpush3.bf16.msra.mxu1 %v3595_v26 }
 0x4db   :  { %3600 = vmatprep.subr.bf16.mxu1 %v3599_v29 }
 0x4de   :  { %3602 = vmatpush3.bf16.msra.mxu1 %v3599_v29 }
 0x4df   :  { %3604 = vmatprep.subr.bf16.mxu1 %v3603_v3 }
 0x4e2   :  { %3606 = vmatpush3.bf16.msra.mxu1 %v3603_v3 }
 0x4e3   :  { %3608 = vmatprep.subr.bf16.mxu1 %v3607_v49 }
 0x4e6   :  { %3610 = vmatpush3.bf16.msra.mxu1 %v3607_v49 }
 0x57c   :  { %v3199_v25 = vpop.f32.mrb[4].mxu1 }
 0x57d   :  { %v2264_v56 = vadd.f32 %v3199_v25, %v2884_v37  ;;  %v2258_v23 = vpop.f32.mrb[5].mxu1 }
 0x57e   :  { %v2259_v36 = vadd.f32 %v2884_v37, %v2258_v23 }
 0x57f   :  { %v2886_v38 = vmul.f32 -1.442695, %v2264_v56 }
 0x580   :  { %v2885_v7 = vmul.f32 -1.442695, %v2259_v36 }
 0x581   :  { %3644 = vpow2.f32 %v2886_v38 }
 0x582   :  { %3646 = vpow2.f32 %v2885_v7 }
 0x588   :  { %v3202_v8 = vpop.f32.mrb[6].mxu1 }
 0x589   :  { %v2274_v32 = vadd.f32 %v3202_v8, %v2884_v37  ;;  %v2268_v31 = vpop.f32.mrb[7].mxu1 }
 0x58a   :  { %v2269_v48 = vadd.f32 %v2884_v37, %v2268_v31 }
 0x58b   :  { %v3645_v43 = vpop.eup %3644  ;;  %v2888_v54 = vmul.f32 -1.442695, %v2274_v32 }
 0x58c   :  { %v3647_v41 = vpop.eup %3646  ;;  %v2290_v13 = vadd.f32 1.0, %v3645_v43  ;;  %v2887_v15 = vmul.f32 -1.442695, %v2269_v48 }
 0x58d   :  { %v2289_v14 = vadd.f32 1.0, %v3647_v41  ;;  %3648 = vpow2.f32 %v2888_v54 }
 0x58e   :  { %3650 = vrcp.f32 %v2290_v13 }
 0x58f   :  { %3652 = vrcp.f32 %v2289_v14 }
 0x590   :  { %3654 = vpow2.f32 %v2887_v15 }
 0x597   :  { %v3649_v55 = vpop.eup %3648 }
 0x598   :  { %v3651_v42 = vpop.eup %3650  ;;  %v2292_v17 = vadd.f32 1.0, %v3649_v55 }
 0x599   :  { %v3653_v47 = vpop.eup %3652  ;;  %v2302_v9 = vmul.f32 %v6539_v45, %v3651_v42  ;;  %v2523_v12 = vmul.f32 %v6030_v51, %v3651_v42  ;;  %v2889_v51 = vld [vmem:[%s6106_s15] ss:$0 sm:$0xff]  ;;  %s4015_s15 = smov [#allocation23]  }
 0x59a   :  { %v3655_v61 = vpop.eup %3654  ;;  %v2301_v57 = vmul.f32 %v3667_v46, %v3653_v47  ;;  %v2522_v10 = vmul.f32 %v6027_v24, %v3653_v47  ;;  %3656 = vrcp.f32 %v2292_v17  ;;  %s2760_s9 = sshll.u32 %s4015_s15, 4  ;;  %s6054_s9 = int_to_ptr.vmem [resolvable:$true] %s2760_s9 }
 0x59b   :  { %v2291_v18 = vadd.f32 1.0, %v3655_v61 }
 0x59c   :  { %3273 = vmatprep.mubr.f32.mxu0 %v2301_v57  ;;  %3349 = vmatprep.mubr.f32.mxu1 %v2522_v10 }
 0x59d   :  { %3658 = vrcp.f32 %v2291_v18  ;;  %3274 = vmatmul.mubr.f32.vlgmr.msra.gmra.mrb[4].mxu0 %v2302_v9  ;;  %3350 = vmatmul.mubr.f32.vlgmr.msra.gmra.mrb[8].mxu1 %v2523_v12 }
 0x5a4   :  { %v3657_v58 = vpop.eup %3656 }
 0x5a5   :  { %v2304_v40 = vmul.f32 %v6540_v39, %v3657_v58  ;;  %v2525_v24 = vmul.f32 %v6036_v63, %v3657_v58 }
 0x5a7   :  { %v3659_v44 = vpop.eup %3658 }
 0x5a8   :  { %v2303_v19 = vmul.f32 %v3668_v21, %v3659_v44  ;;  %v2524_v0 = vmul.f32 %v6033_v22, %v3659_v44 }
 0x5aa   :  { %3276 = vmatprep.mubr.f32.mxu0 %v2303_v19  ;;  %3352 = vmatprep.mubr.f32.mxu1 %v2524_v0 }
 0x5ab   :  { %3277 = vmatmul.mubr.f32.gmra.mrb[6].mxu0 %v2304_v40  ;;  %3353 = vmatmul.mubr.f32.gmra.mrb[10].mxu1 %v2525_v24 }
 0x670   :  { %v3275_v50 = vpop.f32.mrb[4].mxu0  ;;  %v3351_v52 = vpop.f32.mrb[8].mxu1 }
 0x671   :  { %v2515_v11 = vadd.f32 %v3275_v50, %v2889_v51  ;;  %v2736_v22 = vadd.f32 %v3351_v52, %v2890_v33  ;;  %v2488_v5 = vpop.f32.mrb[5].mxu0  ;;  %v2709_v26 = vpop.f32.mrb[9].mxu1 }
 0x672   :  { %v2514_v28 = vadd.f32 %v2889_v51, %v2488_v5  ;;  %v2735_v63 = vadd.f32 %v2890_v33, %v2709_v26 }
 0x673   :  { %2519 = vst [vmem:[#allocation22 + $0x8] sm:$0xff] %v2515_v11  ;;  %2740 = vst [vmem:[#allocation23 + $0x8] sm:$0xff] %v2736_v22 }
 0x674   :  { %2518 = vst [vmem:[#allocation22] sm:$0xff] %v2514_v28  ;;  %2739 = vst [vmem:[#allocation23] sm:$0xff] %v2735_v63 }
 0x67e   :  { %v3278_v4 = vpop.f32.mrb[6].mxu0  ;;  %v3354_v53 = vpop.f32.mrb[10].mxu1 }
 0x67f   :  { %v2517_v35 = vadd.f32 %v3278_v4, %v2889_v51  ;;  %v2738_v34 = vadd.f32 %v3354_v53, %v2890_v33  ;;  %v2498_v29 = vpop.f32.mrb[7].mxu0  ;;  %v2719_v27 = vpop.f32.mrb[11].mxu1 }
 0x680   :  { %v2516_v2 = vadd.f32 %v2889_v51, %v2498_v29  ;;  %v2737_v30 = vadd.f32 %v2890_v33, %v2719_v27 }
 0x681   :  { %2521 = vst [vmem:[#allocation22 + $0x18] sm:$0xff] %v2517_v35  ;;  %2742 = vst [vmem:[#allocation23 + $0x18] sm:$0xff] %v2738_v34 }
 0x682   :  { %2520 = vst [vmem:[#allocation22 + $0x10] sm:$0xff] %v2516_v2  ;;  %2741 = vst [vmem:[#allocation23 + $0x10] sm:$0xff] %v2737_v30 }
 0x683   :  { %3944 = shalt.err (!%p3941_p2)
}
 0x684   :  { %s6541_s16 = sld [smem:[#allocation114_spill]] }
 0x68a   :  { %s3945_s1 = scalar_lea.hbm %s6541_s16, 512 }
 0x68b   :  { %p3946_p3 = scmp.ne.s32.totalorder %s6541_s16, %s3945_s1  ;;  %p3949_p4 = scmp.lt.u32.totalorder %s3945_s1, %s6541_s16 }
 0x68d   :  { %p3951_p5 = pnand %p3949_p4, %p3946_p3 }
 0x68f   :  { %3954 = shalt.err (!%p3951_p5)
}
 0x690   :  { %2754 = dma.vmem_to_hbm [thread:$0]  %s2749_s26, 512, %s6541_s16, [#allocation4], %s3997_s0, %s3997_s0, %s3998_s21  }
 0x691   :  { %s3955_s11 = scalar_lea.vmem %s6054_s9, 512  ;;  %p3960_p7 = scmp.lt.s32.totalorder %s6054_s9, %s6054_s9 }
 0x692   :  { %p3956_p6 = scmp.ne.s32.totalorder %s6054_s9, %s3955_s11  ;;  %p3961_p8 = scmp.lt.s32.totalorder %s3955_s11, %s3955_s11 }
 0x694   :  { %p3962_p9 = por %p3961_p8, %p3960_p7 }
 0x696   :  { %p3963_p10 = pnand %p3962_p9, %p3956_p6 }
 0x698   :  { %3966 = shalt.err (!%p3963_p10)
}
 0x699   :  { %s6542_s28 = sld [smem:[#allocation115_spill]] }
 0x69f   :  { %s3967_s6 = scalar_lea.hbm %s6542_s28, 512 }
 0x6a0   :  { %p3968_p11 = scmp.ne.s32.totalorder %s6542_s28, %s3967_s6  ;;  %p3971_p12 = scmp.lt.u32.totalorder %s3967_s6, %s6542_s28 }
 0x6a2   :  { %p3973_p13 = pnand %p3971_p12, %p3968_p11 }
 0x6a4   :  { %3976 = shalt.err (!%p3973_p13)
}
 0x6a5   :  { %2766 = dma.vmem_to_hbm [thread:$0]  %s6054_s9, 512, %s6542_s28, [#allocation24], %s3997_s0, %s3997_s0, %s3998_s21  }
 0x6a6   :  { %3991 = dma.done.wait [#allocation4], 512  }
 0x6a7   :  { %3992 = vsyncadd [#allocation4], 4294966784 }
 0x6a8   :  { %3993 = dma.done.wait [#allocation24], 512  }
 0x6a9   :  { %3994 = vsyncadd [#allocation24], 4294966784 }
 0x6aa   :  { %2773 = vsyncpa [#allocation3], 1 }
 0x6ab   :  { %2774 = vsyncpa [#allocation6], 1 }
 0x6ac   :  { %2775 = vsyncpa [#allocation9], 1 }
 0x6ad   :  { %2776 = vsyncpa [#allocation12], 1 }
 0x6ae   :  { %2777 = vsyncpa [#allocation15], 1 }
 0x6af   :  { %2778 = vsyncpa [#allocation18], 1 }
 0x6b0   :  { %2779 = vsyncpa [#allocation21], 1 }
 0x6b1   :  { %2780 = vsyncpa [#allocation4], 1 }
 0x6b2   :  { %2781 = vsyncpa [#allocation24], 1 }

</bundles_post_ra>
